<compile_context>
chip_gen: v7x
topology: tpu7x:2x2x1
jax: 0.10.0
libtpu: 0.0.40
codegen_flags: <defaults>
</compile_context>

<pallas_src>
import jax
import jax.numpy as jnp
from jax.experimental import pallas as pl
from jax.experimental.pallas import tpu as pltpu

_LANE = 128
_SUBLANE = 8


def _round_up(x, m):
    return (x + m - 1) // m * m


def _leaky_relu(x, slope=0.2):
    # max(x, slope*x) == LeakyReLU(slope) for 0 < slope < 1 (2 VALU ops).
    return jnp.maximum(x, slope * x)


def encoder_kernel(x_ref, w1_ref, b1_ref, w2_ref, b2_ref, w3_ref, b3_ref, o_ref):
    # x_ref: (TB, D_in) input dtype; w*_ref: (K, N) bf16; b*_ref: (1, N) f32;
    # o_ref: (TB, D_out_p) f32.
    x = x_ref[...].astype(jnp.bfloat16)           # cast on VPU; HBM stream stays f32-only
    h1 = jnp.dot(x, w1_ref[...], preferred_element_type=jnp.float32)
    h1 = _leaky_relu(h1 + b1_ref[...])            # f32 elementwise (VPU)

    h2 = jnp.dot(h1.astype(jnp.bfloat16), w2_ref[...],
                 preferred_element_type=jnp.float32)
    h2 = _leaky_relu(h2 + b2_ref[...])

    out = jnp.dot(h2.astype(jnp.bfloat16), w3_ref[...],
                  preferred_element_type=jnp.float32)
    o_ref[...] = (out + b3_ref[...]).astype(o_ref.dtype)


def _resident_spec(shape):
    # Constant block index -> fetched once; Buffered(1) avoids allocating a
    # second (never used) VMEM copy of the weights/biases.
    zeros = (0,) * len(shape)
    return pl.BlockSpec(shape, lambda i, z=zeros: z,
                        pipeline_mode=pl.Buffered(buffer_count=1))


def _vmem_cap_bytes():
    # Leave headroom below physical VMEM for Mosaic-internal scratch/spills.
    # (Matters on v7x where physical VMEM is only 64 MiB per TensorCore.)
    try:
        phys = int(pltpu.get_tpu_info().vmem_capacity_bytes)
    except Exception:
        phys = 64 << 20            # conservative fallback = smallest (v7x) VMEM
    return int(phys * 7 // 8)


def _vmem_limit_bytes(tile_b, d_in, d_h1, d_h2, d_out_p, x_itemsize, x_buffers):
    bf16, f32 = 2, 4
    d_in_l = _round_up(d_in, _LANE)                                    # VMEM lane padding
    weights = (d_in_l * d_h1 + d_h1 * d_h2 + d_h2 * d_out_p) * bf16    # single-buffered
    biases = (d_h1 + d_h2 + d_out_p) * f32
    x_bufs = x_buffers * tile_b * d_in_l * x_itemsize                  # pipelined input
    o_bufs = 2 * tile_b * d_out_p * f32                                # double-buffered out
    acts = tile_b * (d_h1 + d_h2) * (f32 + bf16)                       # intermediates (generous)
    needed = weights + biases + x_bufs + o_bufs + acts
    return int(max(32 << 20, min(2 * needed, _vmem_cap_bytes())))


def _batch_tiling(B, tile_b=None):
    """Pick (tile_b, padded_B). Keeps >=2 grid steps whenever B > 128."""
    if tile_b is None:
        if B > 128:
            # 128..512 in multiples of 128: full MXU rows on v5e, amortizes
            # per-step overhead on v6e/v7x, and ceil(B/2) keeps >=2 grid steps
            # so both v7x TensorCores get work.
            tile_b = min(max(_round_up(-(-B // 2), _LANE), _LANE), 4 * _LANE)
        else:
            tile_b = _round_up(max(B, 1), _SUBLANE)
    else:
        tile_b = max(_SUBLANE, _round_up(tile_b, _SUBLANE))
    # Ragged last blocks are fine (OOB rows ignored / dropped); only pad when a
    # single block would exceed the whole batch.
    b_pad = tile_b if B < tile_b else B
    return tile_b, b_pad


def encoder_forward(img, params, *, tile_b=None):
    """img: any shape with leading batch dim; flattened to (B, D_in) like img.view(B, -1).

    Returns float32 latents of shape (B, latent_dim). Wrap in jax.jit (as done
    in __main__) so the tiny weight casts / output slice fuse with the kernel.
    """
    w1, b1, w2, b2, w3, b3 = params
    B = img.shape[0]
    x = img.reshape(B, -1)
    d_in, d_h1 = w1.shape
    d_h2 = w2.shape[1]
    d_out = w3.shape[1]
    assert x.shape[1] == d_in, (x.shape, d_in)
    assert d_h1 % _LANE == 0 and d_h2 % _LANE == 0

    tile_b, b_pad = _batch_tiling(B, tile_b)
    d_out_p = _round_up(d_out, _LANE)            # lane-dense output (unmasked vst)
    grid = (pl.cdiv(b_pad, tile_b),)

    if b_pad != B:                               # only for batches smaller than one tile
        x = jnp.zeros((b_pad, d_in), x.dtype).at[:B].set(x)

    # Weights in bf16 (halves residency + HBM bytes), biases in f32. Zero padding
    # of W3 columns / b3 entries is exact; padded output columns are sliced off.
    w1_b = w1.astype(jnp.bfloat16)
    w2_b = w2.astype(jnp.bfloat16)
    if d_out_p != d_out:
        w3_b = jnp.zeros((d_h2, d_out_p), jnp.bfloat16).at[:, :d_out].set(
            w3.astype(jnp.bfloat16))
        b3_r = jnp.zeros((1, d_out_p), jnp.float32).at[:, :d_out].set(
            b3.reshape(1, d_out).astype(jnp.float32))
    else:
        w3_b = w3.astype(jnp.bfloat16)
        b3_r = b3.reshape(1, d_out).astype(jnp.float32)
    b1_r = b1.reshape(1, d_h1).astype(jnp.float32)
    b2_r = b2.reshape(1, d_h2).astype(jnp.float32)

    # 3-deep x pipeline only when the grid is long enough to benefit (v6e is
    # slightly DMA-exposed at tile_b=128); otherwise default double-buffering.
    x_buffers = 3 if grid[0] >= 3 else 2
    if x_buffers == 3:
        x_spec = pl.BlockSpec((tile_b, d_in), lambda i: (i, 0),
                              pipeline_mode=pl.Buffered(buffer_count=3))
    else:
        x_spec = pl.BlockSpec((tile_b, d_in), lambda i: (i, 0))

    flops = 2 * grid[0] * tile_b * (d_in * d_h1 + d_h1 * d_h2 + d_h2 * d_out_p)
    bytes_accessed = (b_pad * d_in * x.dtype.itemsize
                      + 2 * (d_in * d_h1 + d_h1 * d_h2 + d_h2 * d_out_p)
                      + 4 * (d_h1 + d_h2 + d_out_p)
                      + 4 * b_pad * d_out_p)

    out_p = pl.pallas_call(
        encoder_kernel,
        out_shape=jax.ShapeDtypeStruct((b_pad, d_out_p), jnp.float32),
        grid_spec=pltpu.PrefetchScalarGridSpec(
            num_scalar_prefetch=0,
            grid=grid,
            in_specs=[
                x_spec,                                 # x tile (pipelined)
                _resident_spec((d_in, d_h1)),           # W1 (unpadded K)
                _resident_spec((1, d_h1)),              # b1
                _resident_spec((d_h1, d_h2)),           # W2
                _resident_spec((1, d_h2)),              # b2
                _resident_spec((d_h2, d_out_p)),        # W3
                _resident_spec((1, d_out_p)),           # b3
            ],
            out_specs=pl.BlockSpec((tile_b, d_out_p), lambda i: (i, 0)),
        ),
        compiler_params=pltpu.CompilerParams(
            dimension_semantics=("parallel",),
            vmem_limit_bytes=_vmem_limit_bytes(
                tile_b, d_in, d_h1, d_h2, d_out_p, x.dtype.itemsize, x_buffers),
        ),
        cost_estimate=pl.CostEstimate(
            flops=int(flops), transcendentals=0, bytes_accessed=int(bytes_accessed)),
    )(x, w1_b, b1_r, w2_b, b2_r, w3_b, b3_r)

    return out_p[:B, :d_out]                     # always f32 latents


def init_params(key, img_size, latent_dim, dtype=jnp.float32):
    """Deterministic synthetic init (uniform, PyTorch-Linear-like scaling)."""
    d_in = img_size * img_size
    dims = [(d_in, 512), (512, 256), (256, latent_dim)]
    params = []
    for fan_in, fan_out in dims:
        kw, kb, key = jax.random.split(key, 3)
        bound = 1.0 / (fan_in ** 0.5)
        w = jax.random.uniform(kw, (fan_in, fan_out), dtype, -bound, bound)
        b = jax.random.uniform(kb, (1, fan_out), dtype, -bound, bound)
        params += [w, b]
    return tuple(params)


def encoder_reference(img, params, *, emulate_bf16=False):
    """Pure-JAX reference. emulate_bf16=True mimics the kernel's bf16 MXU operands."""
    w1, b1, w2, b2, w3, b3 = params
    x = img.reshape(img.shape[0], -1).astype(jnp.float32)

    def cast(a):
        return a.astype(jnp.bfloat16).astype(jnp.float32) if emulate_bf16 else a

    prec = jax.lax.Precision.HIGHEST
    h1 = _leaky_relu(jnp.dot(cast(x), cast(w1), precision=prec) + b1)
    h2 = _leaky_relu(jnp.dot(cast(h1), cast(w2), precision=prec) + b2)
    return jnp.dot(cast(h2), cast(w3), precision=prec) + b3


def _check(out, img, params):
    # Tight check vs a reference using the same bf16 operands / f32 accumulation.
    ref_bf16 = encoder_reference(img, params, emulate_bf16=True)
    assert jnp.allclose(out, ref_bf16, atol=2e-3, rtol=2e-3), \
        "mismatch vs bf16-emulated reference"
    # Loose sanity check vs the full-f32 reference (bf16 rounding ~1% rel).
    ref_f32 = encoder_reference(img, params, emulate_bf16=False)
    rel = jnp.max(jnp.abs(out - ref_f32)) / (jnp.max(jnp.abs(ref_f32)) + 1e-9)
    assert rel < 5e-2, f"rel err vs f32 reference too large: {rel}"


if __name__ == "__main__":
    fwd = jax.jit(encoder_forward, static_argnames=("tile_b",))
    key = jax.random.PRNGKey(0)

    # Config 1: module defaults (img_size=50 -> 2500 features, latent 128).
    # batch=200 -> tile_b=128, grid=(2,) with a ragged last tile (exercises the
    # OOB-row handling and keeps both v7x TensorCores busy).
    img_size, latent_dim, batch = 50, 128, 200
    k_img, k_par, key = jax.random.split(key, 3)
    img = jax.random.normal(k_img, (batch, img_size, img_size), jnp.float32)
    params = init_params(k_par, img_size, latent_dim)
    out = jax.block_until_ready(fwd(img, params))
    assert out.shape == (batch, latent_dim), out.shape
    assert out.dtype == jnp.float32
    _check(out, img, params)

    # Config 2: small shapes — latent not a lane multiple (padded to 128 and
    # sliced) and a batch smaller than one tile (padded to a sublane multiple).
    img_size2, latent_dim2, batch2 = 16, 32, 10
    k_img2, k_par2, key = jax.random.split(key, 3)
    img2 = jax.random.normal(k_img2, (batch2, img_size2, img_size2), jnp.float32)
    params2 = init_params(k_par2, img_size2, latent_dim2)
    out2 = jax.block_until_ready(fwd(img2, params2))
    assert out2.shape == (batch2, latent_dim2), out2.shape
    _check(out2, img2, params2)

    print("KERNEL_OK")
</pallas_src>

<mosaic_0001>
module attributes {stable_mosaic.version = 11 : i64} {
  func.func @encoder_kernel(%arg0: i32, %arg1: memref<128x2500xf32, #tpu.memory_space<vmem>>, %arg2: memref<2500x512xbf16, #tpu.memory_space<vmem>>, %arg3: memref<1x512xf32, #tpu.memory_space<vmem>>, %arg4: memref<512x256xbf16, #tpu.memory_space<vmem>>, %arg5: memref<1x256xf32, #tpu.memory_space<vmem>>, %arg6: memref<256x128xbf16, #tpu.memory_space<vmem>>, %arg7: memref<1x128xf32, #tpu.memory_space<vmem>>, %arg8: memref<128x128xf32, #tpu.memory_space<vmem>>) attributes {dimension_semantics = [#tpu.dimension_semantics<parallel>], iteration_bounds = array<i64: 2>, scalar_prefetch = 0 : i64, scratch_operands = 0 : i64, tpu.core_type = #tpu.core_type<tc>, window_params = [{transform_indices = @transform_0, window_bounds = array<i64: 128, 2500>}, {pipeline_mode = #tpu.pipeline_mode<synchronous>, transform_indices = @transform_1, window_bounds = array<i64: 2500, 512>}, {pipeline_mode = #tpu.pipeline_mode<synchronous>, transform_indices = @transform_2, window_bounds = array<i64: 1, 512>}, {pipeline_mode = #tpu.pipeline_mode<synchronous>, transform_indices = @transform_3, window_bounds = array<i64: 512, 256>}, {pipeline_mode = #tpu.pipeline_mode<synchronous>, transform_indices = @transform_4, window_bounds = array<i64: 1, 256>}, {pipeline_mode = #tpu.pipeline_mode<synchronous>, transform_indices = @transform_5, window_bounds = array<i64: 256, 128>}, {pipeline_mode = #tpu.pipeline_mode<synchronous>, transform_indices = @transform_6, window_bounds = array<i64: 1, 128>}, {transform_indices = @transform_7, window_bounds = array<i64: 128, 128>}]} {
    %c0 = arith.constant 0 : index
    %c0_0 = arith.constant 0 : index
    %0 = vector.load %arg1[%c0, %c0_0] : memref<128x2500xf32, #tpu.memory_space<vmem>>, vector<128x2500xf32>
    %1 = arith.truncf %0 : vector<128x2500xf32> to vector<128x2500xbf16>
    %c0_1 = arith.constant 0 : index
    %c0_2 = arith.constant 0 : index
    %2 = vector.load %arg2[%c0_1, %c0_2] : memref<2500x512xbf16, #tpu.memory_space<vmem>>, vector<2500x512xbf16>
    %cst = arith.constant dense<0.000000e+00> : vector<128x512xf32>
    %3 = tpu.matmul %1, %2, %cst {dimension_numbers = #tpu.dot_dimension_numbers<[1], [0], [0], [1], [0, 0, 1, 1], [], []>} : vector<128x2500xbf16>, vector<2500x512xbf16>, vector<128x512xf32> -> vector<128x512xf32>
    %c0_3 = arith.constant 0 : index
    %c0_4 = arith.constant 0 : index
    %4 = vector.load %arg3[%c0_3, %c0_4] : memref<1x512xf32, #tpu.memory_space<vmem>>, vector<1x512xf32>
    %5 = vector.broadcast %4 : vector<1x512xf32> to vector<128x512xf32>
    %6 = arith.addf %3, %5 : vector<128x512xf32>
    %cst_5 = arith.constant 2.000000e-01 : f32
    %7 = vector.broadcast %cst_5 : f32 to vector<128x512xf32>
    %8 = arith.mulf %7, %6 : vector<128x512xf32>
    %9 = arith.maximumf %6, %8 : vector<128x512xf32>
    %10 = arith.truncf %9 : vector<128x512xf32> to vector<128x512xbf16>
    %c0_6 = arith.constant 0 : index
    %c0_7 = arith.constant 0 : index
    %11 = vector.load %arg4[%c0_6, %c0_7] : memref<512x256xbf16, #tpu.memory_space<vmem>>, vector<512x256xbf16>
    %cst_8 = arith.constant dense<0.000000e+00> : vector<128x256xf32>
    %12 = tpu.matmul %10, %11, %cst_8 {dimension_numbers = #tpu.dot_dimension_numbers<[1], [0], [0], [1], [0, 0, 1, 1], [], []>} : vector<128x512xbf16>, vector<512x256xbf16>, vector<128x256xf32> -> vector<128x256xf32>
    %c0_9 = arith.constant 0 : index
    %c0_10 = arith.constant 0 : index
    %13 = vector.load %arg5[%c0_9, %c0_10] : memref<1x256xf32, #tpu.memory_space<vmem>>, vector<1x256xf32>
    %14 = vector.broadcast %13 : vector<1x256xf32> to vector<128x256xf32>
    %15 = arith.addf %12, %14 : vector<128x256xf32>
    %cst_11 = arith.constant 2.000000e-01 : f32
    %16 = vector.broadcast %cst_11 : f32 to vector<128x256xf32>
    %17 = arith.mulf %16, %15 : vector<128x256xf32>
    %18 = arith.maximumf %15, %17 : vector<128x256xf32>
    %19 = arith.truncf %18 : vector<128x256xf32> to vector<128x256xbf16>
    %c0_12 = arith.constant 0 : index
    %c0_13 = arith.constant 0 : index
    %20 = vector.load %arg6[%c0_12, %c0_13] : memref<256x128xbf16, #tpu.memory_space<vmem>>, vector<256x128xbf16>
    %cst_14 = arith.constant dense<0.000000e+00> : vector<128x128xf32>
    %21 = tpu.matmul %19, %20, %cst_14 {dimension_numbers = #tpu.dot_dimension_numbers<[1], [0], [0], [1], [0, 0, 1, 1], [], []>} : vector<128x256xbf16>, vector<256x128xbf16>, vector<128x128xf32> -> vector<128x128xf32>
    %c0_15 = arith.constant 0 : index
    %c0_16 = arith.constant 0 : index
    %22 = vector.load %arg7[%c0_15, %c0_16] : memref<1x128xf32, #tpu.memory_space<vmem>>, vector<1x128xf32>
    %23 = vector.broadcast %22 : vector<1x128xf32> to vector<128x128xf32>
    %24 = arith.addf %21, %23 : vector<128x128xf32>
    %c0_17 = arith.constant 0 : index
    %c0_18 = arith.constant 0 : index
    %25 = vector.load %arg8[%c0_17, %c0_18] : memref<128x128xf32, #tpu.memory_space<vmem>>, vector<128x128xf32>
    tpu.vector_store %arg8[%c0_17, %c0_18], %24 {strides = array<i32>} : memref<128x128xf32, #tpu.memory_space<vmem>>, vector<128x128xf32>,
    return
  }
  func.func @transform_0(%arg0: i32) -> (i32, i32) {
    %c0_i32 = arith.constant 0 : i32
    %c0_i32_0 = arith.constant 0 : i32
    return %arg0, %c0_i32 : i32, i32
  }
  func.func @transform_1(%arg0: i32) -> (i32, i32) {
    %c0_i32 = arith.constant 0 : i32
    %c0_i32_0 = arith.constant 0 : i32
    %c0_i32_1 = arith.constant 0 : i32
    return %c0_i32, %c0_i32_0 : i32, i32
  }
  func.func @transform_2(%arg0: i32) -> (i32, i32) {
    %c0_i32 = arith.constant 0 : i32
    %c0_i32_0 = arith.constant 0 : i32
    %c0_i32_1 = arith.constant 0 : i32
    return %c0_i32, %c0_i32_0 : i32, i32
  }
  func.func @transform_3(%arg0: i32) -> (i32, i32) {
    %c0_i32 = arith.constant 0 : i32
    %c0_i32_0 = arith.constant 0 : i32
    %c0_i32_1 = arith.constant 0 : i32
    return %c0_i32, %c0_i32_0 : i32, i32
  }
  func.func @transform_4(%arg0: i32) -> (i32, i32) {
    %c0_i32 = arith.constant 0 : i32
    %c0_i32_0 = arith.constant 0 : i32
    %c0_i32_1 = arith.constant 0 : i32
    return %c0_i32, %c0_i32_0 : i32, i32
  }
  func.func @transform_5(%arg0: i32) -> (i32, i32) {
    %c0_i32 = arith.constant 0 : i32
    %c0_i32_0 = arith.constant 0 : i32
    %c0_i32_1 = arith.constant 0 : i32
    return %c0_i32, %c0_i32_0 : i32, i32
  }
  func.func @transform_6(%arg0: i32) -> (i32, i32) {
    %c0_i32 = arith.constant 0 : i32
    %c0_i32_0 = arith.constant 0 : i32
    %c0_i32_1 = arith.constant 0 : i32
    return %c0_i32, %c0_i32_0 : i32, i32
  }
  func.func @transform_7(%arg0: i32) -> (i32, i32) {
    %c0_i32 = arith.constant 0 : i32
    %c0_i32_0 = arith.constant 0 : i32
    return %arg0, %c0_i32 : i32, i32
  }
}

</mosaic_0001>

<bundles_post_ra>
// kernel: encoder_forward.1
= control target key start
LH: loop header
LB: loop body
LE: loop exit
PB: predicated region body
PF: predicated region fallthrough
CT: control target
= control target key end

     0   :  { %12 = vsyncpa [#allocation3], 0  ;;  %s13730_s0 = inlined_call_operand.vmem [shape: f32[200,2500], index: 0, kind: input, shape index: {}]   ;;  %s13731_s1 = inlined_call_operand.vmem [shape: bf16[2500,512], index: 1, kind: input, shape index: {}]   ;;  %s13732_s2 = inlined_call_operand.vmem [shape: f32[1,512], index: 2, kind: input, shape index: {}]   ;;  %s13733_s3 = inlined_call_operand.vmem [shape: bf16[512,256], index: 3, kind: input, shape index: {}]   ;;  %s13734_s4 = inlined_call_operand.vmem [shape: f32[1,256], index: 4, kind: input, shape index: {}]   ;;  %s13735_s5 = inlined_call_operand.vmem [shape: bf16[256,128], index: 5, kind: input, shape index: {}]   ;;  %s13736_s6 = inlined_call_operand.vmem [shape: f32[1,128], index: 6, kind: input, shape index: {}]   ;;  %s13737_s7 = inlined_call_operand.hbm [shape: f32[200,128], index: 7, kind: output, shape index: {}]  }
   0x1   :  { %14 = vsyncpa [#allocation3 + $0x1], 0  ;;  %s10805_s24 = smov 0   ;;  %s10807_s25 = smov 0  }
   0x2   :  { %s10809_s26 = smov 0   ;;  %s10811_s27 = smov 0  }
   0x3 LB: > { %s10826_s28 = sadd.s32 4294967295, %s10760_s27   ;;  %s8061_s29 = sadd.s32 4294967294, %s10760_s27   ;;  %s10760_s27 = sphi %s10811_s27, %s13762_s27   ;;  %s10756_s26 = sphi %s10809_s26, %s13761_s26   ;;  %s10752_s25 = sphi %s10807_s25, %s13760_s25   ;;  %s10748_s24 = sphi %s10805_s24, %s13759_s24  }
   0x4   : > { %s10830_s30 = sadd.s32 1, %s10760_s27   ;;  %s179_s8 = sadd.s32 1, %s10756_s26 }
   0x5   : > { %s176_s9 = ssub.s32 %s10760_s27, %s10830_s30  ;;  %p189_p0 = scmp.ne.s32.totalorder %s10756_s26, %s10752_s25 }
   0x6   : > { %p177_p1 = scmp.eq.s32.totalorder %s176_s9, 0  ;;  %p190_p2 = scmp.eq.s32.totalorder %s10826_s28, 1 }
   0x7   : > { %p195_p3 = scmp.ne.s32.totalorder %s10752_s25, %s10748_s24  ;;  %p196_p4 = scmp.eq.s32.totalorder %s8061_s29, 1 }
   0x8   : > { %s10841_s10 = scalar_select %p177_p1, %s10756_s26, %s179_s8  }
   0x9   : > { %p10843_p5 = por %p190_p2, %p189_p0  ;;  %p10847_p6 = por %p196_p4, %p195_p3 }
   0xa   : > { %p8064_p7 = scmp.ge.s32.totalorder %s10760_s27, 1  ;;  %p252_p8 = scmp.lt.s32.totalorder %s10760_s27, 3 }
   0xc   : > { %p253_p9 = pnand %p8064_p7, %p252_p8 }
   0xe   : > { %256 = sbr.rel (%p253_p9) target bundleno = 1478 (0x5c6), region = 48 }
  0x15   : > { %v9646_v0 = vld [vmem:[%s13731_s1 + $0x4] ss:$16 sps:$4 sm:$0xff]   ;;  %v9648_v1 = vld [vmem:[%s13731_s1 + $0xc] ss:$16 sps:$4 sm:$0xff]   ;;  %v9650_v2 = vld [vmem:[%s13731_s1] ss:$16 sps:$4 sm:$0xff]  }
  0x16   : > { %4609 = vmatprep.subr.bf16.mxu0 %v9646_v0  ;;  %v9651_v3 = vld [vmem:[%s13731_s1 + $0x8] ss:$16 sps:$4 sm:$0xff]   ;;  %5739 = vmatprep.subr.bf16.mxu1 %v9648_v1  ;;  %v9652_v4 = vld [vmem:[%s13731_s1 + $0x24] ss:$16 sps:$4 sm:$0xff]   ;;  %v9654_v5 = vld [vmem:[%s13731_s1 + $0x2c] ss:$16 sps:$4 sm:$0xff]  }
  0x17   : > { %4610 = vmatpush1.bf16.msra.mxu0 %v9650_v2  ;;  %5740 = vmatpush1.bf16.msra.mxu1 %v9651_v3  ;;  %v9656_v6 = vld [vmem:[%s13731_s1 + $0x20] ss:$16 sps:$4 sm:$0xff]   ;;  %v9657_v7 = vld [vmem:[%s13731_s1 + $0x28] ss:$16 sps:$4 sm:$0xff]   ;;  %v9658_v8 = vld [vmem:[%s13731_s1 + $0x44] ss:$16 sps:$4 sm:$0xff]  }
  0x18   : > { %4611 = vmatprep.subr.bf16.mxu0 %v9652_v4  ;;  %5741 = vmatprep.subr.bf16.mxu1 %v9654_v5  ;;  %v9660_v9 = vld [vmem:[%s13731_s1 + $0x4c] ss:$16 sps:$4 sm:$0xff]   ;;  %v9662_v10 = vld [vmem:[%s13731_s1 + $0x40] ss:$16 sps:$4 sm:$0xff]   ;;  %v9663_v11 = vld [vmem:[%s13731_s1 + $0x48] ss:$16 sps:$4 sm:$0xff]  }
  0x19   : > { %v9664_v12 = vld [vmem:[%s13731_s1 + $0x64] ss:$16 sps:$4 sm:$0xff]   ;;  %v9666_v13 = vld [vmem:[%s13731_s1 + $0x6c] ss:$16 sps:$4 sm:$0xff]   ;;  %v9668_v14 = vld [vmem:[%s13731_s1 + $0x60] ss:$16 sps:$4 sm:$0xff]  }
  0x1a   : > { %v9669_v15 = vld [vmem:[%s13731_s1 + $0x68] ss:$16 sps:$4 sm:$0xff]   ;;  %v9670_v16 = vld [vmem:[%s13731_s1 + $0x84] ss:$16 sps:$4 sm:$0xff]   ;;  %v9672_v17 = vld [vmem:[%s13731_s1 + $0x8c] ss:$16 sps:$4 sm:$0xff]  }
  0x1b   : > { %4612 = vmatpush1.bf16.msra.mxu0 %v9656_v6  ;;  %5742 = vmatpush1.bf16.msra.mxu1 %v9657_v7  ;;  %v9674_v18 = vld [vmem:[%s13731_s1 + $0x80] ss:$16 sps:$4 sm:$0xff]   ;;  %v9675_v19 = vld [vmem:[%s13731_s1 + $0x88] ss:$16 sps:$4 sm:$0xff]   ;;  %v9676_v20 = vld [vmem:[%s13731_s1 + $0xa4] ss:$16 sps:$4 sm:$0xff]  }
  0x1c   : > { %4613 = vmatprep.subr.bf16.mxu0 %v9658_v8  ;;  %5743 = vmatprep.subr.bf16.mxu1 %v9660_v9  ;;  %v9678_v21 = vld [vmem:[%s13731_s1 + $0xac] ss:$16 sps:$4 sm:$0xff]   ;;  %v9680_v22 = vld [vmem:[%s13731_s1 + $0xa0] ss:$16 sps:$4 sm:$0xff]   ;;  %v9681_v23 = vld [vmem:[%s13731_s1 + $0xa8] ss:$16 sps:$4 sm:$0xff]  }
  0x1d   : > { %v9682_v24 = vld [vmem:[%s13731_s1 + $0xc4] ss:$16 sps:$4 sm:$0xff]   ;;  %v9684_v25 = vld [vmem:[%s13731_s1 + $0xcc] ss:$16 sps:$4 sm:$0xff]   ;;  %v9686_v26 = vld [vmem:[%s13731_s1 + $0xc0] ss:$16 sps:$4 sm:$0xff]  }
  0x1e   : > { %v9687_v27 = vld [vmem:[%s13731_s1 + $0xc8] ss:$16 sps:$4 sm:$0xff]   ;;  %v9688_v28 = vld [vmem:[%s13731_s1 + $0xe4] ss:$16 sps:$4 sm:$0xff]   ;;  %s10941_s15 = sshll.u32 %s10826_s28, 4  ;;  %vm4596_vm0 = vcmask 1041408  }
  0x1f   : > { %4614 = vmatpush1.bf16.msra.mxu0 %v9662_v10  ;;  %5744 = vmatpush1.bf16.msra.mxu1 %v9663_v11  ;;  %v9690_v29 = vld [vmem:[%s13731_s1 + $0xec] ss:$16 sps:$4 sm:$0xff]   ;;  %v9692_v30 = vld [vmem:[%s13731_s1 + $0xe0] ss:$16 sps:$4 sm:$0xff]   ;;  %p296_p10 = scmp.lt.s32.totalorder %s10941_s15, 24  ;;  %vm4571_vm1 = vcmask 556032  }
  0x20   : > { %4615 = vmatprep.subr.bf16.mxu0 %v9664_v12  ;;  %5745 = vmatprep.subr.bf16.mxu1 %v9666_v13  ;;  %v9693_v31 = vld [vmem:[%s13731_s1 + $0xe8] ss:$16 sps:$4 sm:$0xff]   ;;  %v9694_v32 = vld [vmem:[%s13731_s1 + $0x104] ss:$16 sps:$4 sm:$0xff]   ;;  %v9696_v33 = vld [vmem:[%s13731_s1 + $0x10c] ss:$16 sps:$4 sm:$0xff]  }
  0x21   : > { %v9698_v34 = vld [vmem:[%s13731_s1 + $0x100] ss:$16 sps:$4 sm:$0xff]   ;;  %v9699_v35 = vld [vmem:[%s13731_s1 + $0x108] ss:$16 sps:$4 sm:$0xff]   ;;  %s297_s17 = scalar_select %p296_p10, %s10941_s15, 24 }
  0x22   : > { %v9700_v36 = vld [vmem:[%s13731_s1 + $0x124] ss:$16 sps:$4 sm:$0xff]   ;;  %v9702_v37 = vld [vmem:[%s13731_s1 + $0x12c] ss:$16 sps:$4 sm:$0xff]   ;;  %v9704_v38 = vld [vmem:[%s13731_s1 + $0x120] ss:$16 sps:$4 sm:$0xff]  }
  0x23   : > { %4616 = vmatpush1.bf16.msra.mxu0 %v9668_v14  ;;  %5746 = vmatpush1.bf16.msra.mxu1 %v9669_v15  ;;  %s9605_s29 = smul.u32 160, %s297_s17  ;;  %v9705_v39 = vld [vmem:[%s13731_s1 + $0x128] ss:$16 sps:$4 sm:$0xff]   ;;  %v9706_v40 = vld [vmem:[%s13731_s1 + $0x144] ss:$16 sps:$4 sm:$0xff]   ;;  %s287_s13 = sand.u32 1, %s10752_s25  }
  0x24   : > { %4617 = vmatprep.subr.bf16.mxu0 %v9670_v16  ;;  %5747 = vmatprep.subr.bf16.mxu1 %v9672_v17  ;;  %v9708_v41 = vld [vmem:[%s13731_s1 + $0x14c] ss:$16 sps:$4 sm:$0xff]   ;;  %v9710_v42 = vld [vmem:[%s13731_s1 + $0x140] ss:$16 sps:$4 sm:$0xff]   ;;  %v9711_v43 = vld [vmem:[%s13731_s1 + $0x148] ss:$16 sps:$4 sm:$0xff]  }
  0x25   : > { %s10993_s8 = scalar_lea.vmem %s13730_s0, %s9605_s29  ;;  %v9712_v44 = vld [vmem:[%s13731_s1 + $0x164] ss:$16 sps:$4 sm:$0xff]   ;;  %v9714_v45 = vld [vmem:[%s13731_s1 + $0x16c] ss:$16 sps:$4 sm:$0xff]   ;;  %v9716_v47 = vld [vmem:[%s13731_s1 + $0x160] ss:$16 sps:$4 sm:$0xff]  }
  0x26   : > { %v314_v46 = vld [vmem:[%s10993_s8 + $0x8] sm:$0xff]  ;;  %v9718_v50 = vld [vmem:[%s13731_s1 + $0x184] ss:$16 sps:$4 sm:$0xff]   ;;  %v9722_v53 = vld [vmem:[%s13731_s1 + $0x180] ss:$16 sps:$4 sm:$0xff]   ;;  %s8065_s14 = sshll.u32 %s287_s13, 7 }
  0x27   : > { %4618 = vmatpush1.bf16.msra.mxu0 %v9674_v18  ;;  %5748 = vmatpush1.bf16.msra.mxu1 %v9675_v19  ;;  %v9717_v48 = vld [vmem:[%s13731_s1 + $0x168] ss:$16 sps:$4 sm:$0xff]   ;;  %v9720_v52 = vld [vmem:[%s13731_s1 + $0x18c] ss:$16 sps:$4 sm:$0xff]   ;;  %v9724_v55 = vld [vmem:[%s13731_s1 + $0x1a4] ss:$16 sps:$4 sm:$0xff]  }
  0x28   : > { %4619 = vmatprep.subr.bf16.mxu0 %v9676_v20  ;;  %5749 = vmatprep.subr.bf16.mxu1 %v9678_v21  ;;  %v334_v49 = vld [vmem:[%s10993_s8 + $0xa8] sm:$0xff]  ;;  %v9728_v57 = vld [vmem:[%s13731_s1 + $0x1a0] ss:$16 sps:$4 sm:$0xff]   ;;  %v9730_v59 = vld [vmem:[%s13731_s1 + $0x1c4] ss:$16 sps:$4 sm:$0xff]   ;;  %s13634_s19 = scalar_lea.vmem [#allocation2], %s8065_s14 }
  0x29   : > { %v634_v51 = vpack.c.bf16 %v334_v49, %v314_v46  ;;  %v9723_v54 = vld [vmem:[%s13731_s1 + $0x188] ss:$16 sps:$4 sm:$0xff]   ;;  %v9726_v56 = vld [vmem:[%s13731_s1 + $0x1ac] ss:$16 sps:$4 sm:$0xff]   ;;  %v9734_v61 = vld [vmem:[%s13731_s1 + $0x1c0] ss:$16 sps:$4 sm:$0xff]  }
  0x2a   : > { %v9729_v58 = vld [vmem:[%s13731_s1 + $0x1a8] ss:$16 sps:$4 sm:$0xff]   ;;  %v9732_v60 = vld [vmem:[%s13731_s1 + $0x1cc] ss:$16 sps:$4 sm:$0xff]   ;;  %v9736_v63 = vld [vmem:[%s13731_s1 + $0x1e4] ss:$16 sps:$4 sm:$0xff]  }
  0x2b   : > { %4620 = vmatpush1.bf16.msra.mxu0 %v9680_v22  ;;  %5750 = vmatpush1.bf16.msra.mxu1 %v9681_v23  ;;  %v9735_v62 = vld [vmem:[%s13731_s1 + $0x1c8] ss:$16 sps:$4 sm:$0xff]   ;;  %v9738_v0 = vld [vmem:[%s13731_s1 + $0x1ec] ss:$16 sps:$4 sm:$0xff]   ;;  %v9740_v1 = vld [vmem:[%s13731_s1 + $0x1e0] ss:$16 sps:$4 sm:$0xff]  }
  0x2c   : > { %4621 = vmatprep.subr.bf16.mxu0 %v9682_v24  ;;  %5751 = vmatprep.subr.bf16.mxu1 %v9684_v25  ;;  %v9741_v2 = vld [vmem:[%s13731_s1 + $0x1e8] ss:$16 sps:$4 sm:$0xff]   ;;  %v313_v3 = vld [vmem:[%s10993_s8] sm:$0xff]  ;;  %v9747_v6 = vld [vmem:[%s13731_s1 + $0x20c] ss:$16 sps:$4 sm:$0xff]   ;;  %s13669_s29 = scalar_lea.sflag [#allocation3], %s287_s13 }
  0x2d   : > { %4641 = vmatprep.mubr.bf16.mxu0 %v634_v51  ;;  %5771 = vmatprep.mubr.bf16.mxu1 %v634_v51  ;;  %v333_v4 = vld [vmem:[%s10993_s8 + $0xa0] sm:$0xff]  ;;  %v9745_v9 = vld [vmem:[%s13731_s1 + $0x208] ss:$16 sps:$4 sm:$0xff]   ;;  %v9753_v13 = vld [vmem:[%s13731_s1 + $0x22c] ss:$16 sps:$4 sm:$0xff]   ;;  %s7988_s20 = ssub.s32 (%p10843_p5), 25, %s10941_s15 }
  0x2e   : > { %v9744_v5 = vld [vmem:[%s13731_s1 + $0x204] ss:$16 sps:$4 sm:$0xff]   ;;  %v9742_v7 = vld [vmem:[%s13731_s1 + $0x200] ss:$16 sps:$4 sm:$0xff]   ;;  %v633_v8 = vpack.c.bf16 %v333_v4, %v313_v3  ;;  %v354_v10 = vld [vmem:[%s10993_s8 + $0x148] sm:$0xff]  ;;  %p7989_p11 = scmp.lt.s32.totalorder (%p10843_p5), %s7988_s20, 16 }
  0x2f   : > { %4622 = vmatpush1.bf16.msra.mxu0 %v9686_v26  ;;  %5752 = vmatpush1.bf16.msra.mxu1 %v9687_v27  ;;  %v374_v11 = vld [vmem:[%s10993_s8 + $0x1e8] sm:$0xff]  ;;  %v9750_v12 = vld [vmem:[%s13731_s1 + $0x224] ss:$16 sps:$4 sm:$0xff]   ;;  %v9748_v14 = vld [vmem:[%s13731_s1 + $0x220] ss:$16 sps:$4 sm:$0xff]  }
  0x30   : > { %4623 = vmatprep.subr.bf16.mxu0 %v9688_v28  ;;  %5753 = vmatprep.subr.bf16.mxu1 %v9690_v29  ;;  %v654_v15 = vpack.c.bf16 %v374_v11, %v354_v10  ;;  %v9751_v16 = vld [vmem:[%s13731_s1 + $0x228] ss:$16 sps:$4 sm:$0xff]   ;;  %v353_v17 = vld [vmem:[%s10993_s8 + $0x140] sm:$0xff]  ;;  %v9759_v20 = vld [vmem:[%s13731_s1 + $0x24c] ss:$16 sps:$4 sm:$0xff]  }
  0x31   : > { %v373_v18 = vld [vmem:[%s10993_s8 + $0x1e0] sm:$0xff]  ;;  %v9757_v22 = vld [vmem:[%s13731_s1 + $0x248] ss:$16 sps:$4 sm:$0xff]   ;;  %v9765_v27 = vld [vmem:[%s13731_s1 + $0x26c] ss:$16 sps:$4 sm:$0xff]  }
  0x32   : > { %v9756_v19 = vld [vmem:[%s13731_s1 + $0x244] ss:$16 sps:$4 sm:$0xff]   ;;  %v9754_v21 = vld [vmem:[%s13731_s1 + $0x240] ss:$16 sps:$4 sm:$0xff]   ;;  %v653_v23 = vpack.c.bf16 %v373_v18, %v353_v17  ;;  %v394_v24 = vld [vmem:[%s10993_s8 + $0x288] sm:$0xff] }
  0x33   : > { %4624 = vmatpush1.bf16.msra.mxu0 %v9692_v30  ;;  %5754 = vmatpush1.bf16.msra.mxu1 %v9693_v31  ;;  %v414_v25 = vld [vmem:[%s10993_s8 + $0x328] sm:$0xff]  ;;  %v9762_v26 = vld [vmem:[%s13731_s1 + $0x264] ss:$16 sps:$4 sm:$0xff]   ;;  %v9760_v29 = vld [vmem:[%s13731_s1 + $0x260] ss:$16 sps:$4 sm:$0xff]  }
  0x34   : > { %4625 = vmatprep.subr.bf16.mxu0 %v9694_v32  ;;  %5755 = vmatprep.subr.bf16.mxu1 %v9696_v33  ;;  %v674_v28 = vpack.c.bf16 %v414_v25, %v394_v24  ;;  %v9763_v30 = vld [vmem:[%s13731_s1 + $0x268] ss:$16 sps:$4 sm:$0xff]   ;;  %v393_v31 = vld [vmem:[%s10993_s8 + $0x280] sm:$0xff] }
  0x35   : > { %v413_v32 = vld [vmem:[%s10993_s8 + $0x320] sm:$0xff]  ;;  %v474_v51 = vld [vmem:[%s10993_s8 + $0x508] sm:$0xff] }
  0x36   : > { %v9768_v33 = vld [vmem:[%s13731_s1 + $0x284] ss:$16 sps:$4 sm:$0xff]   ;;  %v9778_v49 = vld [vmem:[%s13731_s1 + $0x2c0] ss:$16 sps:$4 sm:$0xff]   ;;  %v9793_v3 = vld [vmem:[%s13731_s1 + $0x308] ss:$16 sps:$4 sm:$0xff]  }
  0x37   : > { %4626 = vmatpush1.bf16.msra.mxu0 %v9698_v34  ;;  %5756 = vmatpush1.bf16.msra.mxu1 %v9699_v35  ;;  %v9771_v34 = vld [vmem:[%s13731_s1 + $0x28c] ss:$16 sps:$4 sm:$0xff]   ;;  %v9766_v35 = vld [vmem:[%s13731_s1 + $0x280] ss:$16 sps:$4 sm:$0xff]   ;;  %v9798_v4 = vld [vmem:[%s13731_s1 + $0x324] ss:$16 sps:$4 sm:$0xff]  }
  0x38   : > { %4627 = vmatprep.subr.bf16.mxu0 %v9700_v36  ;;  %5757 = vmatprep.subr.bf16.mxu1 %v9702_v37  ;;  %v9769_v36 = vld [vmem:[%s13731_s1 + $0x288] ss:$16 sps:$4 sm:$0xff]   ;;  %v673_v37 = vpack.c.bf16 %v413_v32, %v393_v31  ;;  %v453_v46 = vld [vmem:[%s10993_s8 + $0x460] sm:$0xff] }
  0x39   : > { %v533_v10 = vld [vmem:[%s10993_s8 + $0x6e0] sm:$0xff]  ;;  %v574_v17 = vld [vmem:[%s10993_s8 + $0x828] sm:$0xff] }
  0x3a   : > { %v9804_v11 = vld [vmem:[%s13731_s1 + $0x344] ss:$16 sps:$4 sm:$0xff]   ;;  %v614_v31 = vld [vmem:[%s10993_s8 + $0x968] sm:$0xff] }
  0x3b   : > { %4628 = vmatpush1.bf16.msra.mxu0 %v9704_v38  ;;  %5758 = vmatpush1.bf16.msra.mxu1 %v9705_v39  ;;  %v434_v38 = vld [vmem:[%s10993_s8 + $0x3c8] sm:$0xff]  ;;  %v9810_v18 = vld [vmem:[%s13731_s1 + $0x364] ss:$16 sps:$4 sm:$0xff]  }
  0x3c   : > { %4629 = vmatprep.subr.bf16.mxu0 %v9706_v40  ;;  %5759 = vmatprep.subr.bf16.mxu1 %v9708_v41  ;;  %v454_v39 = vld [vmem:[%s10993_s8 + $0x468] sm:$0xff]  ;;  %v9774_v40 = vld [vmem:[%s13731_s1 + $0x2a4] ss:$16 sps:$4 sm:$0xff]  }
  0x3d   : > { %v9777_v41 = vld [vmem:[%s13731_s1 + $0x2ac] ss:$16 sps:$4 sm:$0xff]   ;;  %v573_v24 = vld [vmem:[%s10993_s8 + $0x820] sm:$0xff] }
  0x3e   : > { %v9816_v25 = vld [vmem:[%s13731_s1 + $0x384] ss:$16 sps:$4 sm:$0xff]  }
  0x3f   : > { %4630 = vmatpush1.bf16.msra.mxu0 %v9710_v42  ;;  %5760 = vmatpush1.bf16.msra.mxu1 %v9711_v43  ;;  %v9772_v42 = vld [vmem:[%s13731_s1 + $0x2a0] ss:$16 sps:$4 sm:$0xff]   ;;  %v694_v43 = vpack.c.bf16 %v454_v39, %v434_v38  ;;  %v9822_v32 = vld [vmem:[%s13731_s1 + $0x3a4] ss:$16 sps:$4 sm:$0xff]  }
  0x40   : > { %4631 = vmatprep.subr.bf16.mxu0 %v9712_v44  ;;  %5761 = vmatprep.subr.bf16.mxu1 %v9714_v45  ;;  %v9775_v44 = vld [vmem:[%s13731_s1 + $0x2a8] ss:$16 sps:$4 sm:$0xff]   ;;  %v433_v45 = vld [vmem:[%s10993_s8 + $0x3c0] sm:$0xff] }
  0x41   : > { %v613_v38 = vld [vmem:[%s10993_s8 + $0x960] sm:$0xff] }
  0x42   : > { %v9828_v39 = vld [vmem:[%s13731_s1 + $0x3c4] ss:$16 sps:$4 sm:$0xff]  }
  0x43   : > { %4632 = vmatpush1.bf16.msra.mxu0 %v9716_v47  ;;  %5762 = vmatpush1.bf16.msra.mxu1 %v9717_v48  ;;  %v9780_v47 = vld [vmem:[%s13731_s1 + $0x2c4] ss:$16 sps:$4 sm:$0xff]   ;;  %v9783_v48 = vld [vmem:[%s13731_s1 + $0x2cc] ss:$16 sps:$4 sm:$0xff]  }
  0x44   : > { %4633 = vmatprep.subr.bf16.mxu0 %v9718_v50  ;;  %5763 = vmatprep.subr.bf16.mxu1 %v9720_v52  ;;  %v693_v50 = vpack.c.bf16 %v453_v46, %v433_v45  ;;  %v494_v52 = vld [vmem:[%s10993_s8 + $0x5a8] sm:$0xff]  ;;  %v336_v45 = vld [vmem:[%s10993_s8 + $0xb8] sm:$0xff]  ;;  %v9834_v46 = vld [vmem:[%s13731_s1 + $0x3e4] ss:$16 sps:$4 sm:$0xff]  }
  0x47   : > { %4634 = vmatpush1.bf16.msra.mxu0 %v9722_v53  ;;  %5764 = vmatpush1.bf16.msra.mxu1 %v9723_v54  ;;  %v9781_v53 = vld [vmem:[%s13731_s1 + $0x2c8] ss:$16 sps:$4 sm:$0xff]   ;;  %v9786_v54 = vld [vmem:[%s13731_s1 + $0x2e4] ss:$16 sps:$4 sm:$0xff]  }
  0x48   : > { %4635 = vmatprep.subr.bf16.mxu0 %v9724_v55  ;;  %5765 = vmatprep.subr.bf16.mxu1 %v9726_v56  ;;  %v9789_v55 = vld [vmem:[%s13731_s1 + $0x2ec] ss:$16 sps:$4 sm:$0xff]   ;;  %v9784_v56 = vld [vmem:[%s13731_s1 + $0x2e0] ss:$16 sps:$4 sm:$0xff]  }
  0x4b   : > { %4636 = vmatpush1.bf16.msra.mxu0 %v9728_v57  ;;  %5766 = vmatpush1.bf16.msra.mxu1 %v9729_v58  ;;  %v9787_v57 = vld [vmem:[%s13731_s1 + $0x2e8] ss:$16 sps:$4 sm:$0xff]   ;;  %v714_v58 = vpack.c.bf16 %v494_v52, %v474_v51  ;;  %v315_v51 = vld [vmem:[%s10993_s8 + $0x10] sm:$0xff] }
  0x4c   : > { %4637 = vmatprep.subr.bf16.mxu0 %v9730_v59  ;;  %5767 = vmatprep.subr.bf16.mxu1 %v9732_v60  ;;  %v473_v59 = vld [vmem:[%s10993_s8 + $0x500] sm:$0xff]  ;;  %v335_v52 = vld [vmem:[%s10993_s8 + $0xb0] sm:$0xff] }
  0x4d   : > { %v493_v60 = vld [vmem:[%s10993_s8 + $0x5a0] sm:$0xff] }
  0x4f   : > { %4638 = vmatpush1.bf16.msra.mxu0 %v9734_v61  ;;  %5768 = vmatpush1.bf16.msra.mxu1 %v9735_v62  ;;  %v9792_v61 = vld [vmem:[%s13731_s1 + $0x304] ss:$16 sps:$4 sm:$0xff]   ;;  %v9795_v62 = vld [vmem:[%s13731_s1 + $0x30c] ss:$16 sps:$4 sm:$0xff]  }
  0x50   : > { %4639 = vmatprep.subr.bf16.mxu0 %v9736_v63  ;;  %5769 = vmatprep.subr.bf16.mxu1 %v9738_v0  ;;  %v713_v63 = vpack.c.bf16 %v493_v60, %v473_v59  ;;  %v514_v0 = vld [vmem:[%s10993_s8 + $0x648] sm:$0xff]  ;;  %v9846_v60 = vld [vmem:[%s13731_s1 + $0x424] ss:$16 sps:$4 sm:$0xff]  }
  0x51   : > { %v9841_v59 = vld [vmem:[%s13731_s1 + $0x408] ss:$16 sps:$4 sm:$0xff]  }
  0x53   : > { %4640 = vmatpush1.bf16.msra.mxu0 %v9740_v1  ;;  %5770 = vmatpush1.bf16.msra.mxu1 %v9741_v2  ;;  %v534_v1 = vld [vmem:[%s10993_s8 + $0x6e8] sm:$0xff]  ;;  %v9790_v2 = vld [vmem:[%s13731_s1 + $0x300] ss:$16 sps:$4 sm:$0xff]  }
  0x54   : > { %4722 = vmatprep.subr.bf16.mxu0 %v9744_v5  ;;  %5852 = vmatprep.subr.bf16.mxu1 %v9747_v6  ;;  %v9801_v5 = vld [vmem:[%s13731_s1 + $0x32c] ss:$16 sps:$4 sm:$0xff]   ;;  %v9796_v6 = vld [vmem:[%s13731_s1 + $0x320] ss:$16 sps:$4 sm:$0xff]  }
  0x56   : > { %4642 = vmatmul.mubr.bf16.vlgmr.msra.gmra.mrb[0].mxu0 %v633_v8  ;;  %5772 = vmatmul.mubr.bf16.vlgmr.msra.gmra.mrb[0].mxu1 %v633_v8  ;;  %v734_v8 = vpack.c.bf16 %v534_v1, %v514_v0  ;;  %v355_v1 = vld [vmem:[%s10993_s8 + $0x150] sm:$0xff] }
  0x57   : > { %4723 = vmatpush1.bf16.msra.mxu0 %v9742_v7  ;;  %5853 = vmatpush1.bf16.msra.mxu1 %v9745_v9  ;;  %v9799_v7 = vld [vmem:[%s13731_s1 + $0x328] ss:$16 sps:$4 sm:$0xff]   ;;  %v513_v9 = vld [vmem:[%s10993_s8 + $0x640] sm:$0xff] }
  0x58   : > { %4724 = vmatprep.subr.bf16.mxu0 %v9750_v12  ;;  %5854 = vmatprep.subr.bf16.mxu1 %v9753_v13  ;;  %v9807_v12 = vld [vmem:[%s13731_s1 + $0x34c] ss:$16 sps:$4 sm:$0xff]   ;;  %v9802_v13 = vld [vmem:[%s13731_s1 + $0x340] ss:$16 sps:$4 sm:$0xff]  }
  0x59   : > { %4651 = vmatprep.mubr.bf16.mxu0 %v654_v15  ;;  %5781 = vmatprep.mubr.bf16.mxu1 %v654_v15  ;;  %v9805_v15 = vld [vmem:[%s13731_s1 + $0x348] ss:$16 sps:$4 sm:$0xff]  }
  0x5b   : > { %4725 = vmatpush1.bf16.msra.mxu0 %v9748_v14  ;;  %5855 = vmatpush1.bf16.msra.mxu1 %v9751_v16  ;;  %v733_v14 = vpack.c.bf16 %v533_v10, %v513_v9  ;;  %v554_v16 = vld [vmem:[%s10993_s8 + $0x788] sm:$0xff]  ;;  %v9858_v10 = vld [vmem:[%s13731_s1 + $0x464] ss:$16 sps:$4 sm:$0xff]  }
  0x5c   : > { %4726 = vmatprep.subr.bf16.mxu0 %v9756_v19  ;;  %5856 = vmatprep.subr.bf16.mxu1 %v9759_v20  ;;  %v9813_v19 = vld [vmem:[%s13731_s1 + $0x36c] ss:$16 sps:$4 sm:$0xff]   ;;  %v9808_v20 = vld [vmem:[%s13731_s1 + $0x360] ss:$16 sps:$4 sm:$0xff]   ;;  %v9853_v9 = vld [vmem:[%s13731_s1 + $0x448] ss:$16 sps:$4 sm:$0xff]  }
  0x5e   : > { %4652 = vmatmul.mubr.bf16.gmra.mrb[4].mxu0 %v653_v23  ;;  %5782 = vmatmul.mubr.bf16.gmra.mrb[4].mxu1 %v653_v23  ;;  %v553_v23 = vld [vmem:[%s10993_s8 + $0x780] sm:$0xff] }
  0x5f   : > { %4727 = vmatpush1.bf16.msra.mxu0 %v9754_v21  ;;  %5857 = vmatpush1.bf16.msra.mxu1 %v9757_v22  ;;  %v754_v21 = vpack.c.bf16 %v574_v17, %v554_v16  ;;  %v9811_v22 = vld [vmem:[%s13731_s1 + $0x368] ss:$16 sps:$4 sm:$0xff]   ;;  %v415_v16 = vld [vmem:[%s10993_s8 + $0x330] sm:$0xff] }
  0x60   : > { %4728 = vmatprep.subr.bf16.mxu0 %v9762_v26  ;;  %5858 = vmatprep.subr.bf16.mxu1 %v9765_v27  ;;  %v9819_v26 = vld [vmem:[%s13731_s1 + $0x38c] ss:$16 sps:$4 sm:$0xff]   ;;  %v9814_v27 = vld [vmem:[%s13731_s1 + $0x380] ss:$16 sps:$4 sm:$0xff]   ;;  %v9864_v17 = vld [vmem:[%s13731_s1 + $0x484] ss:$16 sps:$4 sm:$0xff]  }
  0x61   : > { %4661 = vmatprep.mubr.bf16.mxu0 %v674_v28  ;;  %5791 = vmatprep.mubr.bf16.mxu1 %v674_v28  ;;  %v9817_v28 = vld [vmem:[%s13731_s1 + $0x388] ss:$16 sps:$4 sm:$0xff]  }
  0x63   : > { %4729 = vmatpush1.bf16.msra.mxu0 %v9760_v29  ;;  %5859 = vmatpush1.bf16.msra.mxu1 %v9763_v30  ;;  %v753_v29 = vpack.c.bf16 %v573_v24, %v553_v23  ;;  %v594_v30 = vld [vmem:[%s10993_s8 + $0x8c8] sm:$0xff]  ;;  %v456_v23 = vld [vmem:[%s10993_s8 + $0x478] sm:$0xff]  ;;  %v9870_v24 = vld [vmem:[%s13731_s1 + $0x4a4] ss:$16 sps:$4 sm:$0xff]  }
  0x64   : > { %4730 = vmatprep.subr.bf16.mxu0 %v9768_v33  ;;  %5860 = vmatprep.subr.bf16.mxu1 %v9771_v34  ;;  %v9825_v33 = vld [vmem:[%s13731_s1 + $0x3ac] ss:$16 sps:$4 sm:$0xff]   ;;  %v774_v34 = vpack.c.bf16 %v614_v31, %v594_v30  ;;  %v455_v30 = vld [vmem:[%s10993_s8 + $0x470] sm:$0xff] }
  0x65   : > { %v9876_v31 = vld [vmem:[%s13731_s1 + $0x4c4] ss:$16 sps:$4 sm:$0xff]  }
  0x66   : > { %4662 = vmatmul.mubr.bf16.gmra.mrb[8].mxu0 %v673_v37  ;;  %5792 = vmatmul.mubr.bf16.gmra.mrb[8].mxu1 %v673_v37  ;;  %v593_v37 = vld [vmem:[%s10993_s8 + $0x8c0] sm:$0xff] }
  0x67   : > { %4731 = vmatpush1.bf16.msra.mxu0 %v9766_v35  ;;  %5861 = vmatpush1.bf16.msra.mxu1 %v9769_v36  ;;  %v9820_v35 = vld [vmem:[%s13731_s1 + $0x3a0] ss:$16 sps:$4 sm:$0xff]   ;;  %v9823_v36 = vld [vmem:[%s13731_s1 + $0x3a8] ss:$16 sps:$4 sm:$0xff]  }
  0x68   : > { %4732 = vmatprep.subr.bf16.mxu0 %v9774_v40  ;;  %5862 = vmatprep.subr.bf16.mxu1 %v9777_v41  ;;  %v9831_v40 = vld [vmem:[%s13731_s1 + $0x3cc] ss:$16 sps:$4 sm:$0xff]   ;;  %v9826_v41 = vld [vmem:[%s13731_s1 + $0x3c0] ss:$16 sps:$4 sm:$0xff]  }
  0x69   : > { %4671 = vmatprep.mubr.bf16.mxu0 %v694_v43  ;;  %5801 = vmatprep.mubr.bf16.mxu1 %v694_v43  ;;  %v773_v43 = vpack.c.bf16 %v613_v38, %v593_v37  ;;  %v496_v37 = vld [vmem:[%s10993_s8 + $0x5b8] sm:$0xff]  ;;  %v9882_v38 = vld [vmem:[%s13731_s1 + $0x4e4] ss:$16 sps:$4 sm:$0xff]  }
  0x6b   : > { %4733 = vmatpush1.bf16.msra.mxu0 %v9772_v42  ;;  %5863 = vmatpush1.bf16.msra.mxu1 %v9775_v44  ;;  %v9829_v42 = vld [vmem:[%s13731_s1 + $0x3c8] ss:$16 sps:$4 sm:$0xff]  }
  0x6c   : > { %4734 = vmatprep.subr.bf16.mxu0 %v9780_v47  ;;  %5864 = vmatprep.subr.bf16.mxu1 %v9783_v48  ;;  %v316_v44 = vld [vmem:[%s10993_s8 + $0x18] sm:$0xff]  ;;  %v9832_v48 = vld [vmem:[%s13731_s1 + $0x3e0] ss:$16 sps:$4 sm:$0xff]  }
  0x6d   : > { %v9837_v47 = vld [vmem:[%s13731_s1 + $0x3ec] ss:$16 sps:$4 sm:$0xff]  }
  0x6e   : > { %4672 = vmatmul.mubr.bf16.gmra.mrb[12].mxu0 %v693_v50  ;;  %5802 = vmatmul.mubr.bf16.gmra.mrb[12].mxu1 %v693_v50  ;;  %v9835_v50 = vld [vmem:[%s13731_s1 + $0x3e8] ss:$16 sps:$4 sm:$0xff]  }
  0x6f   : > { %4735 = vmatpush1.bf16.msra.mxu0 %v9778_v49  ;;  %5865 = vmatpush1.bf16.msra.mxu1 %v9781_v53  ;;  %v636_v49 = vpack.c.bf16 %v336_v45, %v316_v44  ;;  %v9840_v53 = vld [vmem:[%s13731_s1 + $0x404] ss:$16 sps:$4 sm:$0xff]  }
  0x70   : > { %4736 = vmatprep.subr.bf16.mxu0 %v9786_v54  ;;  %5866 = vmatprep.subr.bf16.mxu1 %v9789_v55  ;;  %v9843_v54 = vld [vmem:[%s13731_s1 + $0x40c] ss:$16 sps:$4 sm:$0xff]   ;;  %v9838_v55 = vld [vmem:[%s13731_s1 + $0x400] ss:$16 sps:$4 sm:$0xff]   ;;  %v9888_v45 = vld [vmem:[%s13731_s1 + $0x504] ss:$16 sps:$4 sm:$0xff]  }
  0x71   : > { %4681 = vmatprep.mubr.bf16.mxu0 %v714_v58  ;;  %5811 = vmatprep.mubr.bf16.mxu1 %v714_v58  ;;  %v376_v58 = vld [vmem:[%s10993_s8 + $0x1f8] sm:$0xff]  ;;  %v495_v44 = vld [vmem:[%s10993_s8 + $0x5b0] sm:$0xff] }
  0x73   : > { %4737 = vmatpush1.bf16.msra.mxu0 %v9784_v56  ;;  %5867 = vmatpush1.bf16.msra.mxu1 %v9787_v57  ;;  %v635_v56 = vpack.c.bf16 %v335_v52, %v315_v51  ;;  %v356_v57 = vld [vmem:[%s10993_s8 + $0x158] sm:$0xff]  ;;  %v9894_v52 = vld [vmem:[%s13731_s1 + $0x524] ss:$16 sps:$4 sm:$0xff]  }
  0x74   : > { %4738 = vmatprep.subr.bf16.mxu0 %v9792_v61  ;;  %5868 = vmatprep.subr.bf16.mxu1 %v9795_v62  ;;  %v9849_v61 = vld [vmem:[%s13731_s1 + $0x42c] ss:$16 sps:$4 sm:$0xff]   ;;  %v9844_v62 = vld [vmem:[%s13731_s1 + $0x420] ss:$16 sps:$4 sm:$0xff]   ;;  %v656_v0 = vpack.c.bf16 %v376_v58, %v356_v57 }
  0x75   : > { %v536_v51 = vld [vmem:[%s10993_s8 + $0x6f8] sm:$0xff]  ;;  %v515_v57 = vld [vmem:[%s10993_s8 + $0x650] sm:$0xff] }
  0x76   : > { %4682 = vmatmul.mubr.bf16.gmra.mrb[16].mxu0 %v713_v63  ;;  %5812 = vmatmul.mubr.bf16.gmra.mrb[16].mxu1 %v713_v63  ;;  %v9847_v63 = vld [vmem:[%s13731_s1 + $0x428] ss:$16 sps:$4 sm:$0xff]   ;;  %v535_v58 = vld [vmem:[%s10993_s8 + $0x6f0] sm:$0xff] }
  0x77   : > { %4739 = vmatpush1.bf16.msra.mxu0 %v9790_v2  ;;  %5869 = vmatpush1.bf16.msra.mxu1 %v9793_v3  ;;  %v375_v2 = vld [vmem:[%s10993_s8 + $0x1f0] sm:$0xff] }
  0x78   : > { %4740 = vmatprep.subr.bf16.mxu0 %v9798_v4  ;;  %5870 = vmatprep.subr.bf16.mxu1 %v9801_v5  ;;  %v9852_v3 = vld [vmem:[%s13731_s1 + $0x444] ss:$16 sps:$4 sm:$0xff]   ;;  %v9855_v4 = vld [vmem:[%s13731_s1 + $0x44c] ss:$16 sps:$4 sm:$0xff]   ;;  %v655_v5 = vpack.c.bf16 %v375_v2, %v355_v1  ;;  %v9901_v1 = vld [vmem:[%s13731_s1 + $0x548] ss:$16 sps:$4 sm:$0xff]  }
  0x79   : > { %4691 = vmatprep.mubr.bf16.mxu0 %v734_v8  ;;  %5821 = vmatprep.mubr.bf16.mxu1 %v734_v8  ;;  %v9850_v8 = vld [vmem:[%s13731_s1 + $0x440] ss:$16 sps:$4 sm:$0xff]   ;;  %v9906_v2 = vld [vmem:[%s13731_s1 + $0x564] ss:$16 sps:$4 sm:$0xff]  }
  0x7b   : > { %4741 = vmatpush1.bf16.msra.mxu0 %v9796_v6  ;;  %5871 = vmatpush1.bf16.msra.mxu1 %v9799_v7  ;;  %v396_v6 = vld [vmem:[%s10993_s8 + $0x298] sm:$0xff] }
  0x7c   : > { %4742 = vmatprep.subr.bf16.mxu0 %v9804_v11  ;;  %5872 = vmatprep.subr.bf16.mxu1 %v9807_v12  ;;  %v416_v7 = vld [vmem:[%s10993_s8 + $0x338] sm:$0xff]  ;;  %v9856_v12 = vld [vmem:[%s13731_s1 + $0x460] ss:$16 sps:$4 sm:$0xff]  }
  0x7d   : > { %v9861_v11 = vld [vmem:[%s13731_s1 + $0x46c] ss:$16 sps:$4 sm:$0xff]  }
  0x7e   : > { %4692 = vmatmul.mubr.bf16.gmra.mrb[20].mxu0 %v733_v14  ;;  %5822 = vmatmul.mubr.bf16.gmra.mrb[20].mxu1 %v733_v14  ;;  %v676_v14 = vpack.c.bf16 %v416_v7, %v396_v6  ;;  %v555_v7 = vld [vmem:[%s10993_s8 + $0x790] sm:$0xff] }
  0x7f   : > { %4743 = vmatpush1.bf16.msra.mxu0 %v9802_v13  ;;  %5873 = vmatpush1.bf16.msra.mxu1 %v9805_v15  ;;  %v9859_v13 = vld [vmem:[%s13731_s1 + $0x468] ss:$16 sps:$4 sm:$0xff]   ;;  %v395_v15 = vld [vmem:[%s10993_s8 + $0x290] sm:$0xff] }
  0x80   : > { %4744 = vmatprep.subr.bf16.mxu0 %v9810_v18  ;;  %5874 = vmatprep.subr.bf16.mxu1 %v9813_v19  ;;  %v9867_v18 = vld [vmem:[%s13731_s1 + $0x48c] ss:$16 sps:$4 sm:$0xff]   ;;  %v9862_v19 = vld [vmem:[%s13731_s1 + $0x480] ss:$16 sps:$4 sm:$0xff]  }
  0x81   : > { %4701 = vmatprep.mubr.bf16.mxu0 %v754_v21  ;;  %5831 = vmatprep.mubr.bf16.mxu1 %v754_v21  ;;  %v9865_v21 = vld [vmem:[%s13731_s1 + $0x488] ss:$16 sps:$4 sm:$0xff]  }
  0x83   : > { %4745 = vmatpush1.bf16.msra.mxu0 %v9808_v20  ;;  %5875 = vmatpush1.bf16.msra.mxu1 %v9811_v22  ;;  %v675_v20 = vpack.c.bf16 %v415_v16, %v395_v15  ;;  %v436_v22 = vld [vmem:[%s10993_s8 + $0x3d8] sm:$0xff]  ;;  %v9918_v16 = vld [vmem:[%s13731_s1 + $0x5a4] ss:$16 sps:$4 sm:$0xff]  }
  0x84   : > { %4746 = vmatprep.subr.bf16.mxu0 %v9816_v25  ;;  %5876 = vmatprep.subr.bf16.mxu1 %v9819_v26  ;;  %v9873_v25 = vld [vmem:[%s13731_s1 + $0x4ac] ss:$16 sps:$4 sm:$0xff]   ;;  %v9868_v26 = vld [vmem:[%s13731_s1 + $0x4a0] ss:$16 sps:$4 sm:$0xff]   ;;  %v9913_v15 = vld [vmem:[%s13731_s1 + $0x588] ss:$16 sps:$4 sm:$0xff]  }
  0x86   : > { %4702 = vmatmul.mubr.bf16.gmra.mrb[24].mxu0 %v753_v29  ;;  %5832 = vmatmul.mubr.bf16.gmra.mrb[24].mxu1 %v753_v29  ;;  %v435_v29 = vld [vmem:[%s10993_s8 + $0x3d0] sm:$0xff] }
  0x87   : > { %4747 = vmatpush1.bf16.msra.mxu0 %v9814_v27  ;;  %5877 = vmatpush1.bf16.msra.mxu1 %v9817_v28  ;;  %v696_v27 = vpack.c.bf16 %v456_v23, %v436_v22  ;;  %v9871_v28 = vld [vmem:[%s13731_s1 + $0x4a8] ss:$16 sps:$4 sm:$0xff]   ;;  %v615_v22 = vld [vmem:[%s10993_s8 + $0x970] sm:$0xff] }
  0x88   : > { %4748 = vmatprep.subr.bf16.mxu0 %v9822_v32  ;;  %5878 = vmatprep.subr.bf16.mxu1 %v9825_v33  ;;  %v9879_v32 = vld [vmem:[%s13731_s1 + $0x4cc] ss:$16 sps:$4 sm:$0xff]   ;;  %v9874_v33 = vld [vmem:[%s13731_s1 + $0x4c0] ss:$16 sps:$4 sm:$0xff]   ;;  %v9924_v23 = vld [vmem:[%s13731_s1 + $0x5c4] ss:$16 sps:$4 sm:$0xff]  }
  0x89   : > { %4711 = vmatprep.mubr.bf16.mxu0 %v774_v34  ;;  %5841 = vmatprep.mubr.bf16.mxu1 %v774_v34  ;;  %v9877_v34 = vld [vmem:[%s13731_s1 + $0x4c8] ss:$16 sps:$4 sm:$0xff]  }
  0x8b   : > { %4749 = vmatpush1.bf16.msra.mxu0 %v9820_v35  ;;  %5879 = vmatpush1.bf16.msra.mxu1 %v9823_v36  ;;  %v695_v35 = vpack.c.bf16 %v455_v30, %v435_v29  ;;  %v476_v36 = vld [vmem:[%s10993_s8 + $0x518] sm:$0xff]  ;;  %v338_v29 = vld [vmem:[%s10993_s8 + $0xc8] sm:$0xff]  ;;  %v9930_v30 = vld [vmem:[%s13731_s1 + $0x5e4] ss:$16 sps:$4 sm:$0xff]  }
  0x8c   : > { %4750 = vmatprep.subr.bf16.mxu0 %v9828_v39  ;;  %5880 = vmatprep.subr.bf16.mxu1 %v9831_v40  ;;  %v9885_v39 = vld [vmem:[%s13731_s1 + $0x4ec] ss:$16 sps:$4 sm:$0xff]   ;;  %v716_v40 = vpack.c.bf16 %v496_v37, %v476_v36  ;;  %v337_v36 = vld [vmem:[%s10993_s8 + $0xc0] sm:$0xff] }
  0x8d   : > { %v9936_v37 = vld [vmem:[%s13731_s1 + $0x604] ss:$16 sps:$4 sm:$0xff]  }
  0x8e   : > { %4712 = vmatmul.mubr.bf16.gmra.mrb[28].mxu0 %v773_v43  ;;  %5842 = vmatmul.mubr.bf16.gmra.mrb[28].mxu1 %v773_v43  ;;  %v475_v43 = vld [vmem:[%s10993_s8 + $0x510] sm:$0xff] }
  0x8f   : > { %4751 = vmatpush1.bf16.msra.mxu0 %v9826_v41  ;;  %5881 = vmatpush1.bf16.msra.mxu1 %v9829_v42  ;;  %v9880_v41 = vld [vmem:[%s13731_s1 + $0x4e0] ss:$16 sps:$4 sm:$0xff]   ;;  %v9883_v42 = vld [vmem:[%s13731_s1 + $0x4e8] ss:$16 sps:$4 sm:$0xff]  }
  0x90   : > { %4752 = vmatprep.subr.bf16.mxu0 %v9834_v46  ;;  %5882 = vmatprep.subr.bf16.mxu1 %v9837_v47  ;;  %v9891_v46 = vld [vmem:[%s13731_s1 + $0x50c] ss:$16 sps:$4 sm:$0xff]   ;;  %v9886_v47 = vld [vmem:[%s13731_s1 + $0x500] ss:$16 sps:$4 sm:$0xff]  }
  0x91   : > { %4754 = vmatprep.mubr.bf16.mxu0 %v636_v49  ;;  %5884 = vmatprep.mubr.bf16.mxu1 %v636_v49  ;;  %v715_v49 = vpack.c.bf16 %v495_v44, %v475_v43  ;;  %v378_v43 = vld [vmem:[%s10993_s8 + $0x208] sm:$0xff]  ;;  %v9942_v44 = vld [vmem:[%s13731_s1 + $0x624] ss:$16 sps:$4 sm:$0xff]  }
  0x93   : > { %4753 = vmatpush1.bf16.msra.mxu0 %v9832_v48  ;;  %5883 = vmatpush1.bf16.msra.mxu1 %v9835_v50  ;;  %v9889_v48 = vld [vmem:[%s13731_s1 + $0x508] ss:$16 sps:$4 sm:$0xff]  }
  0x94   : > { %4835 = vmatprep.subr.bf16.mxu0 %v9840_v53  ;;  %5965 = vmatprep.subr.bf16.mxu1 %v9843_v54  ;;  %v516_v50 = vld [vmem:[%s10993_s8 + $0x658] sm:$0xff]  ;;  %v9892_v54 = vld [vmem:[%s13731_s1 + $0x520] ss:$16 sps:$4 sm:$0xff]  }
  0x95   : > { %v9897_v53 = vld [vmem:[%s13731_s1 + $0x52c] ss:$16 sps:$4 sm:$0xff]  }
  0x96   : > { %4755 = vmatmul.mubr.bf16.vlgmr.msra.gmra.mrb[0].mxu0 %v635_v56  ;;  %5885 = vmatmul.mubr.bf16.vlgmr.msra.gmra.mrb[0].mxu1 %v635_v56  ;;  %v9895_v56 = vld [vmem:[%s13731_s1 + $0x528] ss:$16 sps:$4 sm:$0xff]  }
  0x97   : > { %4836 = vmatpush1.bf16.msra.mxu0 %v9838_v55  ;;  %5966 = vmatpush1.bf16.msra.mxu1 %v9841_v59  ;;  %v736_v55 = vpack.c.bf16 %v536_v51, %v516_v50  ;;  %v9900_v59 = vld [vmem:[%s13731_s1 + $0x544] ss:$16 sps:$4 sm:$0xff]  }
  0x98   : > { %4837 = vmatprep.subr.bf16.mxu0 %v9846_v60  ;;  %5967 = vmatprep.subr.bf16.mxu1 %v9849_v61  ;;  %v9903_v60 = vld [vmem:[%s13731_s1 + $0x54c] ss:$16 sps:$4 sm:$0xff]   ;;  %v9898_v61 = vld [vmem:[%s13731_s1 + $0x540] ss:$16 sps:$4 sm:$0xff]   ;;  %v9948_v51 = vld [vmem:[%s13731_s1 + $0x644] ss:$16 sps:$4 sm:$0xff]  }
  0x99   : > { %4764 = vmatprep.mubr.bf16.mxu0 %v656_v0  ;;  %5894 = vmatprep.mubr.bf16.mxu1 %v656_v0  ;;  %v576_v0 = vld [vmem:[%s10993_s8 + $0x838] sm:$0xff]  ;;  %v377_v50 = vld [vmem:[%s10993_s8 + $0x200] sm:$0xff] }
  0x9b   : > { %4838 = vmatpush1.bf16.msra.mxu0 %v9844_v62  ;;  %5968 = vmatpush1.bf16.msra.mxu1 %v9847_v63  ;;  %v735_v62 = vpack.c.bf16 %v535_v58, %v515_v57  ;;  %v556_v63 = vld [vmem:[%s10993_s8 + $0x798] sm:$0xff]  ;;  %v418_v57 = vld [vmem:[%s10993_s8 + $0x348] sm:$0xff]  ;;  %v9954_v58 = vld [vmem:[%s13731_s1 + $0x664] ss:$16 sps:$4 sm:$0xff]  }
  0x9c   : > { %4839 = vmatprep.subr.bf16.mxu0 %v9852_v3  ;;  %5969 = vmatprep.subr.bf16.mxu1 %v9855_v4  ;;  %v9909_v3 = vld [vmem:[%s13731_s1 + $0x56c] ss:$16 sps:$4 sm:$0xff]   ;;  %v9904_v4 = vld [vmem:[%s13731_s1 + $0x560] ss:$16 sps:$4 sm:$0xff]   ;;  %v756_v6 = vpack.c.bf16 %v576_v0, %v556_v63 }
  0x9d   : > { %v397_v63 = vld [vmem:[%s10993_s8 + $0x2a0] sm:$0xff] }
  0x9e   : > { %4765 = vmatmul.mubr.bf16.gmra.mrb[4].mxu0 %v655_v5  ;;  %5895 = vmatmul.mubr.bf16.gmra.mrb[4].mxu1 %v655_v5  ;;  %v9907_v5 = vld [vmem:[%s13731_s1 + $0x568] ss:$16 sps:$4 sm:$0xff]   ;;  %v417_v0 = vld [vmem:[%s10993_s8 + $0x340] sm:$0xff] }
  0x9f   : > { %4840 = vmatpush1.bf16.msra.mxu0 %v9850_v8  ;;  %5970 = vmatpush1.bf16.msra.mxu1 %v9853_v9  ;;  %v575_v8 = vld [vmem:[%s10993_s8 + $0x830] sm:$0xff] }
  0xa0   : > { %4841 = vmatprep.subr.bf16.mxu0 %v9858_v10  ;;  %5971 = vmatprep.subr.bf16.mxu1 %v9861_v11  ;;  %v9912_v9 = vld [vmem:[%s13731_s1 + $0x584] ss:$16 sps:$4 sm:$0xff]   ;;  %v9915_v10 = vld [vmem:[%s13731_s1 + $0x58c] ss:$16 sps:$4 sm:$0xff]   ;;  %v755_v11 = vpack.c.bf16 %v575_v8, %v555_v7  ;;  %v9961_v7 = vld [vmem:[%s13731_s1 + $0x688] ss:$16 sps:$4 sm:$0xff]  }
  0xa1   : > { %4774 = vmatprep.mubr.bf16.mxu0 %v676_v14  ;;  %5904 = vmatprep.mubr.bf16.mxu1 %v676_v14  ;;  %v9910_v14 = vld [vmem:[%s13731_s1 + $0x580] ss:$16 sps:$4 sm:$0xff]   ;;  %v9966_v8 = vld [vmem:[%s13731_s1 + $0x6a4] ss:$16 sps:$4 sm:$0xff]  }
  0xa3   : > { %4842 = vmatpush1.bf16.msra.mxu0 %v9856_v12  ;;  %5972 = vmatpush1.bf16.msra.mxu1 %v9859_v13  ;;  %v596_v12 = vld [vmem:[%s10993_s8 + $0x8d8] sm:$0xff] }
  0xa4   : > { %4843 = vmatprep.subr.bf16.mxu0 %v9864_v17  ;;  %5973 = vmatprep.subr.bf16.mxu1 %v9867_v18  ;;  %v616_v13 = vld [vmem:[%s10993_s8 + $0x978] sm:$0xff]  ;;  %v9916_v18 = vld [vmem:[%s13731_s1 + $0x5a0] ss:$16 sps:$4 sm:$0xff]  }
  0xa5   : > { %v9921_v17 = vld [vmem:[%s13731_s1 + $0x5ac] ss:$16 sps:$4 sm:$0xff]  }
  0xa6   : > { %4775 = vmatmul.mubr.bf16.gmra.mrb[8].mxu0 %v675_v20  ;;  %5905 = vmatmul.mubr.bf16.gmra.mrb[8].mxu1 %v675_v20  ;;  %v776_v20 = vpack.c.bf16 %v616_v13, %v596_v12  ;;  %v437_v13 = vld [vmem:[%s10993_s8 + $0x3e0] sm:$0xff] }
  0xa7   : > { %4844 = vmatpush1.bf16.msra.mxu0 %v9862_v19  ;;  %5974 = vmatpush1.bf16.msra.mxu1 %v9865_v21  ;;  %v9919_v19 = vld [vmem:[%s13731_s1 + $0x5a8] ss:$16 sps:$4 sm:$0xff]   ;;  %v595_v21 = vld [vmem:[%s10993_s8 + $0x8d0] sm:$0xff] }
  0xa8   : > { %4845 = vmatprep.subr.bf16.mxu0 %v9870_v24  ;;  %5975 = vmatprep.subr.bf16.mxu1 %v9873_v25  ;;  %v9927_v24 = vld [vmem:[%s13731_s1 + $0x5cc] ss:$16 sps:$4 sm:$0xff]   ;;  %v9922_v25 = vld [vmem:[%s13731_s1 + $0x5c0] ss:$16 sps:$4 sm:$0xff]  }
  0xa9   : > { %4784 = vmatprep.mubr.bf16.mxu0 %v696_v27  ;;  %5914 = vmatprep.mubr.bf16.mxu1 %v696_v27  ;;  %v9925_v27 = vld [vmem:[%s13731_s1 + $0x5c8] ss:$16 sps:$4 sm:$0xff]  }
  0xab   : > { %4846 = vmatpush1.bf16.msra.mxu0 %v9868_v26  ;;  %5976 = vmatpush1.bf16.msra.mxu1 %v9871_v28  ;;  %v775_v26 = vpack.c.bf16 %v615_v22, %v595_v21  ;;  %v318_v28 = vld [vmem:[%s10993_s8 + $0x28] sm:$0xff]  ;;  %v9978_v22 = vld [vmem:[%s13731_s1 + $0x6e4] ss:$16 sps:$4 sm:$0xff]  }
  0xac   : > { %4847 = vmatprep.subr.bf16.mxu0 %v9876_v31  ;;  %5977 = vmatprep.subr.bf16.mxu1 %v9879_v32  ;;  %v9933_v31 = vld [vmem:[%s13731_s1 + $0x5ec] ss:$16 sps:$4 sm:$0xff]   ;;  %v9928_v32 = vld [vmem:[%s13731_s1 + $0x5e0] ss:$16 sps:$4 sm:$0xff]   ;;  %v9973_v21 = vld [vmem:[%s13731_s1 + $0x6c8] ss:$16 sps:$4 sm:$0xff]  }
  0xae   : > { %4785 = vmatmul.mubr.bf16.gmra.mrb[12].mxu0 %v695_v35  ;;  %5915 = vmatmul.mubr.bf16.gmra.mrb[12].mxu1 %v695_v35  ;;  %v317_v35 = vld [vmem:[%s10993_s8 + $0x20] sm:$0xff] }
  0xaf   : > { %4848 = vmatpush1.bf16.msra.mxu0 %v9874_v33  ;;  %5978 = vmatpush1.bf16.msra.mxu1 %v9877_v34  ;;  %v638_v33 = vpack.c.bf16 %v338_v29, %v318_v28  ;;  %v9931_v34 = vld [vmem:[%s13731_s1 + $0x5e8] ss:$16 sps:$4 sm:$0xff]   ;;  %v497_v28 = vld [vmem:[%s10993_s8 + $0x5c0] sm:$0xff] }
  0xb0   : > { %4849 = vmatprep.subr.bf16.mxu0 %v9882_v38  ;;  %5979 = vmatprep.subr.bf16.mxu1 %v9885_v39  ;;  %v9939_v38 = vld [vmem:[%s13731_s1 + $0x60c] ss:$16 sps:$4 sm:$0xff]   ;;  %v9934_v39 = vld [vmem:[%s13731_s1 + $0x600] ss:$16 sps:$4 sm:$0xff]   ;;  %v9984_v29 = vld [vmem:[%s13731_s1 + $0x704] ss:$16 sps:$4 sm:$0xff]  }
  0xb1   : > { %4794 = vmatprep.mubr.bf16.mxu0 %v716_v40  ;;  %5924 = vmatprep.mubr.bf16.mxu1 %v716_v40  ;;  %v9937_v40 = vld [vmem:[%s13731_s1 + $0x608] ss:$16 sps:$4 sm:$0xff]  }
  0xb3   : > { %4850 = vmatpush1.bf16.msra.mxu0 %v9880_v41  ;;  %5980 = vmatpush1.bf16.msra.mxu1 %v9883_v42  ;;  %v637_v41 = vpack.c.bf16 %v337_v36, %v317_v35  ;;  %v358_v42 = vld [vmem:[%s10993_s8 + $0x168] sm:$0xff]  ;;  %v9990_v36 = vld [vmem:[%s13731_s1 + $0x724] ss:$16 sps:$4 sm:$0xff]  }
  0xb4   : > { %4851 = vmatprep.subr.bf16.mxu0 %v9888_v45  ;;  %5981 = vmatprep.subr.bf16.mxu1 %v9891_v46  ;;  %v9945_v45 = vld [vmem:[%s13731_s1 + $0x62c] ss:$16 sps:$4 sm:$0xff]   ;;  %v658_v46 = vpack.c.bf16 %v378_v43, %v358_v42  ;;  %v537_v42 = vld [vmem:[%s10993_s8 + $0x700] sm:$0xff] }
  0xb5   : > { %v538_v35 = vld [vmem:[%s10993_s8 + $0x708] sm:$0xff]  ;;  %v9996_v43 = vld [vmem:[%s13731_s1 + $0x744] ss:$16 sps:$4 sm:$0xff]  }
  0xb6   : > { %4795 = vmatmul.mubr.bf16.gmra.mrb[16].mxu0 %v715_v49  ;;  %5925 = vmatmul.mubr.bf16.gmra.mrb[16].mxu1 %v715_v49  ;;  %v357_v49 = vld [vmem:[%s10993_s8 + $0x160] sm:$0xff] }
  0xb7   : > { %4852 = vmatpush1.bf16.msra.mxu0 %v9886_v47  ;;  %5982 = vmatpush1.bf16.msra.mxu1 %v9889_v48  ;;  %v9940_v47 = vld [vmem:[%s13731_s1 + $0x620] ss:$16 sps:$4 sm:$0xff]   ;;  %v9943_v48 = vld [vmem:[%s13731_s1 + $0x628] ss:$16 sps:$4 sm:$0xff]  }
  0xb8   : > { %4853 = vmatprep.subr.bf16.mxu0 %v9894_v52  ;;  %5983 = vmatprep.subr.bf16.mxu1 %v9897_v53  ;;  %v9951_v52 = vld [vmem:[%s13731_s1 + $0x64c] ss:$16 sps:$4 sm:$0xff]   ;;  %v9946_v53 = vld [vmem:[%s13731_s1 + $0x640] ss:$16 sps:$4 sm:$0xff]  }
  0xb9   : > { %4804 = vmatprep.mubr.bf16.mxu0 %v736_v55  ;;  %5934 = vmatprep.mubr.bf16.mxu1 %v736_v55  ;;  %v657_v55 = vpack.c.bf16 %v377_v50, %v357_v49  ;;  %v578_v49 = vld [vmem:[%s10993_s8 + $0x848] sm:$0xff]  ;;  %v10002_v50 = vld [vmem:[%s13731_s1 + $0x764] ss:$16 sps:$4 sm:$0xff]  }
  0xbb   : > { %4854 = vmatpush1.bf16.msra.mxu0 %v9892_v54  ;;  %5984 = vmatpush1.bf16.msra.mxu1 %v9895_v56  ;;  %v9949_v54 = vld [vmem:[%s13731_s1 + $0x648] ss:$16 sps:$4 sm:$0xff]  }
  0xbc   : > { %4855 = vmatprep.subr.bf16.mxu0 %v9900_v59  ;;  %5985 = vmatprep.subr.bf16.mxu1 %v9903_v60  ;;  %v398_v56 = vld [vmem:[%s10993_s8 + $0x2a8] sm:$0xff]  ;;  %v9952_v60 = vld [vmem:[%s13731_s1 + $0x660] ss:$16 sps:$4 sm:$0xff]  }
  0xbd   : > { %v9957_v59 = vld [vmem:[%s13731_s1 + $0x66c] ss:$16 sps:$4 sm:$0xff]  }
  0xbe   : > { %4805 = vmatmul.mubr.bf16.gmra.mrb[20].mxu0 %v735_v62  ;;  %5935 = vmatmul.mubr.bf16.gmra.mrb[20].mxu1 %v735_v62  ;;  %v9955_v62 = vld [vmem:[%s13731_s1 + $0x668] ss:$16 sps:$4 sm:$0xff]  }
  0xbf   : > { %4856 = vmatpush1.bf16.msra.mxu0 %v9898_v61  ;;  %5986 = vmatpush1.bf16.msra.mxu1 %v9901_v1  ;;  %v678_v61 = vpack.c.bf16 %v418_v57, %v398_v56  ;;  %v9960_v1 = vld [vmem:[%s13731_s1 + $0x684] ss:$16 sps:$4 sm:$0xff]  }
  0xc0   : > { %4857 = vmatprep.subr.bf16.mxu0 %v9906_v2  ;;  %5987 = vmatprep.subr.bf16.mxu1 %v9909_v3  ;;  %v9963_v2 = vld [vmem:[%s13731_s1 + $0x68c] ss:$16 sps:$4 sm:$0xff]   ;;  %v9958_v3 = vld [vmem:[%s13731_s1 + $0x680] ss:$16 sps:$4 sm:$0xff]   ;;  %v10008_v57 = vld [vmem:[%s13731_s1 + $0x784] ss:$16 sps:$4 sm:$0xff]  }
  0xc1   : > { %4814 = vmatprep.mubr.bf16.mxu0 %v756_v6  ;;  %5944 = vmatprep.mubr.bf16.mxu1 %v756_v6  ;;  %v458_v6 = vld [vmem:[%s10993_s8 + $0x488] sm:$0xff]  ;;  %v577_v56 = vld [vmem:[%s10993_s8 + $0x840] sm:$0xff] }
  0xc3   : > { %4858 = vmatpush1.bf16.msra.mxu0 %v9904_v4  ;;  %5988 = vmatpush1.bf16.msra.mxu1 %v9907_v5  ;;  %v677_v4 = vpack.c.bf16 %v417_v0, %v397_v63  ;;  %v438_v5 = vld [vmem:[%s10993_s8 + $0x3e8] sm:$0xff]  ;;  %v10014_v0 = vld [vmem:[%s13731_s1 + $0x7a4] ss:$16 sps:$4 sm:$0xff]  }
  0xc4   : > { %4859 = vmatprep.subr.bf16.mxu0 %v9912_v9  ;;  %5989 = vmatprep.subr.bf16.mxu1 %v9915_v10  ;;  %v9969_v9 = vld [vmem:[%s13731_s1 + $0x6ac] ss:$16 sps:$4 sm:$0xff]   ;;  %v9964_v10 = vld [vmem:[%s13731_s1 + $0x6a0] ss:$16 sps:$4 sm:$0xff]   ;;  %v698_v12 = vpack.c.bf16 %v458_v6, %v438_v5 }
  0xc5   : > { %v618_v63 = vld [vmem:[%s10993_s8 + $0x988] sm:$0xff]  ;;  %v597_v5 = vld [vmem:[%s10993_s8 + $0x8e0] sm:$0xff] }
  0xc6   : > { %4815 = vmatmul.mubr.bf16.gmra.mrb[24].mxu0 %v755_v11  ;;  %5945 = vmatmul.mubr.bf16.gmra.mrb[24].mxu1 %v755_v11  ;;  %v9967_v11 = vld [vmem:[%s13731_s1 + $0x6a8] ss:$16 sps:$4 sm:$0xff]   ;;  %v617_v6 = vld [vmem:[%s10993_s8 + $0x980] sm:$0xff] }
  0xc7   : > { %4860 = vmatpush1.bf16.msra.mxu0 %v9910_v14  ;;  %5990 = vmatpush1.bf16.msra.mxu1 %v9913_v15  ;;  %v457_v14 = vld [vmem:[%s10993_s8 + $0x480] sm:$0xff] }
  0xc8   : > { %4861 = vmatprep.subr.bf16.mxu0 %v9918_v16  ;;  %5991 = vmatprep.subr.bf16.mxu1 %v9921_v17  ;;  %v9972_v15 = vld [vmem:[%s13731_s1 + $0x6c4] ss:$16 sps:$4 sm:$0xff]   ;;  %v9975_v16 = vld [vmem:[%s13731_s1 + $0x6cc] ss:$16 sps:$4 sm:$0xff]   ;;  %v697_v17 = vpack.c.bf16 %v457_v14, %v437_v13  ;;  %v10021_v13 = vld [vmem:[%s13731_s1 + $0x7c8] ss:$16 sps:$4 sm:$0xff]  }
  0xc9   : > { %4824 = vmatprep.mubr.bf16.mxu0 %v776_v20  ;;  %5954 = vmatprep.mubr.bf16.mxu1 %v776_v20  ;;  %v9970_v20 = vld [vmem:[%s13731_s1 + $0x6c0] ss:$16 sps:$4 sm:$0xff]   ;;  %v10026_v14 = vld [vmem:[%s13731_s1 + $0x7e4] ss:$16 sps:$4 sm:$0xff]  }
  0xcb   : > { %4862 = vmatpush1.bf16.msra.mxu0 %v9916_v18  ;;  %5992 = vmatpush1.bf16.msra.mxu1 %v9919_v19  ;;  %v478_v18 = vld [vmem:[%s10993_s8 + $0x528] sm:$0xff] }
  0xcc   : > { %4863 = vmatprep.subr.bf16.mxu0 %v9924_v23  ;;  %5993 = vmatprep.subr.bf16.mxu1 %v9927_v24  ;;  %v498_v19 = vld [vmem:[%s10993_s8 + $0x5c8] sm:$0xff]  ;;  %v9976_v24 = vld [vmem:[%s13731_s1 + $0x6e0] ss:$16 sps:$4 sm:$0xff]  }
  0xcd   : > { %v9981_v23 = vld [vmem:[%s13731_s1 + $0x6ec] ss:$16 sps:$4 sm:$0xff]  }
  0xce   : > { %4825 = vmatmul.mubr.bf16.gmra.mrb[28].mxu0 %v775_v26  ;;  %5955 = vmatmul.mubr.bf16.gmra.mrb[28].mxu1 %v775_v26  ;;  %v718_v26 = vpack.c.bf16 %v498_v19, %v478_v18  ;;  %v319_v19 = vld [vmem:[%s10993_s8 + $0x30] sm:$0xff] }
  0xcf   : > { %4864 = vmatpush1.bf16.msra.mxu0 %v9922_v25  ;;  %5994 = vmatpush1.bf16.msra.mxu1 %v9925_v27  ;;  %v9979_v25 = vld [vmem:[%s13731_s1 + $0x6e8] ss:$16 sps:$4 sm:$0xff]   ;;  %v477_v27 = vld [vmem:[%s10993_s8 + $0x520] sm:$0xff] }
  0xd0   : > { %4865 = vmatprep.subr.bf16.mxu0 %v9930_v30  ;;  %5995 = vmatprep.subr.bf16.mxu1 %v9933_v31  ;;  %v9987_v30 = vld [vmem:[%s13731_s1 + $0x70c] ss:$16 sps:$4 sm:$0xff]   ;;  %v9982_v31 = vld [vmem:[%s13731_s1 + $0x700] ss:$16 sps:$4 sm:$0xff]  }
  0xd1   : > { %4867 = vmatprep.mubr.bf16.mxu0 %v638_v33  ;;  %5997 = vmatprep.mubr.bf16.mxu1 %v638_v33  ;;  %v9985_v33 = vld [vmem:[%s13731_s1 + $0x708] ss:$16 sps:$4 sm:$0xff]  }
  0xd3   : > { %4866 = vmatpush1.bf16.msra.mxu0 %v9928_v32  ;;  %5996 = vmatpush1.bf16.msra.mxu1 %v9931_v34  ;;  %v717_v32 = vpack.c.bf16 %v497_v28, %v477_v27  ;;  %v518_v34 = vld [vmem:[%s10993_s8 + $0x668] sm:$0xff]  ;;  %v10038_v28 = vld [vmem:[%s13731_s1 + $0x824] ss:$16 sps:$4 sm:$0xff]  }
  0xd4   : > { %4948 = vmatprep.subr.bf16.mxu0 %v9936_v37  ;;  %6078 = vmatprep.subr.bf16.mxu1 %v9939_v38  ;;  %v9993_v37 = vld [vmem:[%s13731_s1 + $0x72c] ss:$16 sps:$4 sm:$0xff]   ;;  %v9988_v38 = vld [vmem:[%s13731_s1 + $0x720] ss:$16 sps:$4 sm:$0xff]   ;;  %v10033_v27 = vld [vmem:[%s13731_s1 + $0x808] ss:$16 sps:$4 sm:$0xff]  }
  0xd6   : > { %4868 = vmatmul.mubr.bf16.vlgmr.msra.gmra.mrb[0].mxu0 %v637_v41  ;;  %5998 = vmatmul.mubr.bf16.vlgmr.msra.gmra.mrb[0].mxu1 %v637_v41  ;;  %v517_v41 = vld [vmem:[%s10993_s8 + $0x660] sm:$0xff] }
  0xd7   : > { %4949 = vmatpush1.bf16.msra.mxu0 %v9934_v39  ;;  %6079 = vmatpush1.bf16.msra.mxu1 %v9937_v40  ;;  %v738_v39 = vpack.c.bf16 %v538_v35, %v518_v34  ;;  %v9991_v40 = vld [vmem:[%s13731_s1 + $0x728] ss:$16 sps:$4 sm:$0xff]   ;;  %v379_v34 = vld [vmem:[%s10993_s8 + $0x210] sm:$0xff] }
  0xd8   : > { %4950 = vmatprep.subr.bf16.mxu0 %v9942_v44  ;;  %6080 = vmatprep.subr.bf16.mxu1 %v9945_v45  ;;  %v9999_v44 = vld [vmem:[%s13731_s1 + $0x74c] ss:$16 sps:$4 sm:$0xff]   ;;  %v9994_v45 = vld [vmem:[%s13731_s1 + $0x740] ss:$16 sps:$4 sm:$0xff]   ;;  %v10044_v35 = vld [vmem:[%s13731_s1 + $0x844] ss:$16 sps:$4 sm:$0xff]  }
  0xd9   : > { %4877 = vmatprep.mubr.bf16.mxu0 %v658_v46  ;;  %6007 = vmatprep.mubr.bf16.mxu1 %v658_v46  ;;  %v9997_v46 = vld [vmem:[%s13731_s1 + $0x748] ss:$16 sps:$4 sm:$0xff]  }
  0xdb   : > { %4951 = vmatpush1.bf16.msra.mxu0 %v9940_v47  ;;  %6081 = vmatpush1.bf16.msra.mxu1 %v9943_v48  ;;  %v737_v47 = vpack.c.bf16 %v537_v42, %v517_v41  ;;  %v558_v48 = vld [vmem:[%s10993_s8 + $0x7a8] sm:$0xff]  ;;  %v420_v41 = vld [vmem:[%s10993_s8 + $0x358] sm:$0xff]  ;;  %v10050_v42 = vld [vmem:[%s13731_s1 + $0x864] ss:$16 sps:$4 sm:$0xff]  }
  0xdc   : > { %4952 = vmatprep.subr.bf16.mxu0 %v9948_v51  ;;  %6082 = vmatprep.subr.bf16.mxu1 %v9951_v52  ;;  %v10005_v51 = vld [vmem:[%s13731_s1 + $0x76c] ss:$16 sps:$4 sm:$0xff]   ;;  %v758_v52 = vpack.c.bf16 %v578_v49, %v558_v48  ;;  %v419_v48 = vld [vmem:[%s10993_s8 + $0x350] sm:$0xff] }
  0xdd   : > { %v10056_v49 = vld [vmem:[%s13731_s1 + $0x884] ss:$16 sps:$4 sm:$0xff]  }
  0xde   : > { %4878 = vmatmul.mubr.bf16.gmra.mrb[4].mxu0 %v657_v55  ;;  %6008 = vmatmul.mubr.bf16.gmra.mrb[4].mxu1 %v657_v55  ;;  %v557_v55 = vld [vmem:[%s10993_s8 + $0x7a0] sm:$0xff] }
  0xdf   : > { %4953 = vmatpush1.bf16.msra.mxu0 %v9946_v53  ;;  %6083 = vmatpush1.bf16.msra.mxu1 %v9949_v54  ;;  %v10000_v53 = vld [vmem:[%s13731_s1 + $0x760] ss:$16 sps:$4 sm:$0xff]   ;;  %v10003_v54 = vld [vmem:[%s13731_s1 + $0x768] ss:$16 sps:$4 sm:$0xff]  }
  0xe0   : > { %4954 = vmatprep.subr.bf16.mxu0 %v9954_v58  ;;  %6084 = vmatprep.subr.bf16.mxu1 %v9957_v59  ;;  %v10011_v58 = vld [vmem:[%s13731_s1 + $0x78c] ss:$16 sps:$4 sm:$0xff]   ;;  %v10006_v59 = vld [vmem:[%s13731_s1 + $0x780] ss:$16 sps:$4 sm:$0xff]  }
  0xe1   : > { %4887 = vmatprep.mubr.bf16.mxu0 %v678_v61  ;;  %6017 = vmatprep.mubr.bf16.mxu1 %v678_v61  ;;  %v757_v61 = vpack.c.bf16 %v577_v56, %v557_v55  ;;  %v460_v55 = vld [vmem:[%s10993_s8 + $0x498] sm:$0xff]  ;;  %v10062_v56 = vld [vmem:[%s13731_s1 + $0x8a4] ss:$16 sps:$4 sm:$0xff]  }
  0xe3   : > { %4955 = vmatpush1.bf16.msra.mxu0 %v9952_v60  ;;  %6085 = vmatpush1.bf16.msra.mxu1 %v9955_v62  ;;  %v10009_v60 = vld [vmem:[%s13731_s1 + $0x788] ss:$16 sps:$4 sm:$0xff]  }
  0xe4   : > { %4956 = vmatprep.subr.bf16.mxu0 %v9960_v1  ;;  %6086 = vmatprep.subr.bf16.mxu1 %v9963_v2  ;;  %v598_v62 = vld [vmem:[%s10993_s8 + $0x8e8] sm:$0xff]  ;;  %v10012_v2 = vld [vmem:[%s13731_s1 + $0x7a0] ss:$16 sps:$4 sm:$0xff]  }
  0xe5   : > { %v10017_v1 = vld [vmem:[%s13731_s1 + $0x7ac] ss:$16 sps:$4 sm:$0xff]  }
  0xe6   : > { %4888 = vmatmul.mubr.bf16.gmra.mrb[8].mxu0 %v677_v4  ;;  %6018 = vmatmul.mubr.bf16.gmra.mrb[8].mxu1 %v677_v4  ;;  %v10015_v4 = vld [vmem:[%s13731_s1 + $0x7a8] ss:$16 sps:$4 sm:$0xff]  }
  0xe7   : > { %4957 = vmatpush1.bf16.msra.mxu0 %v9958_v3  ;;  %6087 = vmatpush1.bf16.msra.mxu1 %v9961_v7  ;;  %v778_v3 = vpack.c.bf16 %v618_v63, %v598_v62  ;;  %v10020_v7 = vld [vmem:[%s13731_s1 + $0x7c4] ss:$16 sps:$4 sm:$0xff]  }
  0xe8   : > { %4958 = vmatprep.subr.bf16.mxu0 %v9966_v8  ;;  %6088 = vmatprep.subr.bf16.mxu1 %v9969_v9  ;;  %v10023_v8 = vld [vmem:[%s13731_s1 + $0x7cc] ss:$16 sps:$4 sm:$0xff]   ;;  %v10018_v9 = vld [vmem:[%s13731_s1 + $0x7c0] ss:$16 sps:$4 sm:$0xff]   ;;  %v10068_v63 = vld [vmem:[%s13731_s1 + $0x8c4] ss:$16 sps:$4 sm:$0xff]  }
  0xe9   : > { %4897 = vmatprep.mubr.bf16.mxu0 %v698_v12  ;;  %6027 = vmatprep.mubr.bf16.mxu1 %v698_v12  ;;  %v340_v12 = vld [vmem:[%s10993_s8 + $0xd8] sm:$0xff]  ;;  %v459_v62 = vld [vmem:[%s10993_s8 + $0x490] sm:$0xff] }
  0xeb   : > { %4959 = vmatpush1.bf16.msra.mxu0 %v9964_v10  ;;  %6089 = vmatpush1.bf16.msra.mxu1 %v9967_v11  ;;  %v777_v10 = vpack.c.bf16 %v617_v6, %v597_v5  ;;  %v320_v11 = vld [vmem:[%s10993_s8 + $0x38] sm:$0xff]  ;;  %v10074_v6 = vld [vmem:[%s13731_s1 + $0x8e4] ss:$16 sps:$4 sm:$0xff]  }
  0xec   : > { %4960 = vmatprep.subr.bf16.mxu0 %v9972_v15  ;;  %6090 = vmatprep.subr.bf16.mxu1 %v9975_v16  ;;  %v10029_v15 = vld [vmem:[%s13731_s1 + $0x7ec] ss:$16 sps:$4 sm:$0xff]   ;;  %v10024_v16 = vld [vmem:[%s13731_s1 + $0x7e0] ss:$16 sps:$4 sm:$0xff]   ;;  %v640_v18 = vpack.c.bf16 %v340_v12, %v320_v11 }
  0xed   : > { %v500_v5 = vld [vmem:[%s10993_s8 + $0x5d8] sm:$0xff]  ;;  %v479_v11 = vld [vmem:[%s10993_s8 + $0x530] sm:$0xff] }
  0xee   : > { %4898 = vmatmul.mubr.bf16.gmra.mrb[12].mxu0 %v697_v17  ;;  %6028 = vmatmul.mubr.bf16.gmra.mrb[12].mxu1 %v697_v17  ;;  %v10027_v17 = vld [vmem:[%s13731_s1 + $0x7e8] ss:$16 sps:$4 sm:$0xff]   ;;  %v499_v12 = vld [vmem:[%s10993_s8 + $0x5d0] sm:$0xff] }
  0xef   : > { %4961 = vmatpush1.bf16.msra.mxu0 %v9970_v20  ;;  %6091 = vmatpush1.bf16.msra.mxu1 %v9973_v21  ;;  %v339_v20 = vld [vmem:[%s10993_s8 + $0xd0] sm:$0xff] }
  0xf0   : > { %4962 = vmatprep.subr.bf16.mxu0 %v9978_v22  ;;  %6092 = vmatprep.subr.bf16.mxu1 %v9981_v23  ;;  %v10032_v21 = vld [vmem:[%s13731_s1 + $0x804] ss:$16 sps:$4 sm:$0xff]   ;;  %v10035_v22 = vld [vmem:[%s13731_s1 + $0x80c] ss:$16 sps:$4 sm:$0xff]   ;;  %v639_v23 = vpack.c.bf16 %v339_v20, %v319_v19  ;;  %v10081_v19 = vld [vmem:[%s13731_s1 + $0x908] ss:$16 sps:$4 sm:$0xff]  }
  0xf1   : > { %4907 = vmatprep.mubr.bf16.mxu0 %v718_v26  ;;  %6037 = vmatprep.mubr.bf16.mxu1 %v718_v26  ;;  %v10030_v26 = vld [vmem:[%s13731_s1 + $0x800] ss:$16 sps:$4 sm:$0xff]   ;;  %v10086_v20 = vld [vmem:[%s13731_s1 + $0x924] ss:$16 sps:$4 sm:$0xff]  }
  0xf3   : > { %4963 = vmatpush1.bf16.msra.mxu0 %v9976_v24  ;;  %6093 = vmatpush1.bf16.msra.mxu1 %v9979_v25  ;;  %v360_v24 = vld [vmem:[%s10993_s8 + $0x178] sm:$0xff] }
  0xf4   : > { %4964 = vmatprep.subr.bf16.mxu0 %v9984_v29  ;;  %6094 = vmatprep.subr.bf16.mxu1 %v9987_v30  ;;  %v380_v25 = vld [vmem:[%s10993_s8 + $0x218] sm:$0xff]  ;;  %v10036_v30 = vld [vmem:[%s13731_s1 + $0x820] ss:$16 sps:$4 sm:$0xff]  }
  0xf5   : > { %v10041_v29 = vld [vmem:[%s13731_s1 + $0x82c] ss:$16 sps:$4 sm:$0xff]  }
  0xf6   : > { %4908 = vmatmul.mubr.bf16.gmra.mrb[16].mxu0 %v717_v32  ;;  %6038 = vmatmul.mubr.bf16.gmra.mrb[16].mxu1 %v717_v32  ;;  %v660_v32 = vpack.c.bf16 %v380_v25, %v360_v24  ;;  %v519_v25 = vld [vmem:[%s10993_s8 + $0x670] sm:$0xff] }
  0xf7   : > { %4965 = vmatpush1.bf16.msra.mxu0 %v9982_v31  ;;  %6095 = vmatpush1.bf16.msra.mxu1 %v9985_v33  ;;  %v10039_v31 = vld [vmem:[%s13731_s1 + $0x828] ss:$16 sps:$4 sm:$0xff]   ;;  %v359_v33 = vld [vmem:[%s10993_s8 + $0x170] sm:$0xff] }
  0xf8   : > { %4966 = vmatprep.subr.bf16.mxu0 %v9990_v36  ;;  %6096 = vmatprep.subr.bf16.mxu1 %v9993_v37  ;;  %v10047_v36 = vld [vmem:[%s13731_s1 + $0x84c] ss:$16 sps:$4 sm:$0xff]   ;;  %v10042_v37 = vld [vmem:[%s13731_s1 + $0x840] ss:$16 sps:$4 sm:$0xff]  }
  0xf9   : > { %4917 = vmatprep.mubr.bf16.mxu0 %v738_v39  ;;  %6047 = vmatprep.mubr.bf16.mxu1 %v738_v39  ;;  %v10045_v39 = vld [vmem:[%s13731_s1 + $0x848] ss:$16 sps:$4 sm:$0xff]  }
  0xfb   : > { %4967 = vmatpush1.bf16.msra.mxu0 %v9988_v38  ;;  %6097 = vmatpush1.bf16.msra.mxu1 %v9991_v40  ;;  %v659_v38 = vpack.c.bf16 %v379_v34, %v359_v33  ;;  %v400_v40 = vld [vmem:[%s10993_s8 + $0x2b8] sm:$0xff]  ;;  %v10098_v34 = vld [vmem:[%s13731_s1 + $0x964] ss:$16 sps:$4 sm:$0xff]  }
  0xfc   : > { %4968 = vmatprep.subr.bf16.mxu0 %v9996_v43  ;;  %6098 = vmatprep.subr.bf16.mxu1 %v9999_v44  ;;  %v10053_v43 = vld [vmem:[%s13731_s1 + $0x86c] ss:$16 sps:$4 sm:$0xff]   ;;  %v10048_v44 = vld [vmem:[%s13731_s1 + $0x860] ss:$16 sps:$4 sm:$0xff]   ;;  %v10093_v33 = vld [vmem:[%s13731_s1 + $0x948] ss:$16 sps:$4 sm:$0xff]  }
  0xfe   : > { %4918 = vmatmul.mubr.bf16.gmra.mrb[20].mxu0 %v737_v47  ;;  %6048 = vmatmul.mubr.bf16.gmra.mrb[20].mxu1 %v737_v47  ;;  %v399_v47 = vld [vmem:[%s10993_s8 + $0x2b0] sm:$0xff] }
  0xff   : > { %4969 = vmatpush1.bf16.msra.mxu0 %v9994_v45  ;;  %6099 = vmatpush1.bf16.msra.mxu1 %v9997_v46  ;;  %v680_v45 = vpack.c.bf16 %v420_v41, %v400_v40  ;;  %v10051_v46 = vld [vmem:[%s13731_s1 + $0x868] ss:$16 sps:$4 sm:$0xff]   ;;  %v579_v40 = vld [vmem:[%s10993_s8 + $0x850] sm:$0xff] }
 0x100   : > { %4970 = vmatprep.subr.bf16.mxu0 %v10002_v50  ;;  %6100 = vmatprep.subr.bf16.mxu1 %v10005_v51  ;;  %v10059_v50 = vld [vmem:[%s13731_s1 + $0x88c] ss:$16 sps:$4 sm:$0xff]   ;;  %v10054_v51 = vld [vmem:[%s13731_s1 + $0x880] ss:$16 sps:$4 sm:$0xff]   ;;  %v10104_v41 = vld [vmem:[%s13731_s1 + $0x984] ss:$16 sps:$4 sm:$0xff]  }
 0x101   : > { %4927 = vmatprep.mubr.bf16.mxu0 %v758_v52  ;;  %6057 = vmatprep.mubr.bf16.mxu1 %v758_v52  ;;  %v10057_v52 = vld [vmem:[%s13731_s1 + $0x888] ss:$16 sps:$4 sm:$0xff]  }
 0x103   : > { %4971 = vmatpush1.bf16.msra.mxu0 %v10000_v53  ;;  %6101 = vmatpush1.bf16.msra.mxu1 %v10003_v54  ;;  %v679_v53 = vpack.c.bf16 %v419_v48, %v399_v47  ;;  %v440_v54 = vld [vmem:[%s10993_s8 + $0x3f8] sm:$0xff]  ;;  %v10110_v48 = vld [vmem:[%s13731_s1 + $0x9a4] ss:$16 sps:$4 sm:$0xff]  }
 0x104   : > { %4972 = vmatprep.subr.bf16.mxu0 %v10008_v57  ;;  %6102 = vmatprep.subr.bf16.mxu1 %v10011_v58  ;;  %v10065_v57 = vld [vmem:[%s13731_s1 + $0x8ac] ss:$16 sps:$4 sm:$0xff]   ;;  %v700_v58 = vpack.c.bf16 %v460_v55, %v440_v54  ;;  %v619_v54 = vld [vmem:[%s10993_s8 + $0x990] sm:$0xff] }
 0x105   : > { %v620_v47 = vld [vmem:[%s10993_s8 + $0x998] sm:$0xff]  ;;  %v10116_v55 = vld [vmem:[%s13731_s1 + $0x9c4] ss:$16 sps:$4 sm:$0xff]  }
 0x106   : > { %4928 = vmatmul.mubr.bf16.gmra.mrb[24].mxu0 %v757_v61  ;;  %6058 = vmatmul.mubr.bf16.gmra.mrb[24].mxu1 %v757_v61  ;;  %v439_v61 = vld [vmem:[%s10993_s8 + $0x3f0] sm:$0xff] }
 0x107   : > { %4973 = vmatpush1.bf16.msra.mxu0 %v10006_v59  ;;  %6103 = vmatpush1.bf16.msra.mxu1 %v10009_v60  ;;  %v10060_v59 = vld [vmem:[%s13731_s1 + $0x8a0] ss:$16 sps:$4 sm:$0xff]   ;;  %v10063_v60 = vld [vmem:[%s13731_s1 + $0x8a8] ss:$16 sps:$4 sm:$0xff]  }
 0x108   : > { %4974 = vmatprep.subr.bf16.mxu0 %v10014_v0  ;;  %6104 = vmatprep.subr.bf16.mxu1 %v10017_v1  ;;  %v10071_v0 = vld [vmem:[%s13731_s1 + $0x8cc] ss:$16 sps:$4 sm:$0xff]   ;;  %v10066_v1 = vld [vmem:[%s13731_s1 + $0x8c0] ss:$16 sps:$4 sm:$0xff]  }
 0x109   : > { %4937 = vmatprep.mubr.bf16.mxu0 %v778_v3  ;;  %6067 = vmatprep.mubr.bf16.mxu1 %v778_v3  ;;  %v699_v3 = vpack.c.bf16 %v459_v62, %v439_v61  ;;  %v342_v61 = vld [vmem:[%s10993_s8 + $0xe8] sm:$0xff]  ;;  %v10122_v62 = vld [vmem:[%s13731_s1 + $0x9e4] ss:$16 sps:$4 sm:$0xff]  }
 0x10b   : > { %4975 = vmatpush1.bf16.msra.mxu0 %v10012_v2  ;;  %6105 = vmatpush1.bf16.msra.mxu1 %v10015_v4  ;;  %v10069_v2 = vld [vmem:[%s13731_s1 + $0x8c8] ss:$16 sps:$4 sm:$0xff]  }
 0x10c   : > { %4976 = vmatprep.subr.bf16.mxu0 %v10020_v7  ;;  %6106 = vmatprep.subr.bf16.mxu1 %v10023_v8  ;;  %v480_v4 = vld [vmem:[%s10993_s8 + $0x538] sm:$0xff]  ;;  %v10072_v8 = vld [vmem:[%s13731_s1 + $0x8e0] ss:$16 sps:$4 sm:$0xff]  }
 0x10d   : > { %v10077_v7 = vld [vmem:[%s13731_s1 + $0x8ec] ss:$16 sps:$4 sm:$0xff]  }
 0x10e   : > { %4938 = vmatmul.mubr.bf16.gmra.mrb[28].mxu0 %v777_v10  ;;  %6068 = vmatmul.mubr.bf16.gmra.mrb[28].mxu1 %v777_v10  ;;  %v10075_v10 = vld [vmem:[%s13731_s1 + $0x8e8] ss:$16 sps:$4 sm:$0xff]  }
 0x10f   : > { %4977 = vmatpush1.bf16.msra.mxu0 %v10018_v9  ;;  %6107 = vmatpush1.bf16.msra.mxu1 %v10021_v13  ;;  %v720_v9 = vpack.c.bf16 %v500_v5, %v480_v4  ;;  %v10080_v13 = vld [vmem:[%s13731_s1 + $0x904] ss:$16 sps:$4 sm:$0xff]  }
 0x110   : > { %4978 = vmatprep.subr.bf16.mxu0 %v10026_v14  ;;  %6108 = vmatprep.subr.bf16.mxu1 %v10029_v15  ;;  %v10083_v14 = vld [vmem:[%s13731_s1 + $0x90c] ss:$16 sps:$4 sm:$0xff]   ;;  %v10078_v15 = vld [vmem:[%s13731_s1 + $0x900] ss:$16 sps:$4 sm:$0xff]   ;;  %v10128_v5 = vld [vmem:[%s13731_s1 + $0xa04] ss:$16 sps:$4 sm:$0xff]  }
 0x111   : > { %4980 = vmatprep.mubr.bf16.mxu0 %v640_v18  ;;  %6110 = vmatprep.mubr.bf16.mxu1 %v640_v18  ;;  %v540_v18 = vld [vmem:[%s10993_s8 + $0x718] sm:$0xff]  ;;  %v341_v4 = vld [vmem:[%s10993_s8 + $0xe0] sm:$0xff] }
 0x113   : > { %4979 = vmatpush1.bf16.msra.mxu0 %v10024_v16  ;;  %6109 = vmatpush1.bf16.msra.mxu1 %v10027_v17  ;;  %v719_v16 = vpack.c.bf16 %v499_v12, %v479_v11  ;;  %v520_v17 = vld [vmem:[%s10993_s8 + $0x678] sm:$0xff]  ;;  %v382_v11 = vld [vmem:[%s10993_s8 + $0x228] sm:$0xff]  ;;  %v10134_v12 = vld [vmem:[%s13731_s1 + $0xa24] ss:$16 sps:$4 sm:$0xff]  }
 0x114   : > { %5061 = vmatprep.subr.bf16.mxu0 %v10032_v21  ;;  %6191 = vmatprep.subr.bf16.mxu1 %v10035_v22  ;;  %v10089_v21 = vld [vmem:[%s13731_s1 + $0x92c] ss:$16 sps:$4 sm:$0xff]   ;;  %v10084_v22 = vld [vmem:[%s13731_s1 + $0x920] ss:$16 sps:$4 sm:$0xff]   ;;  %v740_v24 = vpack.c.bf16 %v540_v18, %v520_v17 }
 0x115   : > { %v361_v17 = vld [vmem:[%s10993_s8 + $0x180] sm:$0xff] }
 0x116   : > { %4981 = vmatmul.mubr.bf16.vlgmr.msra.gmra.mrb[0].mxu0 %v639_v23  ;;  %6111 = vmatmul.mubr.bf16.vlgmr.msra.gmra.mrb[0].mxu1 %v639_v23  ;;  %v10087_v23 = vld [vmem:[%s13731_s1 + $0x928] ss:$16 sps:$4 sm:$0xff]   ;;  %v381_v18 = vld [vmem:[%s10993_s8 + $0x220] sm:$0xff] }
 0x117   : > { %5062 = vmatpush1.bf16.msra.mxu0 %v10030_v26  ;;  %6192 = vmatpush1.bf16.msra.mxu1 %v10033_v27  ;;  %v539_v26 = vld [vmem:[%s10993_s8 + $0x710] sm:$0xff] }
 0x118   : > { %5063 = vmatprep.subr.bf16.mxu0 %v10038_v28  ;;  %6193 = vmatprep.subr.bf16.mxu1 %v10041_v29  ;;  %v10092_v27 = vld [vmem:[%s13731_s1 + $0x944] ss:$16 sps:$4 sm:$0xff]   ;;  %v10095_v28 = vld [vmem:[%s13731_s1 + $0x94c] ss:$16 sps:$4 sm:$0xff]   ;;  %v739_v29 = vpack.c.bf16 %v539_v26, %v519_v25  ;;  %v10141_v25 = vld [vmem:[%s13731_s1 + $0xa48] ss:$16 sps:$4 sm:$0xff]  }
 0x119   : > { %4990 = vmatprep.mubr.bf16.mxu0 %v660_v32  ;;  %6120 = vmatprep.mubr.bf16.mxu1 %v660_v32  ;;  %v10090_v32 = vld [vmem:[%s13731_s1 + $0x940] ss:$16 sps:$4 sm:$0xff]   ;;  %v10146_v26 = vld [vmem:[%s13731_s1 + $0xa64] ss:$16 sps:$4 sm:$0xff]  }
 0x11b   : > { %5064 = vmatpush1.bf16.msra.mxu0 %v10036_v30  ;;  %6194 = vmatpush1.bf16.msra.mxu1 %v10039_v31  ;;  %v560_v30 = vld [vmem:[%s10993_s8 + $0x7b8] sm:$0xff] }
 0x11c   : > { %5065 = vmatprep.subr.bf16.mxu0 %v10044_v35  ;;  %6195 = vmatprep.subr.bf16.mxu1 %v10047_v36  ;;  %v580_v31 = vld [vmem:[%s10993_s8 + $0x858] sm:$0xff]  ;;  %v10096_v36 = vld [vmem:[%s13731_s1 + $0x960] ss:$16 sps:$4 sm:$0xff]  }
 0x11d   : > { %v10101_v35 = vld [vmem:[%s13731_s1 + $0x96c] ss:$16 sps:$4 sm:$0xff]  }
 0x11e   : > { %4991 = vmatmul.mubr.bf16.gmra.mrb[4].mxu0 %v659_v38  ;;  %6121 = vmatmul.mubr.bf16.gmra.mrb[4].mxu1 %v659_v38  ;;  %v760_v38 = vpack.c.bf16 %v580_v31, %v560_v30  ;;  %v401_v31 = vld [vmem:[%s10993_s8 + $0x2c0] sm:$0xff] }
 0x11f   : > { %5066 = vmatpush1.bf16.msra.mxu0 %v10042_v37  ;;  %6196 = vmatpush1.bf16.msra.mxu1 %v10045_v39  ;;  %v10099_v37 = vld [vmem:[%s13731_s1 + $0x968] ss:$16 sps:$4 sm:$0xff]   ;;  %v559_v39 = vld [vmem:[%s10993_s8 + $0x7b0] sm:$0xff] }
 0x120   : > { %5067 = vmatprep.subr.bf16.mxu0 %v10050_v42  ;;  %6197 = vmatprep.subr.bf16.mxu1 %v10053_v43  ;;  %v10107_v42 = vld [vmem:[%s13731_s1 + $0x98c] ss:$16 sps:$4 sm:$0xff]   ;;  %v10102_v43 = vld [vmem:[%s13731_s1 + $0x980] ss:$16 sps:$4 sm:$0xff]  }
 0x121   : > { %5000 = vmatprep.mubr.bf16.mxu0 %v680_v45  ;;  %6130 = vmatprep.mubr.bf16.mxu1 %v680_v45  ;;  %v10105_v45 = vld [vmem:[%s13731_s1 + $0x988] ss:$16 sps:$4 sm:$0xff]  }
 0x123   : > { %5068 = vmatpush1.bf16.msra.mxu0 %v10048_v44  ;;  %6198 = vmatpush1.bf16.msra.mxu1 %v10051_v46  ;;  %v759_v44 = vpack.c.bf16 %v579_v40, %v559_v39  ;;  %v600_v46 = vld [vmem:[%s10993_s8 + $0x8f8] sm:$0xff]  ;;  %v10158_v40 = vld [vmem:[%s13731_s1 + $0xaa4] ss:$16 sps:$4 sm:$0xff]  }
 0x124   : > { %5069 = vmatprep.subr.bf16.mxu0 %v10056_v49  ;;  %6199 = vmatprep.subr.bf16.mxu1 %v10059_v50  ;;  %v10113_v49 = vld [vmem:[%s13731_s1 + $0x9ac] ss:$16 sps:$4 sm:$0xff]   ;;  %v10108_v50 = vld [vmem:[%s13731_s1 + $0x9a0] ss:$16 sps:$4 sm:$0xff]   ;;  %v10153_v39 = vld [vmem:[%s13731_s1 + $0xa88] ss:$16 sps:$4 sm:$0xff]  }
 0x126   : > { %5001 = vmatmul.mubr.bf16.gmra.mrb[8].mxu0 %v679_v53  ;;  %6131 = vmatmul.mubr.bf16.gmra.mrb[8].mxu1 %v679_v53  ;;  %v599_v53 = vld [vmem:[%s10993_s8 + $0x8f0] sm:$0xff] }
 0x127   : > { %5070 = vmatpush1.bf16.msra.mxu0 %v10054_v51  ;;  %6200 = vmatpush1.bf16.msra.mxu1 %v10057_v52  ;;  %v780_v51 = vpack.c.bf16 %v620_v47, %v600_v46  ;;  %v10111_v52 = vld [vmem:[%s13731_s1 + $0x9a8] ss:$16 sps:$4 sm:$0xff]   ;;  %v461_v46 = vld [vmem:[%s10993_s8 + $0x4a0] sm:$0xff] }
 0x128   : > { %5071 = vmatprep.subr.bf16.mxu0 %v10062_v56  ;;  %6201 = vmatprep.subr.bf16.mxu1 %v10065_v57  ;;  %v10119_v56 = vld [vmem:[%s13731_s1 + $0x9cc] ss:$16 sps:$4 sm:$0xff]   ;;  %v10114_v57 = vld [vmem:[%s13731_s1 + $0x9c0] ss:$16 sps:$4 sm:$0xff]   ;;  %v10164_v47 = vld [vmem:[%s13731_s1 + $0xac4] ss:$16 sps:$4 sm:$0xff]  }
 0x129   : > { %5010 = vmatprep.mubr.bf16.mxu0 %v700_v58  ;;  %6140 = vmatprep.mubr.bf16.mxu1 %v700_v58  ;;  %v10117_v58 = vld [vmem:[%s13731_s1 + $0x9c8] ss:$16 sps:$4 sm:$0xff]  }
 0x12b   : > { %5072 = vmatpush1.bf16.msra.mxu0 %v10060_v59  ;;  %6202 = vmatpush1.bf16.msra.mxu1 %v10063_v60  ;;  %v779_v59 = vpack.c.bf16 %v619_v54, %v599_v53  ;;  %v322_v60 = vld [vmem:[%s10993_s8 + $0x48] sm:$0xff]  ;;  %v10170_v54 = vld [vmem:[%s13731_s1 + $0xae4] ss:$16 sps:$4 sm:$0xff]  }
 0x12c   : > { %5073 = vmatprep.subr.bf16.mxu0 %v10068_v63  ;;  %6203 = vmatprep.subr.bf16.mxu1 %v10071_v0  ;;  %v10125_v63 = vld [vmem:[%s13731_s1 + $0x9ec] ss:$16 sps:$4 sm:$0xff]   ;;  %v642_v0 = vpack.c.bf16 %v342_v61, %v322_v60  ;;  %v501_v60 = vld [vmem:[%s10993_s8 + $0x5e0] sm:$0xff] }
 0x12d   : > { %v502_v53 = vld [vmem:[%s10993_s8 + $0x5e8] sm:$0xff]  ;;  %v10176_v61 = vld [vmem:[%s13731_s1 + $0xb04] ss:$16 sps:$4 sm:$0xff]  }
 0x12e   : > { %5011 = vmatmul.mubr.bf16.gmra.mrb[12].mxu0 %v699_v3  ;;  %6141 = vmatmul.mubr.bf16.gmra.mrb[12].mxu1 %v699_v3  ;;  %v321_v3 = vld [vmem:[%s10993_s8 + $0x40] sm:$0xff] }
 0x12f   : > { %5074 = vmatpush1.bf16.msra.mxu0 %v10066_v1  ;;  %6204 = vmatpush1.bf16.msra.mxu1 %v10069_v2  ;;  %v10120_v1 = vld [vmem:[%s13731_s1 + $0x9e0] ss:$16 sps:$4 sm:$0xff]   ;;  %v10123_v2 = vld [vmem:[%s13731_s1 + $0x9e8] ss:$16 sps:$4 sm:$0xff]  }
 0x130   : > { %5075 = vmatprep.subr.bf16.mxu0 %v10074_v6  ;;  %6205 = vmatprep.subr.bf16.mxu1 %v10077_v7  ;;  %v10131_v6 = vld [vmem:[%s13731_s1 + $0xa0c] ss:$16 sps:$4 sm:$0xff]   ;;  %v10126_v7 = vld [vmem:[%s13731_s1 + $0xa00] ss:$16 sps:$4 sm:$0xff]  }
 0x131   : > { %5020 = vmatprep.mubr.bf16.mxu0 %v720_v9  ;;  %6150 = vmatprep.mubr.bf16.mxu1 %v720_v9  ;;  %v641_v9 = vpack.c.bf16 %v341_v4, %v321_v3  ;;  %v542_v3 = vld [vmem:[%s10993_s8 + $0x728] sm:$0xff]  ;;  %v10182_v4 = vld [vmem:[%s13731_s1 + $0xb24] ss:$16 sps:$4 sm:$0xff]  }
 0x133   : > { %5076 = vmatpush1.bf16.msra.mxu0 %v10072_v8  ;;  %6206 = vmatpush1.bf16.msra.mxu1 %v10075_v10  ;;  %v10129_v8 = vld [vmem:[%s13731_s1 + $0xa08] ss:$16 sps:$4 sm:$0xff]  }
 0x134   : > { %5077 = vmatprep.subr.bf16.mxu0 %v10080_v13  ;;  %6207 = vmatprep.subr.bf16.mxu1 %v10083_v14  ;;  %v362_v10 = vld [vmem:[%s10993_s8 + $0x188] sm:$0xff]  ;;  %v10132_v14 = vld [vmem:[%s13731_s1 + $0xa20] ss:$16 sps:$4 sm:$0xff]  }
 0x135   : > { %v10137_v13 = vld [vmem:[%s13731_s1 + $0xa2c] ss:$16 sps:$4 sm:$0xff]  }
 0x136   : > { %5021 = vmatmul.mubr.bf16.gmra.mrb[16].mxu0 %v719_v16  ;;  %6151 = vmatmul.mubr.bf16.gmra.mrb[16].mxu1 %v719_v16  ;;  %v10135_v16 = vld [vmem:[%s13731_s1 + $0xa28] ss:$16 sps:$4 sm:$0xff]  }
 0x137   : > { %5078 = vmatpush1.bf16.msra.mxu0 %v10078_v15  ;;  %6208 = vmatpush1.bf16.msra.mxu1 %v10081_v19  ;;  %v662_v15 = vpack.c.bf16 %v382_v11, %v362_v10  ;;  %v10140_v19 = vld [vmem:[%s13731_s1 + $0xa44] ss:$16 sps:$4 sm:$0xff]  }
 0x138   : > { %5079 = vmatprep.subr.bf16.mxu0 %v10086_v20  ;;  %6209 = vmatprep.subr.bf16.mxu1 %v10089_v21  ;;  %v10143_v20 = vld [vmem:[%s13731_s1 + $0xa4c] ss:$16 sps:$4 sm:$0xff]   ;;  %v10138_v21 = vld [vmem:[%s13731_s1 + $0xa40] ss:$16 sps:$4 sm:$0xff]   ;;  %v10188_v11 = vld [vmem:[%s13731_s1 + $0xb44] ss:$16 sps:$4 sm:$0xff]  }
 0x139   : > { %5030 = vmatprep.mubr.bf16.mxu0 %v740_v24  ;;  %6160 = vmatprep.mubr.bf16.mxu1 %v740_v24  ;;  %v422_v24 = vld [vmem:[%s10993_s8 + $0x368] sm:$0xff]  ;;  %v541_v10 = vld [vmem:[%s10993_s8 + $0x720] sm:$0xff] }
 0x13b   : > { %5080 = vmatpush1.bf16.msra.mxu0 %v10084_v22  ;;  %6210 = vmatpush1.bf16.msra.mxu1 %v10087_v23  ;;  %v661_v22 = vpack.c.bf16 %v381_v18, %v361_v17  ;;  %v402_v23 = vld [vmem:[%s10993_s8 + $0x2c8] sm:$0xff]  ;;  %v10194_v18 = vld [vmem:[%s13731_s1 + $0xb64] ss:$16 sps:$4 sm:$0xff]  }
 0x13c   : > { %5081 = vmatprep.subr.bf16.mxu0 %v10092_v27  ;;  %6211 = vmatprep.subr.bf16.mxu1 %v10095_v28  ;;  %v10149_v27 = vld [vmem:[%s13731_s1 + $0xa6c] ss:$16 sps:$4 sm:$0xff]   ;;  %v10144_v28 = vld [vmem:[%s13731_s1 + $0xa60] ss:$16 sps:$4 sm:$0xff]   ;;  %v682_v30 = vpack.c.bf16 %v422_v24, %v402_v23 }
 0x13d   : > { %v582_v17 = vld [vmem:[%s10993_s8 + $0x868] sm:$0xff]  ;;  %v561_v23 = vld [vmem:[%s10993_s8 + $0x7c0] sm:$0xff] }
 0x13e   : > { %5031 = vmatmul.mubr.bf16.gmra.mrb[20].mxu0 %v739_v29  ;;  %6161 = vmatmul.mubr.bf16.gmra.mrb[20].mxu1 %v739_v29  ;;  %v10147_v29 = vld [vmem:[%s13731_s1 + $0xa68] ss:$16 sps:$4 sm:$0xff]   ;;  %v581_v24 = vld [vmem:[%s10993_s8 + $0x860] sm:$0xff] }
 0x13f   : > { %5082 = vmatpush1.bf16.msra.mxu0 %v10090_v32  ;;  %6212 = vmatpush1.bf16.msra.mxu1 %v10093_v33  ;;  %v421_v32 = vld [vmem:[%s10993_s8 + $0x360] sm:$0xff] }
 0x140   : > { %5083 = vmatprep.subr.bf16.mxu0 %v10098_v34  ;;  %6213 = vmatprep.subr.bf16.mxu1 %v10101_v35  ;;  %v10152_v33 = vld [vmem:[%s13731_s1 + $0xa84] ss:$16 sps:$4 sm:$0xff]   ;;  %v10155_v34 = vld [vmem:[%s13731_s1 + $0xa8c] ss:$16 sps:$4 sm:$0xff]   ;;  %v681_v35 = vpack.c.bf16 %v421_v32, %v401_v31  ;;  %v10201_v31 = vld [vmem:[%s13731_s1 + $0xb88] ss:$16 sps:$4 sm:$0xff]  }
 0x141   : > { %5040 = vmatprep.mubr.bf16.mxu0 %v760_v38  ;;  %6170 = vmatprep.mubr.bf16.mxu1 %v760_v38  ;;  %v10150_v38 = vld [vmem:[%s13731_s1 + $0xa80] ss:$16 sps:$4 sm:$0xff]   ;;  %v10206_v32 = vld [vmem:[%s13731_s1 + $0xba4] ss:$16 sps:$4 sm:$0xff]  }
 0x143   : > { %5084 = vmatpush1.bf16.msra.mxu0 %v10096_v36  ;;  %6214 = vmatpush1.bf16.msra.mxu1 %v10099_v37  ;;  %v442_v36 = vld [vmem:[%s10993_s8 + $0x408] sm:$0xff] }
 0x144   : > { %5085 = vmatprep.subr.bf16.mxu0 %v10104_v41  ;;  %6215 = vmatprep.subr.bf16.mxu1 %v10107_v42  ;;  %v462_v37 = vld [vmem:[%s10993_s8 + $0x4a8] sm:$0xff]  ;;  %v10156_v42 = vld [vmem:[%s13731_s1 + $0xaa0] ss:$16 sps:$4 sm:$0xff]  }
 0x145   : > { %v10161_v41 = vld [vmem:[%s13731_s1 + $0xaac] ss:$16 sps:$4 sm:$0xff]  }
 0x146   : > { %5041 = vmatmul.mubr.bf16.gmra.mrb[24].mxu0 %v759_v44  ;;  %6171 = vmatmul.mubr.bf16.gmra.mrb[24].mxu1 %v759_v44  ;;  %v702_v44 = vpack.c.bf16 %v462_v37, %v442_v36  ;;  %v601_v37 = vld [vmem:[%s10993_s8 + $0x900] sm:$0xff] }
 0x147   : > { %5086 = vmatpush1.bf16.msra.mxu0 %v10102_v43  ;;  %6216 = vmatpush1.bf16.msra.mxu1 %v10105_v45  ;;  %v10159_v43 = vld [vmem:[%s13731_s1 + $0xaa8] ss:$16 sps:$4 sm:$0xff]   ;;  %v441_v45 = vld [vmem:[%s10993_s8 + $0x400] sm:$0xff] }
 0x148   : > { %5087 = vmatprep.subr.bf16.mxu0 %v10110_v48  ;;  %6217 = vmatprep.subr.bf16.mxu1 %v10113_v49  ;;  %v10167_v48 = vld [vmem:[%s13731_s1 + $0xacc] ss:$16 sps:$4 sm:$0xff]   ;;  %v10162_v49 = vld [vmem:[%s13731_s1 + $0xac0] ss:$16 sps:$4 sm:$0xff]  }
 0x149   : > { %5050 = vmatprep.mubr.bf16.mxu0 %v780_v51  ;;  %6180 = vmatprep.mubr.bf16.mxu1 %v780_v51  ;;  %v10165_v51 = vld [vmem:[%s13731_s1 + $0xac8] ss:$16 sps:$4 sm:$0xff]  }
 0x14b   : > { %5088 = vmatpush1.bf16.msra.mxu0 %v10108_v50  ;;  %6218 = vmatpush1.bf16.msra.mxu1 %v10111_v52  ;;  %v701_v50 = vpack.c.bf16 %v461_v46, %v441_v45  ;;  %v482_v52 = vld [vmem:[%s10993_s8 + $0x548] sm:$0xff]  ;;  %v10218_v46 = vld [vmem:[%s13731_s1 + $0xbe4] ss:$16 sps:$4 sm:$0xff]  }
 0x14c   : > { %5089 = vmatprep.subr.bf16.mxu0 %v10116_v55  ;;  %6219 = vmatprep.subr.bf16.mxu1 %v10119_v56  ;;  %v10173_v55 = vld [vmem:[%s13731_s1 + $0xaec] ss:$16 sps:$4 sm:$0xff]   ;;  %v10168_v56 = vld [vmem:[%s13731_s1 + $0xae0] ss:$16 sps:$4 sm:$0xff]   ;;  %v10213_v45 = vld [vmem:[%s13731_s1 + $0xbc8] ss:$16 sps:$4 sm:$0xff]  }
 0x14e   : > { %5051 = vmatmul.mubr.bf16.gmra.mrb[28].mxu0 %v779_v59  ;;  %6181 = vmatmul.mubr.bf16.gmra.mrb[28].mxu1 %v779_v59  ;;  %v481_v59 = vld [vmem:[%s10993_s8 + $0x540] sm:$0xff] }
 0x14f   : > { %5090 = vmatpush1.bf16.msra.mxu0 %v10114_v57  ;;  %6220 = vmatpush1.bf16.msra.mxu1 %v10117_v58  ;;  %v722_v57 = vpack.c.bf16 %v502_v53, %v482_v52  ;;  %v10171_v58 = vld [vmem:[%s13731_s1 + $0xae8] ss:$16 sps:$4 sm:$0xff]   ;;  %v343_v52 = vld [vmem:[%s10993_s8 + $0xf0] sm:$0xff] }
 0x150   : > { %5091 = vmatprep.subr.bf16.mxu0 %v10122_v62  ;;  %6221 = vmatprep.subr.bf16.mxu1 %v10125_v63  ;;  %v10179_v62 = vld [vmem:[%s13731_s1 + $0xb0c] ss:$16 sps:$4 sm:$0xff]   ;;  %v10174_v63 = vld [vmem:[%s13731_s1 + $0xb00] ss:$16 sps:$4 sm:$0xff]   ;;  %v10224_v53 = vld [vmem:[%s13731_s1 + $0xc04] ss:$16 sps:$4 sm:$0xff]  }
 0x151   : > { %5093 = vmatprep.mubr.bf16.mxu0 %v642_v0  ;;  %6223 = vmatprep.mubr.bf16.mxu1 %v642_v0  ;;  %v10177_v0 = vld [vmem:[%s13731_s1 + $0xb08] ss:$16 sps:$4 sm:$0xff]  }
 0x153   : > { %5092 = vmatpush1.bf16.msra.mxu0 %v10120_v1  ;;  %6222 = vmatpush1.bf16.msra.mxu1 %v10123_v2  ;;  %v721_v1 = vpack.c.bf16 %v501_v60, %v481_v59  ;;  %v522_v2 = vld [vmem:[%s10993_s8 + $0x688] sm:$0xff]  ;;  %v384_v59 = vld [vmem:[%s10993_s8 + $0x238] sm:$0xff]  ;;  %v10230_v60 = vld [vmem:[%s13731_s1 + $0xc24] ss:$16 sps:$4 sm:$0xff]  }
 0x154   : > { %5174 = vmatprep.subr.bf16.mxu0 %v10128_v5  ;;  %6304 = vmatprep.subr.bf16.mxu1 %v10131_v6  ;;  %v10185_v5 = vld [vmem:[%s13731_s1 + $0xb2c] ss:$16 sps:$4 sm:$0xff]   ;;  %v742_v6 = vpack.c.bf16 %v542_v3, %v522_v2  ;;  %v383_v2 = vld [vmem:[%s10993_s8 + $0x230] sm:$0xff] }
 0x155   : > { %v10236_v3 = vld [vmem:[%s13731_s1 + $0xc44] ss:$16 sps:$4 sm:$0xff]  }
 0x156   : > { %5094 = vmatmul.mubr.bf16.vlgmr.msra.gmra.mrb[0].mxu0 %v641_v9  ;;  %6224 = vmatmul.mubr.bf16.vlgmr.msra.gmra.mrb[0].mxu1 %v641_v9  ;;  %v521_v9 = vld [vmem:[%s10993_s8 + $0x680] sm:$0xff] }
 0x157   : > { %5175 = vmatpush1.bf16.msra.mxu0 %v10126_v7  ;;  %6305 = vmatpush1.bf16.msra.mxu1 %v10129_v8  ;;  %v10180_v7 = vld [vmem:[%s13731_s1 + $0xb20] ss:$16 sps:$4 sm:$0xff]   ;;  %v10183_v8 = vld [vmem:[%s13731_s1 + $0xb28] ss:$16 sps:$4 sm:$0xff]  }
 0x158   : > { %5176 = vmatprep.subr.bf16.mxu0 %v10134_v12  ;;  %6306 = vmatprep.subr.bf16.mxu1 %v10137_v13  ;;  %v10191_v12 = vld [vmem:[%s13731_s1 + $0xb4c] ss:$16 sps:$4 sm:$0xff]   ;;  %v10186_v13 = vld [vmem:[%s13731_s1 + $0xb40] ss:$16 sps:$4 sm:$0xff]  }
 0x159   : > { %5103 = vmatprep.mubr.bf16.mxu0 %v662_v15  ;;  %6233 = vmatprep.mubr.bf16.mxu1 %v662_v15  ;;  %v741_v15 = vpack.c.bf16 %v541_v10, %v521_v9  ;;  %v424_v9 = vld [vmem:[%s10993_s8 + $0x378] sm:$0xff]  ;;  %v10242_v10 = vld [vmem:[%s13731_s1 + $0xc64] ss:$16 sps:$4 sm:$0xff]  }
 0x15b   : > { %5177 = vmatpush1.bf16.msra.mxu0 %v10132_v14  ;;  %6307 = vmatpush1.bf16.msra.mxu1 %v10135_v16  ;;  %v10189_v14 = vld [vmem:[%s13731_s1 + $0xb48] ss:$16 sps:$4 sm:$0xff]  }
 0x15c   : > { %5178 = vmatprep.subr.bf16.mxu0 %v10140_v19  ;;  %6308 = vmatprep.subr.bf16.mxu1 %v10143_v20  ;;  %v562_v16 = vld [vmem:[%s10993_s8 + $0x7c8] sm:$0xff]  ;;  %v10192_v20 = vld [vmem:[%s13731_s1 + $0xb60] ss:$16 sps:$4 sm:$0xff]  }
 0x15d   : > { %v10197_v19 = vld [vmem:[%s13731_s1 + $0xb6c] ss:$16 sps:$4 sm:$0xff]  }
 0x15e   : > { %5104 = vmatmul.mubr.bf16.gmra.mrb[4].mxu0 %v661_v22  ;;  %6234 = vmatmul.mubr.bf16.gmra.mrb[4].mxu1 %v661_v22  ;;  %v10195_v22 = vld [vmem:[%s13731_s1 + $0xb68] ss:$16 sps:$4 sm:$0xff]  }
 0x15f   : > { %5179 = vmatpush1.bf16.msra.mxu0 %v10138_v21  ;;  %6309 = vmatpush1.bf16.msra.mxu1 %v10141_v25  ;;  %v762_v21 = vpack.c.bf16 %v582_v17, %v562_v16  ;;  %v10200_v25 = vld [vmem:[%s13731_s1 + $0xb84] ss:$16 sps:$4 sm:$0xff]  }
 0x160   : > { %5180 = vmatprep.subr.bf16.mxu0 %v10146_v26  ;;  %6310 = vmatprep.subr.bf16.mxu1 %v10149_v27  ;;  %v10203_v26 = vld [vmem:[%s13731_s1 + $0xb8c] ss:$16 sps:$4 sm:$0xff]   ;;  %v10198_v27 = vld [vmem:[%s13731_s1 + $0xb80] ss:$16 sps:$4 sm:$0xff]   ;;  %v10248_v17 = vld [vmem:[%s13731_s1 + $0xc84] ss:$16 sps:$4 sm:$0xff]  }
 0x161   : > { %5113 = vmatprep.mubr.bf16.mxu0 %v682_v30  ;;  %6243 = vmatprep.mubr.bf16.mxu1 %v682_v30  ;;  %v622_v30 = vld [vmem:[%s10993_s8 + $0x9a8] sm:$0xff]  ;;  %v423_v16 = vld [vmem:[%s10993_s8 + $0x370] sm:$0xff] }
 0x163   : > { %5181 = vmatpush1.bf16.msra.mxu0 %v10144_v28  ;;  %6311 = vmatpush1.bf16.msra.mxu1 %v10147_v29  ;;  %v761_v28 = vpack.c.bf16 %v581_v24, %v561_v23  ;;  %v602_v29 = vld [vmem:[%s10993_s8 + $0x908] sm:$0xff]  ;;  %v464_v23 = vld [vmem:[%s10993_s8 + $0x4b8] sm:$0xff]  ;;  %v10254_v24 = vld [vmem:[%s13731_s1 + $0xca4] ss:$16 sps:$4 sm:$0xff]  }
 0x164   : > { %5182 = vmatprep.subr.bf16.mxu0 %v10152_v33  ;;  %6312 = vmatprep.subr.bf16.mxu1 %v10155_v34  ;;  %v10209_v33 = vld [vmem:[%s13731_s1 + $0xbac] ss:$16 sps:$4 sm:$0xff]   ;;  %v10204_v34 = vld [vmem:[%s13731_s1 + $0xba0] ss:$16 sps:$4 sm:$0xff]   ;;  %v782_v36 = vpack.c.bf16 %v622_v30, %v602_v29 }
 0x165   : > { %v443_v29 = vld [vmem:[%s10993_s8 + $0x410] sm:$0xff] }
 0x166   : > { %5114 = vmatmul.mubr.bf16.gmra.mrb[8].mxu0 %v681_v35  ;;  %6244 = vmatmul.mubr.bf16.gmra.mrb[8].mxu1 %v681_v35  ;;  %v10207_v35 = vld [vmem:[%s13731_s1 + $0xba8] ss:$16 sps:$4 sm:$0xff]   ;;  %v463_v30 = vld [vmem:[%s10993_s8 + $0x4b0] sm:$0xff] }
 0x167   : > { %5183 = vmatpush1.bf16.msra.mxu0 %v10150_v38  ;;  %6313 = vmatpush1.bf16.msra.mxu1 %v10153_v39  ;;  %v621_v38 = vld [vmem:[%s10993_s8 + $0x9a0] sm:$0xff] }
 0x168   : > { %5184 = vmatprep.subr.bf16.mxu0 %v10158_v40  ;;  %6314 = vmatprep.subr.bf16.mxu1 %v10161_v41  ;;  %v10212_v39 = vld [vmem:[%s13731_s1 + $0xbc4] ss:$16 sps:$4 sm:$0xff]   ;;  %v10215_v40 = vld [vmem:[%s13731_s1 + $0xbcc] ss:$16 sps:$4 sm:$0xff]   ;;  %v781_v41 = vpack.c.bf16 %v621_v38, %v601_v37  ;;  %v10261_v37 = vld [vmem:[%s13731_s1 + $0xcc8] ss:$16 sps:$4 sm:$0xff]  }
 0x169   : > { %5123 = vmatprep.mubr.bf16.mxu0 %v702_v44  ;;  %6253 = vmatprep.mubr.bf16.mxu1 %v702_v44  ;;  %v10210_v44 = vld [vmem:[%s13731_s1 + $0xbc0] ss:$16 sps:$4 sm:$0xff]   ;;  %v10266_v38 = vld [vmem:[%s13731_s1 + $0xce4] ss:$16 sps:$4 sm:$0xff]  }
 0x16b   : > { %5185 = vmatpush1.bf16.msra.mxu0 %v10156_v42  ;;  %6315 = vmatpush1.bf16.msra.mxu1 %v10159_v43  ;;  %v324_v42 = vld [vmem:[%s10993_s8 + $0x58] sm:$0xff] }
 0x16c   : > { %5186 = vmatprep.subr.bf16.mxu0 %v10164_v47  ;;  %6316 = vmatprep.subr.bf16.mxu1 %v10167_v48  ;;  %v344_v43 = vld [vmem:[%s10993_s8 + $0xf8] sm:$0xff]  ;;  %v10216_v48 = vld [vmem:[%s13731_s1 + $0xbe0] ss:$16 sps:$4 sm:$0xff]  }
 0x16d   : > { %v10221_v47 = vld [vmem:[%s13731_s1 + $0xbec] ss:$16 sps:$4 sm:$0xff]  }
 0x16e   : > { %5124 = vmatmul.mubr.bf16.gmra.mrb[12].mxu0 %v701_v50  ;;  %6254 = vmatmul.mubr.bf16.gmra.mrb[12].mxu1 %v701_v50  ;;  %v644_v50 = vpack.c.bf16 %v344_v43, %v324_v42  ;;  %v483_v43 = vld [vmem:[%s10993_s8 + $0x550] sm:$0xff] }
 0x16f   : > { %5187 = vmatpush1.bf16.msra.mxu0 %v10162_v49  ;;  %6317 = vmatpush1.bf16.msra.mxu1 %v10165_v51  ;;  %v10219_v49 = vld [vmem:[%s13731_s1 + $0xbe8] ss:$16 sps:$4 sm:$0xff]   ;;  %v323_v51 = vld [vmem:[%s10993_s8 + $0x50] sm:$0xff] }
 0x170   : > { %5188 = vmatprep.subr.bf16.mxu0 %v10170_v54  ;;  %6318 = vmatprep.subr.bf16.mxu1 %v10173_v55  ;;  %v10227_v54 = vld [vmem:[%s13731_s1 + $0xc0c] ss:$16 sps:$4 sm:$0xff]   ;;  %v10222_v55 = vld [vmem:[%s13731_s1 + $0xc00] ss:$16 sps:$4 sm:$0xff]  }
 0x171   : > { %5133 = vmatprep.mubr.bf16.mxu0 %v722_v57  ;;  %6263 = vmatprep.mubr.bf16.mxu1 %v722_v57  ;;  %v10225_v57 = vld [vmem:[%s13731_s1 + $0xc08] ss:$16 sps:$4 sm:$0xff]  }
 0x173   : > { %5189 = vmatpush1.bf16.msra.mxu0 %v10168_v56  ;;  %6319 = vmatpush1.bf16.msra.mxu1 %v10171_v58  ;;  %v643_v56 = vpack.c.bf16 %v343_v52, %v323_v51  ;;  %v364_v58 = vld [vmem:[%s10993_s8 + $0x198] sm:$0xff]  ;;  %v10278_v52 = vld [vmem:[%s13731_s1 + $0xd24] ss:$16 sps:$4 sm:$0xff]  }
 0x174   : > { %5190 = vmatprep.subr.bf16.mxu0 %v10176_v61  ;;  %6320 = vmatprep.subr.bf16.mxu1 %v10179_v62  ;;  %v10233_v61 = vld [vmem:[%s13731_s1 + $0xc2c] ss:$16 sps:$4 sm:$0xff]   ;;  %v10228_v62 = vld [vmem:[%s13731_s1 + $0xc20] ss:$16 sps:$4 sm:$0xff]   ;;  %v10273_v51 = vld [vmem:[%s13731_s1 + $0xd08] ss:$16 sps:$4 sm:$0xff]  }
 0x176   : > { %5134 = vmatmul.mubr.bf16.gmra.mrb[16].mxu0 %v721_v1  ;;  %6264 = vmatmul.mubr.bf16.gmra.mrb[16].mxu1 %v721_v1  ;;  %v363_v1 = vld [vmem:[%s10993_s8 + $0x190] sm:$0xff] }
 0x177   : > { %5191 = vmatpush1.bf16.msra.mxu0 %v10174_v63  ;;  %6321 = vmatpush1.bf16.msra.mxu1 %v10177_v0  ;;  %v664_v63 = vpack.c.bf16 %v384_v59, %v364_v58  ;;  %v10231_v0 = vld [vmem:[%s13731_s1 + $0xc28] ss:$16 sps:$4 sm:$0xff]   ;;  %v543_v58 = vld [vmem:[%s10993_s8 + $0x730] sm:$0xff] }
 0x178   : > { %5192 = vmatprep.subr.bf16.mxu0 %v10182_v4  ;;  %6322 = vmatprep.subr.bf16.mxu1 %v10185_v5  ;;  %v10239_v4 = vld [vmem:[%s13731_s1 + $0xc4c] ss:$16 sps:$4 sm:$0xff]   ;;  %v10234_v5 = vld [vmem:[%s13731_s1 + $0xc40] ss:$16 sps:$4 sm:$0xff]   ;;  %v10284_v59 = vld [vmem:[%s13731_s1 + $0xd44] ss:$16 sps:$4 sm:$0xff]  }
 0x179   : > { %5143 = vmatprep.mubr.bf16.mxu0 %v742_v6  ;;  %6273 = vmatprep.mubr.bf16.mxu1 %v742_v6  ;;  %v10237_v6 = vld [vmem:[%s13731_s1 + $0xc48] ss:$16 sps:$4 sm:$0xff]  }
 0x17b   : > { %5193 = vmatpush1.bf16.msra.mxu0 %v10180_v7  ;;  %6323 = vmatpush1.bf16.msra.mxu1 %v10183_v8  ;;  %v663_v7 = vpack.c.bf16 %v383_v2, %v363_v1  ;;  %v404_v8 = vld [vmem:[%s10993_s8 + $0x2d8] sm:$0xff]  ;;  %v10290_v2 = vld [vmem:[%s13731_s1 + $0xd64] ss:$16 sps:$4 sm:$0xff]  }
 0x17c   : > { %5194 = vmatprep.subr.bf16.mxu0 %v10188_v11  ;;  %6324 = vmatprep.subr.bf16.mxu1 %v10191_v12  ;;  %v10245_v11 = vld [vmem:[%s13731_s1 + $0xc6c] ss:$16 sps:$4 sm:$0xff]   ;;  %v684_v12 = vpack.c.bf16 %v424_v9, %v404_v8  ;;  %v583_v8 = vld [vmem:[%s10993_s8 + $0x870] sm:$0xff] }
 0x17d   : > { %v584_v1 = vld [vmem:[%s10993_s8 + $0x878] sm:$0xff]  ;;  %v10296_v9 = vld [vmem:[%s13731_s1 + $0xd84] ss:$16 sps:$4 sm:$0xff]  }
 0x17e   : > { %5144 = vmatmul.mubr.bf16.gmra.mrb[20].mxu0 %v741_v15  ;;  %6274 = vmatmul.mubr.bf16.gmra.mrb[20].mxu1 %v741_v15  ;;  %v403_v15 = vld [vmem:[%s10993_s8 + $0x2d0] sm:$0xff] }
 0x17f   : > { %5195 = vmatpush1.bf16.msra.mxu0 %v10186_v13  ;;  %6325 = vmatpush1.bf16.msra.mxu1 %v10189_v14  ;;  %v10240_v13 = vld [vmem:[%s13731_s1 + $0xc60] ss:$16 sps:$4 sm:$0xff]   ;;  %v10243_v14 = vld [vmem:[%s13731_s1 + $0xc68] ss:$16 sps:$4 sm:$0xff]  }
 0x180   : > { %5196 = vmatprep.subr.bf16.mxu0 %v10194_v18  ;;  %6326 = vmatprep.subr.bf16.mxu1 %v10197_v19  ;;  %v10251_v18 = vld [vmem:[%s13731_s1 + $0xc8c] ss:$16 sps:$4 sm:$0xff]   ;;  %v10246_v19 = vld [vmem:[%s13731_s1 + $0xc80] ss:$16 sps:$4 sm:$0xff]  }
 0x181   : > { %5153 = vmatprep.mubr.bf16.mxu0 %v762_v21  ;;  %6283 = vmatprep.mubr.bf16.mxu1 %v762_v21  ;;  %v683_v21 = vpack.c.bf16 %v423_v16, %v403_v15  ;;  %v624_v15 = vld [vmem:[%s10993_s8 + $0x9b8] sm:$0xff]  ;;  %v10302_v16 = vld [vmem:[%s13731_s1 + $0xda4] ss:$16 sps:$4 sm:$0xff]  }
 0x183   : > { %5197 = vmatpush1.bf16.msra.mxu0 %v10192_v20  ;;  %6327 = vmatpush1.bf16.msra.mxu1 %v10195_v22  ;;  %v10249_v20 = vld [vmem:[%s13731_s1 + $0xc88] ss:$16 sps:$4 sm:$0xff]  }
 0x184   : > { %5198 = vmatprep.subr.bf16.mxu0 %v10200_v25  ;;  %6328 = vmatprep.subr.bf16.mxu1 %v10203_v26  ;;  %v444_v22 = vld [vmem:[%s10993_s8 + $0x418] sm:$0xff]  ;;  %v10252_v26 = vld [vmem:[%s13731_s1 + $0xca0] ss:$16 sps:$4 sm:$0xff]  }
 0x185   : > { %v10257_v25 = vld [vmem:[%s13731_s1 + $0xcac] ss:$16 sps:$4 sm:$0xff]  }
 0x186   : > { %5154 = vmatmul.mubr.bf16.gmra.mrb[24].mxu0 %v761_v28  ;;  %6284 = vmatmul.mubr.bf16.gmra.mrb[24].mxu1 %v761_v28  ;;  %v10255_v28 = vld [vmem:[%s13731_s1 + $0xca8] ss:$16 sps:$4 sm:$0xff]  }
 0x187   : > { %5199 = vmatpush1.bf16.msra.mxu0 %v10198_v27  ;;  %6329 = vmatpush1.bf16.msra.mxu1 %v10201_v31  ;;  %v704_v27 = vpack.c.bf16 %v464_v23, %v444_v22  ;;  %v10260_v31 = vld [vmem:[%s13731_s1 + $0xcc4] ss:$16 sps:$4 sm:$0xff]  }
 0x188   : > { %5200 = vmatprep.subr.bf16.mxu0 %v10206_v32  ;;  %6330 = vmatprep.subr.bf16.mxu1 %v10209_v33  ;;  %v10263_v32 = vld [vmem:[%s13731_s1 + $0xccc] ss:$16 sps:$4 sm:$0xff]   ;;  %v10258_v33 = vld [vmem:[%s13731_s1 + $0xcc0] ss:$16 sps:$4 sm:$0xff]   ;;  %v10308_v23 = vld [vmem:[%s13731_s1 + $0xdc4] ss:$16 sps:$4 sm:$0xff]  }
 0x189   : > { %5163 = vmatprep.mubr.bf16.mxu0 %v782_v36  ;;  %6293 = vmatprep.mubr.bf16.mxu1 %v782_v36  ;;  %v504_v36 = vld [vmem:[%s10993_s8 + $0x5f8] sm:$0xff]  ;;  %v623_v22 = vld [vmem:[%s10993_s8 + $0x9b0] sm:$0xff] }
 0x18b   : > { %5201 = vmatpush1.bf16.msra.mxu0 %v10204_v34  ;;  %6331 = vmatpush1.bf16.msra.mxu1 %v10207_v35  ;;  %v703_v34 = vpack.c.bf16 %v463_v30, %v443_v29  ;;  %v484_v35 = vld [vmem:[%s10993_s8 + $0x558] sm:$0xff]  ;;  %v346_v29 = vld [vmem:[%s10993_s8 + $0x108] sm:$0xff]  ;;  %v10314_v30 = vld [vmem:[%s13731_s1 + $0xde4] ss:$16 sps:$4 sm:$0xff]  }
 0x18c   : > { %5202 = vmatprep.subr.bf16.mxu0 %v10212_v39  ;;  %6332 = vmatprep.subr.bf16.mxu1 %v10215_v40  ;;  %v10269_v39 = vld [vmem:[%s13731_s1 + $0xcec] ss:$16 sps:$4 sm:$0xff]   ;;  %v10264_v40 = vld [vmem:[%s13731_s1 + $0xce0] ss:$16 sps:$4 sm:$0xff]   ;;  %v724_v42 = vpack.c.bf16 %v504_v36, %v484_v35 }
 0x18d   : > { %v325_v35 = vld [vmem:[%s10993_s8 + $0x60] sm:$0xff] }
 0x18e   : > { %5164 = vmatmul.mubr.bf16.gmra.mrb[28].mxu0 %v781_v41  ;;  %6294 = vmatmul.mubr.bf16.gmra.mrb[28].mxu1 %v781_v41  ;;  %v10267_v41 = vld [vmem:[%s13731_s1 + $0xce8] ss:$16 sps:$4 sm:$0xff]   ;;  %v345_v36 = vld [vmem:[%s10993_s8 + $0x100] sm:$0xff] }
 0x18f   : > { %5203 = vmatpush1.bf16.msra.mxu0 %v10210_v44  ;;  %6333 = vmatpush1.bf16.msra.mxu1 %v10213_v45  ;;  %v503_v44 = vld [vmem:[%s10993_s8 + $0x5f0] sm:$0xff] }
 0x190   : > { %5204 = vmatprep.subr.bf16.mxu0 %v10218_v46  ;;  %6334 = vmatprep.subr.bf16.mxu1 %v10221_v47  ;;  %v10272_v45 = vld [vmem:[%s13731_s1 + $0xd04] ss:$16 sps:$4 sm:$0xff]   ;;  %v10275_v46 = vld [vmem:[%s13731_s1 + $0xd0c] ss:$16 sps:$4 sm:$0xff]   ;;  %v723_v47 = vpack.c.bf16 %v503_v44, %v483_v43  ;;  %v10321_v43 = vld [vmem:[%s13731_s1 + $0xe08] ss:$16 sps:$4 sm:$0xff]  }
 0x191   : > { %5206 = vmatprep.mubr.bf16.mxu0 %v644_v50  ;;  %6336 = vmatprep.mubr.bf16.mxu1 %v644_v50  ;;  %v10270_v50 = vld [vmem:[%s13731_s1 + $0xd00] ss:$16 sps:$4 sm:$0xff]   ;;  %v10326_v44 = vld [vmem:[%s13731_s1 + $0xe24] ss:$16 sps:$4 sm:$0xff]  }
 0x193   : > { %5205 = vmatpush1.bf16.msra.mxu0 %v10216_v48  ;;  %6335 = vmatpush1.bf16.msra.mxu1 %v10219_v49  ;;  %v524_v48 = vld [vmem:[%s10993_s8 + $0x698] sm:$0xff] }
 0x194   : > { %5287 = vmatprep.subr.bf16.mxu0 %v10224_v53  ;;  %6417 = vmatprep.subr.bf16.mxu1 %v10227_v54  ;;  %v544_v49 = vld [vmem:[%s10993_s8 + $0x738] sm:$0xff]  ;;  %v10276_v54 = vld [vmem:[%s13731_s1 + $0xd20] ss:$16 sps:$4 sm:$0xff]  }
 0x195   : > { %v10281_v53 = vld [vmem:[%s13731_s1 + $0xd2c] ss:$16 sps:$4 sm:$0xff]  }
 0x196   : > { %5207 = vmatmul.mubr.bf16.vlgmr.msra.gmra.mrb[0].mxu0 %v643_v56  ;;  %6337 = vmatmul.mubr.bf16.vlgmr.msra.gmra.mrb[0].mxu1 %v643_v56  ;;  %v744_v56 = vpack.c.bf16 %v544_v49, %v524_v48  ;;  %v365_v49 = vld [vmem:[%s10993_s8 + $0x1a0] sm:$0xff] }
 0x197   : > { %5288 = vmatpush1.bf16.msra.mxu0 %v10222_v55  ;;  %6418 = vmatpush1.bf16.msra.mxu1 %v10225_v57  ;;  %v10279_v55 = vld [vmem:[%s13731_s1 + $0xd28] ss:$16 sps:$4 sm:$0xff]   ;;  %v523_v57 = vld [vmem:[%s10993_s8 + $0x690] sm:$0xff] }
 0x198   : > { %5289 = vmatprep.subr.bf16.mxu0 %v10230_v60  ;;  %6419 = vmatprep.subr.bf16.mxu1 %v10233_v61  ;;  %v10287_v60 = vld [vmem:[%s13731_s1 + $0xd4c] ss:$16 sps:$4 sm:$0xff]   ;;  %v10282_v61 = vld [vmem:[%s13731_s1 + $0xd40] ss:$16 sps:$4 sm:$0xff]  }
 0x199   : > { %5216 = vmatprep.mubr.bf16.mxu0 %v664_v63  ;;  %6346 = vmatprep.mubr.bf16.mxu1 %v664_v63  ;;  %v10285_v63 = vld [vmem:[%s13731_s1 + $0xd48] ss:$16 sps:$4 sm:$0xff]  }
 0x19b   : > { %5290 = vmatpush1.bf16.msra.mxu0 %v10228_v62  ;;  %6420 = vmatpush1.bf16.msra.mxu1 %v10231_v0  ;;  %v743_v62 = vpack.c.bf16 %v543_v58, %v523_v57  ;;  %v564_v0 = vld [vmem:[%s10993_s8 + $0x7d8] sm:$0xff]  ;;  %v10338_v58 = vld [vmem:[%s13731_s1 + $0xe64] ss:$16 sps:$4 sm:$0xff]  }
 0x19c   : > { %5291 = vmatprep.subr.bf16.mxu0 %v10236_v3  ;;  %6421 = vmatprep.subr.bf16.mxu1 %v10239_v4  ;;  %v10293_v3 = vld [vmem:[%s13731_s1 + $0xd6c] ss:$16 sps:$4 sm:$0xff]   ;;  %v10288_v4 = vld [vmem:[%s13731_s1 + $0xd60] ss:$16 sps:$4 sm:$0xff]   ;;  %v10333_v57 = vld [vmem:[%s13731_s1 + $0xe48] ss:$16 sps:$4 sm:$0xff]  }
 0x19e   : > { %5217 = vmatmul.mubr.bf16.gmra.mrb[4].mxu0 %v663_v7  ;;  %6347 = vmatmul.mubr.bf16.gmra.mrb[4].mxu1 %v663_v7  ;;  %v563_v7 = vld [vmem:[%s10993_s8 + $0x7d0] sm:$0xff] }
 0x19f   : > { %5292 = vmatpush1.bf16.msra.mxu0 %v10234_v5  ;;  %6422 = vmatpush1.bf16.msra.mxu1 %v10237_v6  ;;  %v764_v5 = vpack.c.bf16 %v584_v1, %v564_v0  ;;  %v10291_v6 = vld [vmem:[%s13731_s1 + $0xd68] ss:$16 sps:$4 sm:$0xff]   ;;  %v425_v0 = vld [vmem:[%s10993_s8 + $0x380] sm:$0xff] }
 0x1a0   : > { %5293 = vmatprep.subr.bf16.mxu0 %v10242_v10  ;;  %6423 = vmatprep.subr.bf16.mxu1 %v10245_v11  ;;  %v10299_v10 = vld [vmem:[%s13731_s1 + $0xd8c] ss:$16 sps:$4 sm:$0xff]   ;;  %v10294_v11 = vld [vmem:[%s13731_s1 + $0xd80] ss:$16 sps:$4 sm:$0xff]   ;;  %v10344_v1 = vld [vmem:[%s13731_s1 + $0xe84] ss:$16 sps:$4 sm:$0xff]  }
 0x1a1   : > { %5226 = vmatprep.mubr.bf16.mxu0 %v684_v12  ;;  %6356 = vmatprep.mubr.bf16.mxu1 %v684_v12  ;;  %v10297_v12 = vld [vmem:[%s13731_s1 + $0xd88] ss:$16 sps:$4 sm:$0xff]  }
 0x1a3   : > { %5294 = vmatpush1.bf16.msra.mxu0 %v10240_v13  ;;  %6424 = vmatpush1.bf16.msra.mxu1 %v10243_v14  ;;  %v763_v13 = vpack.c.bf16 %v583_v8, %v563_v7  ;;  %v604_v14 = vld [vmem:[%s10993_s8 + $0x918] sm:$0xff]  ;;  %v466_v7 = vld [vmem:[%s10993_s8 + $0x4c8] sm:$0xff]  ;;  %v10350_v8 = vld [vmem:[%s13731_s1 + $0xea4] ss:$16 sps:$4 sm:$0xff]  }
 0x1a4   : > { %5295 = vmatprep.subr.bf16.mxu0 %v10248_v17  ;;  %6425 = vmatprep.subr.bf16.mxu1 %v10251_v18  ;;  %v10305_v17 = vld [vmem:[%s13731_s1 + $0xdac] ss:$16 sps:$4 sm:$0xff]   ;;  %v784_v18 = vpack.c.bf16 %v624_v15, %v604_v14  ;;  %v465_v14 = vld [vmem:[%s10993_s8 + $0x4c0] sm:$0xff] }
 0x1a5   : > { %v10356_v15 = vld [vmem:[%s13731_s1 + $0xec4] ss:$16 sps:$4 sm:$0xff]  }
 0x1a6   : > { %5227 = vmatmul.mubr.bf16.gmra.mrb[8].mxu0 %v683_v21  ;;  %6357 = vmatmul.mubr.bf16.gmra.mrb[8].mxu1 %v683_v21  ;;  %v603_v21 = vld [vmem:[%s10993_s8 + $0x910] sm:$0xff] }
 0x1a7   : > { %5296 = vmatpush1.bf16.msra.mxu0 %v10246_v19  ;;  %6426 = vmatpush1.bf16.msra.mxu1 %v10249_v20  ;;  %v10300_v19 = vld [vmem:[%s13731_s1 + $0xda0] ss:$16 sps:$4 sm:$0xff]   ;;  %v10303_v20 = vld [vmem:[%s13731_s1 + $0xda8] ss:$16 sps:$4 sm:$0xff]  }
 0x1a8   : > { %5297 = vmatprep.subr.bf16.mxu0 %v10254_v24  ;;  %6427 = vmatprep.subr.bf16.mxu1 %v10257_v25  ;;  %v10311_v24 = vld [vmem:[%s13731_s1 + $0xdcc] ss:$16 sps:$4 sm:$0xff]   ;;  %v10306_v25 = vld [vmem:[%s13731_s1 + $0xdc0] ss:$16 sps:$4 sm:$0xff]  }
 0x1a9   : > { %5236 = vmatprep.mubr.bf16.mxu0 %v704_v27  ;;  %6366 = vmatprep.mubr.bf16.mxu1 %v704_v27  ;;  %v783_v27 = vpack.c.bf16 %v623_v22, %v603_v21  ;;  %v10357_v21 = vld [vmem:[%s13731_s1 + $0xec8] ss:$16 sps:$4 sm:$0xff]   ;;  %v10362_v22 = vld [vmem:[%s13731_s1 + $0xee4] ss:$16 sps:$4 sm:$0xff]  }
 0x1ab   : > { %5298 = vmatpush1.bf16.msra.mxu0 %v10252_v26  ;;  %6428 = vmatpush1.bf16.msra.mxu1 %v10255_v28  ;;  %v10309_v26 = vld [vmem:[%s13731_s1 + $0xdc8] ss:$16 sps:$4 sm:$0xff]  }
 0x1ac   : > { %5299 = vmatprep.subr.bf16.mxu0 %v10260_v31  ;;  %6429 = vmatprep.subr.bf16.mxu1 %v10263_v32  ;;  %v326_v28 = vld [vmem:[%s10993_s8 + $0x68] sm:$0xff]  ;;  %v10312_v32 = vld [vmem:[%s13731_s1 + $0xde0] ss:$16 sps:$4 sm:$0xff]  }
 0x1ad   : > { %v10317_v31 = vld [vmem:[%s13731_s1 + $0xdec] ss:$16 sps:$4 sm:$0xff]  }
 0x1ae   : > { %5237 = vmatmul.mubr.bf16.gmra.mrb[12].mxu0 %v703_v34  ;;  %6367 = vmatmul.mubr.bf16.gmra.mrb[12].mxu1 %v703_v34  ;;  %v10315_v34 = vld [vmem:[%s13731_s1 + $0xde8] ss:$16 sps:$4 sm:$0xff]  }
 0x1af   : > { %5300 = vmatpush1.bf16.msra.mxu0 %v10258_v33  ;;  %6430 = vmatpush1.bf16.msra.mxu1 %v10261_v37  ;;  %v646_v33 = vpack.c.bf16 %v346_v29, %v326_v28  ;;  %v10320_v37 = vld [vmem:[%s13731_s1 + $0xe04] ss:$16 sps:$4 sm:$0xff]  }
 0x1b0   : > { %5301 = vmatprep.subr.bf16.mxu0 %v10266_v38  ;;  %6431 = vmatprep.subr.bf16.mxu1 %v10269_v39  ;;  %v10323_v38 = vld [vmem:[%s13731_s1 + $0xe0c] ss:$16 sps:$4 sm:$0xff]   ;;  %v10318_v39 = vld [vmem:[%s13731_s1 + $0xe00] ss:$16 sps:$4 sm:$0xff]   ;;  %v10368_v29 = vld [vmem:[%s13731_s1 + $0xf04] ss:$16 sps:$4 sm:$0xff]  }
 0x1b1   : > { %5246 = vmatprep.mubr.bf16.mxu0 %v724_v42  ;;  %6376 = vmatprep.mubr.bf16.mxu1 %v724_v42  ;;  %v386_v42 = vld [vmem:[%s10993_s8 + $0x248] sm:$0xff]  ;;  %v505_v28 = vld [vmem:[%s10993_s8 + $0x600] sm:$0xff] }
 0x1b3   : > { %5302 = vmatpush1.bf16.msra.mxu0 %v10264_v40  ;;  %6432 = vmatpush1.bf16.msra.mxu1 %v10267_v41  ;;  %v645_v40 = vpack.c.bf16 %v345_v36, %v325_v35  ;;  %v366_v41 = vld [vmem:[%s10993_s8 + $0x1a8] sm:$0xff]  ;;  %v10374_v36 = vld [vmem:[%s13731_s1 + $0xf24] ss:$16 sps:$4 sm:$0xff]  }
 0x1b4   : > { %5303 = vmatprep.subr.bf16.mxu0 %v10272_v45  ;;  %6433 = vmatprep.subr.bf16.mxu1 %v10275_v46  ;;  %v10329_v45 = vld [vmem:[%s13731_s1 + $0xe2c] ss:$16 sps:$4 sm:$0xff]   ;;  %v10324_v46 = vld [vmem:[%s13731_s1 + $0xe20] ss:$16 sps:$4 sm:$0xff]   ;;  %v666_v48 = vpack.c.bf16 %v386_v42, %v366_v41 }
 0x1b5   : > { %v546_v35 = vld [vmem:[%s10993_s8 + $0x748] sm:$0xff]  ;;  %v525_v41 = vld [vmem:[%s10993_s8 + $0x6a0] sm:$0xff] }
 0x1b6   : > { %5247 = vmatmul.mubr.bf16.gmra.mrb[16].mxu0 %v723_v47  ;;  %6377 = vmatmul.mubr.bf16.gmra.mrb[16].mxu1 %v723_v47  ;;  %v10327_v47 = vld [vmem:[%s13731_s1 + $0xe28] ss:$16 sps:$4 sm:$0xff]   ;;  %v545_v42 = vld [vmem:[%s10993_s8 + $0x740] sm:$0xff] }
 0x1b7   : > { %5304 = vmatpush1.bf16.msra.mxu0 %v10270_v50  ;;  %6434 = vmatpush1.bf16.msra.mxu1 %v10273_v51  ;;  %v385_v50 = vld [vmem:[%s10993_s8 + $0x240] sm:$0xff] }
 0x1b8   : > { %5305 = vmatprep.subr.bf16.mxu0 %v10278_v52  ;;  %6435 = vmatprep.subr.bf16.mxu1 %v10281_v53  ;;  %v10332_v51 = vld [vmem:[%s13731_s1 + $0xe44] ss:$16 sps:$4 sm:$0xff]   ;;  %v10335_v52 = vld [vmem:[%s13731_s1 + $0xe4c] ss:$16 sps:$4 sm:$0xff]   ;;  %v665_v53 = vpack.c.bf16 %v385_v50, %v365_v49 }
 0x1b9   : > { %5256 = vmatprep.mubr.bf16.mxu0 %v744_v56  ;;  %6386 = vmatprep.mubr.bf16.mxu1 %v744_v56  ;;  %v10330_v56 = vld [vmem:[%s13731_s1 + $0xe40] ss:$16 sps:$4 sm:$0xff]   ;;  %v586_v49 = vld [vmem:[%s10993_s8 + $0x888] sm:$0xff]  ;;  %v10386_v50 = vld [vmem:[%s13731_s1 + $0xf64] ss:$16 sps:$4 sm:$0xff]  }
 0x1bb   : > { %5306 = vmatpush1.bf16.msra.mxu0 %v10276_v54  ;;  %6436 = vmatpush1.bf16.msra.mxu1 %v10279_v55  ;;  %v406_v54 = vld [vmem:[%s10993_s8 + $0x2e8] sm:$0xff] }
 0x1bc   : > { %5307 = vmatprep.subr.bf16.mxu0 %v10284_v59  ;;  %6437 = vmatprep.subr.bf16.mxu1 %v10287_v60  ;;  %v426_v55 = vld [vmem:[%s10993_s8 + $0x388] sm:$0xff]  ;;  %v10336_v60 = vld [vmem:[%s13731_s1 + $0xe60] ss:$16 sps:$4 sm:$0xff]  }
 0x1bd   : > { %v10341_v59 = vld [vmem:[%s13731_s1 + $0xe6c] ss:$16 sps:$4 sm:$0xff]  }
 0x1be   : > { %5257 = vmatmul.mubr.bf16.gmra.mrb[20].mxu0 %v743_v62  ;;  %6387 = vmatmul.mubr.bf16.gmra.mrb[20].mxu1 %v743_v62  ;;  %v686_v62 = vpack.c.bf16 %v426_v55, %v406_v54  ;;  %v10387_v54 = vld [vmem:[%s13731_s1 + $0xf68] ss:$16 sps:$4 sm:$0xff]   ;;  %v565_v55 = vld [vmem:[%s10993_s8 + $0x7e0] sm:$0xff] }
 0x1bf   : > { %5308 = vmatpush1.bf16.msra.mxu0 %v10282_v61  ;;  %6438 = vmatpush1.bf16.msra.mxu1 %v10285_v63  ;;  %v10339_v61 = vld [vmem:[%s13731_s1 + $0xe68] ss:$16 sps:$4 sm:$0xff]   ;;  %v405_v63 = vld [vmem:[%s10993_s8 + $0x2e0] sm:$0xff] }
 0x1c0   : > { %5309 = vmatprep.subr.bf16.mxu0 %v10290_v2  ;;  %6439 = vmatprep.subr.bf16.mxu1 %v10293_v3  ;;  %v10347_v2 = vld [vmem:[%s13731_s1 + $0xe8c] ss:$16 sps:$4 sm:$0xff]   ;;  %v10342_v3 = vld [vmem:[%s13731_s1 + $0xe80] ss:$16 sps:$4 sm:$0xff]  }
 0x1c1   : > { %5266 = vmatprep.mubr.bf16.mxu0 %v764_v5  ;;  %6396 = vmatprep.mubr.bf16.mxu1 %v764_v5  ;;  %v10345_v5 = vld [vmem:[%s13731_s1 + $0xe88] ss:$16 sps:$4 sm:$0xff]  }
 0x1c3   : > { %5310 = vmatpush1.bf16.msra.mxu0 %v10288_v4  ;;  %6440 = vmatpush1.bf16.msra.mxu1 %v10291_v6  ;;  %v685_v4 = vpack.c.bf16 %v425_v0, %v405_v63  ;;  %v446_v6 = vld [vmem:[%s10993_s8 + $0x428] sm:$0xff]  ;;  %v10398_v0 = vld [vmem:[%s13731_s1 + $0xfa4] ss:$16 sps:$4 sm:$0xff]  }
 0x1c4   : > { %5311 = vmatprep.subr.bf16.mxu0 %v10296_v9  ;;  %6441 = vmatprep.subr.bf16.mxu1 %v10299_v10  ;;  %v10353_v9 = vld [vmem:[%s13731_s1 + $0xeac] ss:$16 sps:$4 sm:$0xff]   ;;  %v10348_v10 = vld [vmem:[%s13731_s1 + $0xea0] ss:$16 sps:$4 sm:$0xff]   ;;  %v10393_v63 = vld [vmem:[%s13731_s1 + $0xf88] ss:$16 sps:$4 sm:$0xff]  }
 0x1c6   : > { %5267 = vmatmul.mubr.bf16.gmra.mrb[24].mxu0 %v763_v13  ;;  %6397 = vmatmul.mubr.bf16.gmra.mrb[24].mxu1 %v763_v13  ;;  %v445_v13 = vld [vmem:[%s10993_s8 + $0x420] sm:$0xff] }
 0x1c7   : > { %5312 = vmatpush1.bf16.msra.mxu0 %v10294_v11  ;;  %6442 = vmatpush1.bf16.msra.mxu1 %v10297_v12  ;;  %v706_v11 = vpack.c.bf16 %v466_v7, %v446_v6  ;;  %v10351_v12 = vld [vmem:[%s13731_s1 + $0xea8] ss:$16 sps:$4 sm:$0xff]   ;;  %v625_v6 = vld [vmem:[%s10993_s8 + $0x9c0] sm:$0xff] }
 0x1c8   : > { %5313 = vmatprep.subr.bf16.mxu0 %v10302_v16  ;;  %6443 = vmatprep.subr.bf16.mxu1 %v10305_v17  ;;  %v10359_v16 = vld [vmem:[%s13731_s1 + $0xecc] ss:$16 sps:$4 sm:$0xff]   ;;  %v10354_v17 = vld [vmem:[%s13731_s1 + $0xec0] ss:$16 sps:$4 sm:$0xff]   ;;  %v10404_v7 = vld [vmem:[%s13731_s1 + $0xfc4] ss:$16 sps:$4 sm:$0xff]  }
 0x1c9   : > { %5276 = vmatprep.mubr.bf16.mxu0 %v784_v18  ;;  %6406 = vmatprep.mubr.bf16.mxu1 %v784_v18  ;;  %v705_v18 = vpack.c.bf16 %v465_v14, %v445_v13  ;;  %v348_v13 = vld [vmem:[%s10993_s8 + $0x118] sm:$0xff]  ;;  %v10410_v14 = vld [vmem:[%s13731_s1 + $0xfe4] ss:$16 sps:$4 sm:$0xff]  }
 0x1cb   : > { %5314 = vmatpush1.bf16.msra.mxu0 %v10300_v19  ;;  %6444 = vmatpush1.bf16.msra.mxu1 %v10303_v20  ;;  %v486_v19 = vld [vmem:[%s10993_s8 + $0x568] sm:$0xff] }
 0x1cc   : > { %5315 = vmatprep.subr.bf16.mxu0 %v10308_v23  ;;  %6445 = vmatprep.subr.bf16.mxu1 %v10311_v24  ;;  %v506_v20 = vld [vmem:[%s10993_s8 + $0x608] sm:$0xff]  ;;  %v10360_v24 = vld [vmem:[%s13731_s1 + $0xee0] ss:$16 sps:$4 sm:$0xff]  }
 0x1cd   : > { %v10365_v23 = vld [vmem:[%s13731_s1 + $0xeec] ss:$16 sps:$4 sm:$0xff]  }
 0x1ce   : > { %5277 = vmatmul.mubr.bf16.gmra.mrb[28].mxu0 %v783_v27  ;;  %6407 = vmatmul.mubr.bf16.gmra.mrb[28].mxu1 %v783_v27  ;;  %v485_v27 = vld [vmem:[%s10993_s8 + $0x560] sm:$0xff] }
 0x1cf   : > { %5316 = vmatpush1.bf16.msra.mxu0 %v10306_v25  ;;  %6446 = vmatpush1.bf16.msra.mxu1 %v10309_v26  ;;  %v726_v25 = vpack.c.bf16 %v506_v20, %v486_v19  ;;  %v10363_v26 = vld [vmem:[%s13731_s1 + $0xee8] ss:$16 sps:$4 sm:$0xff]   ;;  %v327_v19 = vld [vmem:[%s10993_s8 + $0x70] sm:$0xff] }
 0x1d0   : > { %5317 = vmatprep.subr.bf16.mxu0 %v10314_v30  ;;  %6447 = vmatprep.subr.bf16.mxu1 %v10317_v31  ;;  %v10371_v30 = vld [vmem:[%s13731_s1 + $0xf0c] ss:$16 sps:$4 sm:$0xff]   ;;  %v10366_v31 = vld [vmem:[%s13731_s1 + $0xf00] ss:$16 sps:$4 sm:$0xff]  }
 0x1d1   : > { %5319 = vmatprep.mubr.bf16.mxu0 %v646_v33  ;;  %6449 = vmatprep.mubr.bf16.mxu1 %v646_v33  ;;  %v10369_v33 = vld [vmem:[%s13731_s1 + $0xf08] ss:$16 sps:$4 sm:$0xff]   ;;  %v347_v20 = vld [vmem:[%s10993_s8 + $0x110] sm:$0xff] }
 0x1d3   : > { %5318 = vmatpush1.bf16.msra.mxu0 %v10312_v32  ;;  %6448 = vmatpush1.bf16.msra.mxu1 %v10315_v34  ;;  %v725_v32 = vpack.c.bf16 %v505_v28, %v485_v27  ;;  %v526_v34 = vld [vmem:[%s10993_s8 + $0x6a8] sm:$0xff]  ;;  %v10422_v28 = vld [vmem:[%s13731_s1 + $0x1024] ss:$16 sps:$4 sm:$0xff]  }
 0x1d4   : > { %5400 = vmatprep.subr.bf16.mxu0 %v10320_v37  ;;  %6530 = vmatprep.subr.bf16.mxu1 %v10323_v38  ;;  %v10377_v37 = vld [vmem:[%s13731_s1 + $0xf2c] ss:$16 sps:$4 sm:$0xff]   ;;  %v746_v38 = vpack.c.bf16 %v546_v35, %v526_v34  ;;  %v10417_v27 = vld [vmem:[%s13731_s1 + $0x1008] ss:$16 sps:$4 sm:$0xff]   ;;  %v387_v34 = vld [vmem:[%s10993_s8 + $0x250] sm:$0xff] }
 0x1d5   : > { %v10428_v35 = vld [vmem:[%s13731_s1 + $0x1044] ss:$16 sps:$4 sm:$0xff]  }
 0x1d6   : > { %5320 = vmatmul.mubr.bf16.vlgmr.msra.gmra.mrb[0].mxu0 %v645_v40  ;;  %6450 = vmatmul.mubr.bf16.vlgmr.msra.gmra.mrb[0].mxu1 %v645_v40  ;;  %v10375_v40 = vld [vmem:[%s13731_s1 + $0xf28] ss:$16 sps:$4 sm:$0xff]  }
 0x1d7   : > { %5401 = vmatpush1.bf16.msra.mxu0 %v10318_v39  ;;  %6531 = vmatpush1.bf16.msra.mxu1 %v10321_v43  ;;  %v10372_v39 = vld [vmem:[%s13731_s1 + $0xf20] ss:$16 sps:$4 sm:$0xff]   ;;  %v10380_v43 = vld [vmem:[%s13731_s1 + $0xf44] ss:$16 sps:$4 sm:$0xff]  }
 0x1d8   : > { %5402 = vmatprep.subr.bf16.mxu0 %v10326_v44  ;;  %6532 = vmatprep.subr.bf16.mxu1 %v10329_v45  ;;  %v10383_v44 = vld [vmem:[%s13731_s1 + $0xf4c] ss:$16 sps:$4 sm:$0xff]   ;;  %v10378_v45 = vld [vmem:[%s13731_s1 + $0xf40] ss:$16 sps:$4 sm:$0xff]  }
 0x1d9   : > { %5329 = vmatprep.mubr.bf16.mxu0 %v666_v48  ;;  %6459 = vmatprep.mubr.bf16.mxu1 %v666_v48  ;;  %v566_v48 = vld [vmem:[%s10993_s8 + $0x7e8] sm:$0xff] }
 0x1db   : > { %5403 = vmatpush1.bf16.msra.mxu0 %v10324_v46  ;;  %6533 = vmatpush1.bf16.msra.mxu1 %v10327_v47  ;;  %v10381_v46 = vld [vmem:[%s13731_s1 + $0xf48] ss:$16 sps:$4 sm:$0xff]   ;;  %v745_v47 = vpack.c.bf16 %v545_v42, %v525_v41  ;;  %v10434_v42 = vld [vmem:[%s13731_s1 + $0x1064] ss:$16 sps:$4 sm:$0xff]  }
 0x1dc   : > { %5404 = vmatprep.subr.bf16.mxu0 %v10332_v51  ;;  %6534 = vmatprep.subr.bf16.mxu1 %v10335_v52  ;;  %v10389_v51 = vld [vmem:[%s13731_s1 + $0xf6c] ss:$16 sps:$4 sm:$0xff]   ;;  %v10384_v52 = vld [vmem:[%s13731_s1 + $0xf60] ss:$16 sps:$4 sm:$0xff]  }
 0x1de   : > { %5330 = vmatmul.mubr.bf16.gmra.mrb[4].mxu0 %v665_v53  ;;  %6460 = vmatmul.mubr.bf16.gmra.mrb[4].mxu1 %v665_v53  ;;  %v766_v53 = vpack.c.bf16 %v586_v49, %v566_v48  ;;  %v427_v48 = vld [vmem:[%s10993_s8 + $0x390] sm:$0xff] }
 0x1df   : > { %5405 = vmatpush1.bf16.msra.mxu0 %v10330_v56  ;;  %6535 = vmatpush1.bf16.msra.mxu1 %v10333_v57  ;;  %v585_v56 = vld [vmem:[%s10993_s8 + $0x880] sm:$0xff] }
 0x1e0   : > { %5406 = vmatprep.subr.bf16.mxu0 %v10338_v58  ;;  %6536 = vmatprep.subr.bf16.mxu1 %v10341_v59  ;;  %v10392_v57 = vld [vmem:[%s13731_s1 + $0xf84] ss:$16 sps:$4 sm:$0xff]   ;;  %v10395_v58 = vld [vmem:[%s13731_s1 + $0xf8c] ss:$16 sps:$4 sm:$0xff]   ;;  %v765_v59 = vpack.c.bf16 %v585_v56, %v565_v55 }
 0x1e1   : > { %5339 = vmatprep.mubr.bf16.mxu0 %v686_v62  ;;  %6469 = vmatprep.mubr.bf16.mxu1 %v686_v62  ;;  %v10390_v62 = vld [vmem:[%s13731_s1 + $0xf80] ss:$16 sps:$4 sm:$0xff]   ;;  %v10440_v49 = vld [vmem:[%s13731_s1 + $0x1084] ss:$16 sps:$4 sm:$0xff]  }
 0x1e2   : > { %v10446_v56 = vld [vmem:[%s13731_s1 + $0x10a4] ss:$16 sps:$4 sm:$0xff]  }
 0x1e3   : > { %5407 = vmatpush1.bf16.msra.mxu0 %v10336_v60  ;;  %6537 = vmatpush1.bf16.msra.mxu1 %v10339_v61  ;;  %v606_v60 = vld [vmem:[%s10993_s8 + $0x928] sm:$0xff] }
 0x1e4   : > { %5408 = vmatprep.subr.bf16.mxu0 %v10344_v1  ;;  %6538 = vmatprep.subr.bf16.mxu1 %v10347_v2  ;;  %v626_v61 = vld [vmem:[%s10993_s8 + $0x9c8] sm:$0xff]  ;;  %v10396_v2 = vld [vmem:[%s13731_s1 + $0xfa0] ss:$16 sps:$4 sm:$0xff]  }
 0x1e5   : > { %v10401_v1 = vld [vmem:[%s13731_s1 + $0xfac] ss:$16 sps:$4 sm:$0xff]  }
 0x1e6   : > { %5340 = vmatmul.mubr.bf16.gmra.mrb[8].mxu0 %v685_v4  ;;  %6470 = vmatmul.mubr.bf16.gmra.mrb[8].mxu1 %v685_v4  ;;  %v786_v4 = vpack.c.bf16 %v626_v61, %v606_v60  ;;  %v447_v61 = vld [vmem:[%s10993_s8 + $0x430] sm:$0xff] }
 0x1e7   : > { %5409 = vmatpush1.bf16.msra.mxu0 %v10342_v3  ;;  %6539 = vmatpush1.bf16.msra.mxu1 %v10345_v5  ;;  %v10399_v3 = vld [vmem:[%s13731_s1 + $0xfa8] ss:$16 sps:$4 sm:$0xff]   ;;  %v605_v5 = vld [vmem:[%s10993_s8 + $0x920] sm:$0xff] }
 0x1e8   : > { %5410 = vmatprep.subr.bf16.mxu0 %v10350_v8  ;;  %6540 = vmatprep.subr.bf16.mxu1 %v10353_v9  ;;  %v10407_v8 = vld [vmem:[%s13731_s1 + $0xfcc] ss:$16 sps:$4 sm:$0xff]   ;;  %v10402_v9 = vld [vmem:[%s13731_s1 + $0xfc0] ss:$16 sps:$4 sm:$0xff]  }
 0x1e9   : > { %5349 = vmatprep.mubr.bf16.mxu0 %v706_v11  ;;  %6479 = vmatprep.mubr.bf16.mxu1 %v706_v11  ;;  %v10405_v11 = vld [vmem:[%s13731_s1 + $0xfc8] ss:$16 sps:$4 sm:$0xff]  }
 0x1eb   : > { %5411 = vmatpush1.bf16.msra.mxu0 %v10348_v10  ;;  %6541 = vmatpush1.bf16.msra.mxu1 %v10351_v12  ;;  %v785_v10 = vpack.c.bf16 %v625_v6, %v605_v5  ;;  %v328_v12 = vld [vmem:[%s10993_s8 + $0x78] sm:$0xff]  ;;  %v10458_v6 = vld [vmem:[%s13731_s1 + $0x10e4] ss:$16 sps:$4 sm:$0xff]  }
 0x1ec   : > { %5412 = vmatprep.subr.bf16.mxu0 %v10356_v15  ;;  %6542 = vmatprep.subr.bf16.mxu1 %v10359_v16  ;;  %v10413_v15 = vld [vmem:[%s13731_s1 + $0xfec] ss:$16 sps:$4 sm:$0xff]   ;;  %v648_v16 = vpack.c.bf16 %v348_v13, %v328_v12  ;;  %v507_v12 = vld [vmem:[%s10993_s8 + $0x610] sm:$0xff] }
 0x1ed   : > { %v10464_v13 = vld [vmem:[%s13731_s1 + $0x1104] ss:$16 sps:$4 sm:$0xff]  }
 0x1ee   : > { %5350 = vmatmul.mubr.bf16.gmra.mrb[12].mxu0 %v705_v18  ;;  %6480 = vmatmul.mubr.bf16.gmra.mrb[12].mxu1 %v705_v18  ;;  %v10411_v18 = vld [vmem:[%s13731_s1 + $0xfe8] ss:$16 sps:$4 sm:$0xff]  }
 0x1ef   : > { %5413 = vmatpush1.bf16.msra.mxu0 %v10354_v17  ;;  %6543 = vmatpush1.bf16.msra.mxu1 %v10357_v21  ;;  %v10408_v17 = vld [vmem:[%s13731_s1 + $0xfe0] ss:$16 sps:$4 sm:$0xff]   ;;  %v10416_v21 = vld [vmem:[%s13731_s1 + $0x1004] ss:$16 sps:$4 sm:$0xff]  }
 0x1f0   : > { %5414 = vmatprep.subr.bf16.mxu0 %v10362_v22  ;;  %6544 = vmatprep.subr.bf16.mxu1 %v10365_v23  ;;  %v10419_v22 = vld [vmem:[%s13731_s1 + $0x100c] ss:$16 sps:$4 sm:$0xff]   ;;  %v647_v23 = vpack.c.bf16 %v347_v20, %v327_v19  ;;  %v10470_v20 = vld [vmem:[%s13731_s1 + $0x1124] ss:$16 sps:$4 sm:$0xff]  }
 0x1f1   : > { %5359 = vmatprep.mubr.bf16.mxu0 %v726_v25  ;;  %6489 = vmatprep.mubr.bf16.mxu1 %v726_v25  ;;  %v388_v25 = vld [vmem:[%s10993_s8 + $0x258] sm:$0xff] }
 0x1f3   : > { %5415 = vmatpush1.bf16.msra.mxu0 %v10360_v24  ;;  %6545 = vmatpush1.bf16.msra.mxu1 %v10363_v26  ;;  %v368_v24 = vld [vmem:[%s10993_s8 + $0x1b8] sm:$0xff]  ;;  %v10414_v26 = vld [vmem:[%s13731_s1 + $0x1000] ss:$16 sps:$4 sm:$0xff]  }
 0x1f4   : > { %5416 = vmatprep.subr.bf16.mxu0 %v10368_v29  ;;  %6546 = vmatprep.subr.bf16.mxu1 %v10371_v30  ;;  %v10425_v29 = vld [vmem:[%s13731_s1 + $0x102c] ss:$16 sps:$4 sm:$0xff]   ;;  %v10420_v30 = vld [vmem:[%s13731_s1 + $0x1020] ss:$16 sps:$4 sm:$0xff]  }
 0x1f6   : > { %5360 = vmatmul.mubr.bf16.gmra.mrb[16].mxu0 %v725_v32  ;;  %6490 = vmatmul.mubr.bf16.gmra.mrb[16].mxu1 %v725_v32  ;;  %v668_v32 = vpack.c.bf16 %v388_v25, %v368_v24  ;;  %v527_v25 = vld [vmem:[%s10993_s8 + $0x6b0] sm:$0xff] }
 0x1f7   : > { %5417 = vmatpush1.bf16.msra.mxu0 %v10366_v31  ;;  %6547 = vmatpush1.bf16.msra.mxu1 %v10369_v33  ;;  %v10423_v31 = vld [vmem:[%s13731_s1 + $0x1028] ss:$16 sps:$4 sm:$0xff]   ;;  %v367_v33 = vld [vmem:[%s10993_s8 + $0x1b0] sm:$0xff] }
 0x1f8   : > { %5418 = vmatprep.subr.bf16.mxu0 %v10374_v36  ;;  %6548 = vmatprep.subr.bf16.mxu1 %v10377_v37  ;;  %v10431_v36 = vld [vmem:[%s13731_s1 + $0x104c] ss:$16 sps:$4 sm:$0xff]   ;;  %v667_v41 = vpack.c.bf16 %v387_v34, %v367_v33  ;;  %v10477_v33 = vld [vmem:[%s13731_s1 + $0x1148] ss:$16 sps:$4 sm:$0xff]   ;;  %v10482_v34 = vld [vmem:[%s13731_s1 + $0x1164] ss:$16 sps:$4 sm:$0xff]  }
 0x1f9   : > { %5369 = vmatprep.mubr.bf16.mxu0 %v746_v38  ;;  %6499 = vmatprep.mubr.bf16.mxu1 %v746_v38  ;;  %v408_v37 = vld [vmem:[%s10993_s8 + $0x2f8] sm:$0xff] }
 0x1fa   : > { %v428_v38 = vld [vmem:[%s10993_s8 + $0x398] sm:$0xff] }
 0x1fb   : > { %5419 = vmatpush1.bf16.msra.mxu0 %v10372_v39  ;;  %6549 = vmatpush1.bf16.msra.mxu1 %v10375_v40  ;;  %v10426_v39 = vld [vmem:[%s13731_s1 + $0x1040] ss:$16 sps:$4 sm:$0xff]   ;;  %v10429_v40 = vld [vmem:[%s13731_s1 + $0x1048] ss:$16 sps:$4 sm:$0xff]  }
 0x1fc   : > { %5420 = vmatprep.subr.bf16.mxu0 %v10380_v43  ;;  %6550 = vmatprep.subr.bf16.mxu1 %v10383_v44  ;;  %v10437_v43 = vld [vmem:[%s13731_s1 + $0x106c] ss:$16 sps:$4 sm:$0xff]   ;;  %v10432_v44 = vld [vmem:[%s13731_s1 + $0x1060] ss:$16 sps:$4 sm:$0xff]  }
 0x1fe   : > { %5370 = vmatmul.mubr.bf16.gmra.mrb[20].mxu0 %v745_v47  ;;  %6500 = vmatmul.mubr.bf16.gmra.mrb[20].mxu1 %v745_v47  ;;  %v407_v47 = vld [vmem:[%s10993_s8 + $0x2f0] sm:$0xff] }
 0x1ff   : > { %5421 = vmatpush1.bf16.msra.mxu0 %v10378_v45  ;;  %6551 = vmatpush1.bf16.msra.mxu1 %v10381_v46  ;;  %v10435_v45 = vld [vmem:[%s13731_s1 + $0x1068] ss:$16 sps:$4 sm:$0xff]   ;;  %v688_v46 = vpack.c.bf16 %v428_v38, %v408_v37  ;;  %v687_v55 = vpack.c.bf16 %v427_v48, %v407_v47  ;;  %v10480_v37 = vld [vmem:[%s13731_s1 + $0x1160] ss:$16 sps:$4 sm:$0xff]   ;;  %v10494_v48 = vld [vmem:[%s13731_s1 + $0x11a4] ss:$16 sps:$4 sm:$0xff]  }
 0x200   : > { %5422 = vmatprep.subr.bf16.mxu0 %v10386_v50  ;;  %6552 = vmatprep.subr.bf16.mxu1 %v10389_v51  ;;  %v10443_v50 = vld [vmem:[%s13731_s1 + $0x108c] ss:$16 sps:$4 sm:$0xff]   ;;  %v10483_v38 = vld [vmem:[%s13731_s1 + $0x1168] ss:$16 sps:$4 sm:$0xff]  }
 0x201   : > { %5379 = vmatprep.mubr.bf16.mxu0 %v766_v53  ;;  %6509 = vmatprep.mubr.bf16.mxu1 %v766_v53  ;;  %v448_v51 = vld [vmem:[%s10993_s8 + $0x438] sm:$0xff]  ;;  %v10438_v53 = vld [vmem:[%s13731_s1 + $0x1080] ss:$16 sps:$4 sm:$0xff]  }
 0x202   : > { %v10489_v47 = vld [vmem:[%s13731_s1 + $0x1188] ss:$16 sps:$4 sm:$0xff]  }
 0x203   : > { %5423 = vmatpush1.bf16.msra.mxu0 %v10384_v52  ;;  %6553 = vmatpush1.bf16.msra.mxu1 %v10387_v54  ;;  %v468_v52 = vld [vmem:[%s10993_s8 + $0x4d8] sm:$0xff] }
 0x204   : > { %5424 = vmatprep.subr.bf16.mxu0 %v10392_v57  ;;  %6554 = vmatprep.subr.bf16.mxu1 %v10395_v58  ;;  %v10441_v54 = vld [vmem:[%s13731_s1 + $0x1088] ss:$16 sps:$4 sm:$0xff]   ;;  %v10449_v57 = vld [vmem:[%s13731_s1 + $0x10ac] ss:$16 sps:$4 sm:$0xff]   ;;  %v10444_v58 = vld [vmem:[%s13731_s1 + $0x10a0] ss:$16 sps:$4 sm:$0xff]   ;;  %v708_v60 = vpack.c.bf16 %v468_v52, %v448_v51 }
 0x205   : > { %v10492_v51 = vld [vmem:[%s13731_s1 + $0x11a0] ss:$16 sps:$4 sm:$0xff]   ;;  %v10495_v52 = vld [vmem:[%s13731_s1 + $0x11a8] ss:$16 sps:$4 sm:$0xff]  }
 0x206   : > { %5380 = vmatmul.mubr.bf16.gmra.mrb[24].mxu0 %v765_v59  ;;  %6510 = vmatmul.mubr.bf16.gmra.mrb[24].mxu1 %v765_v59  ;;  %v10447_v59 = vld [vmem:[%s13731_s1 + $0x10a8] ss:$16 sps:$4 sm:$0xff]  }
 0x207   : > { %5425 = vmatpush1.bf16.msra.mxu0 %v10390_v62  ;;  %6555 = vmatpush1.bf16.msra.mxu1 %v10393_v63  ;;  %v467_v62 = vld [vmem:[%s10993_s8 + $0x4d0] sm:$0xff] }
 0x208   : > { %5426 = vmatprep.subr.bf16.mxu0 %v10398_v0  ;;  %6556 = vmatprep.subr.bf16.mxu1 %v10401_v1  ;;  %v10452_v63 = vld [vmem:[%s13731_s1 + $0x10c4] ss:$16 sps:$4 sm:$0xff]   ;;  %v10455_v0 = vld [vmem:[%s13731_s1 + $0x10cc] ss:$16 sps:$4 sm:$0xff]   ;;  %v707_v5 = vpack.c.bf16 %v467_v62, %v447_v61  ;;  %v10501_v61 = vld [vmem:[%s13731_s1 + $0x11c8] ss:$16 sps:$4 sm:$0xff]  }
 0x209   : > { %5389 = vmatprep.mubr.bf16.mxu0 %v786_v4  ;;  %6519 = vmatprep.mubr.bf16.mxu1 %v786_v4  ;;  %v488_v1 = vld [vmem:[%s10993_s8 + $0x578] sm:$0xff]  ;;  %v10506_v62 = vld [vmem:[%s13731_s1 + $0x11e4] ss:$16 sps:$4 sm:$0xff]  }
 0x20a   : > { %v10453_v4 = vld [vmem:[%s13731_s1 + $0x10c8] ss:$16 sps:$4 sm:$0xff]  }
 0x20b   : > { %5427 = vmatpush1.bf16.msra.mxu0 %v10396_v2  ;;  %6557 = vmatpush1.bf16.msra.mxu1 %v10399_v3  ;;  %v508_v2 = vld [vmem:[%s10993_s8 + $0x618] sm:$0xff]  ;;  %v10450_v3 = vld [vmem:[%s13731_s1 + $0x10c0] ss:$16 sps:$4 sm:$0xff]  }
 0x20c   : > { %5428 = vmatprep.subr.bf16.mxu0 %v10404_v7  ;;  %6558 = vmatprep.subr.bf16.mxu1 %v10407_v8  ;;  %v10461_v7 = vld [vmem:[%s13731_s1 + $0x10ec] ss:$16 sps:$4 sm:$0xff]   ;;  %v10456_v8 = vld [vmem:[%s13731_s1 + $0x10e0] ss:$16 sps:$4 sm:$0xff]  }
 0x20e   : > { %5390 = vmatmul.mubr.bf16.gmra.mrb[28].mxu0 %v785_v10  ;;  %6520 = vmatmul.mubr.bf16.gmra.mrb[28].mxu1 %v785_v10  ;;  %v728_v10 = vpack.c.bf16 %v508_v2, %v488_v1  ;;  %v10504_v1 = vld [vmem:[%s13731_s1 + $0x11e0] ss:$16 sps:$4 sm:$0xff]   ;;  %v10507_v2 = vld [vmem:[%s13731_s1 + $0x11e8] ss:$16 sps:$4 sm:$0xff]  }
 0x20f   : > { %5429 = vmatpush1.bf16.msra.mxu0 %v10402_v9  ;;  %6559 = vmatpush1.bf16.msra.mxu1 %v10405_v11  ;;  %v10459_v9 = vld [vmem:[%s13731_s1 + $0x10e8] ss:$16 sps:$4 sm:$0xff]   ;;  %v487_v11 = vld [vmem:[%s10993_s8 + $0x570] sm:$0xff] }
 0x210   : > { %5430 = vmatprep.subr.bf16.mxu0 %v10410_v14  ;;  %6560 = vmatprep.subr.bf16.mxu1 %v10413_v15  ;;  %v10467_v14 = vld [vmem:[%s13731_s1 + $0x110c] ss:$16 sps:$4 sm:$0xff]   ;;  %v727_v19 = vpack.c.bf16 %v507_v12, %v487_v11  ;;  %v10515_v12 = vld [vmem:[%s13731_s1 + $0x1224] ss:$16 sps:$4 sm:$0xff]  }
 0x211   : > { %5432 = vmatprep.mubr.bf16.mxu0 %v648_v16  ;;  %6562 = vmatprep.mubr.bf16.mxu1 %v648_v16  ;;  %v528_v15 = vld [vmem:[%s10993_s8 + $0x6b8] sm:$0xff] }
 0x212   : > { %v548_v16 = vld [vmem:[%s10993_s8 + $0x758] sm:$0xff] }
 0x213   : > { %5431 = vmatpush1.bf16.msra.mxu0 %v10408_v17  ;;  %6561 = vmatpush1.bf16.msra.mxu1 %v10411_v18  ;;  %v10462_v17 = vld [vmem:[%s13731_s1 + $0x1100] ss:$16 sps:$4 sm:$0xff]   ;;  %v10465_v18 = vld [vmem:[%s13731_s1 + $0x1108] ss:$16 sps:$4 sm:$0xff]   ;;  %v748_v24 = vpack.c.bf16 %v548_v16, %v528_v15 }
 0x214   : > { %5513 = vmatprep.subr.bf16.mxu0 %v10416_v21  ;;  %6643 = vmatprep.subr.bf16.mxu1 %v10419_v22  ;;  %v10473_v21 = vld [vmem:[%s13731_s1 + $0x112c] ss:$16 sps:$4 sm:$0xff]   ;;  %v10468_v22 = vld [vmem:[%s13731_s1 + $0x1120] ss:$16 sps:$4 sm:$0xff]  }
 0x215   : > { %v10513_v15 = vld [vmem:[%s13731_s1 + $0x1220] ss:$16 sps:$4 sm:$0xff]  }
 0x216   : > { %5433 = vmatmul.mubr.bf16.vlgmr.msra.gmra.mrb[0].mxu0 %v647_v23  ;;  %6563 = vmatmul.mubr.bf16.vlgmr.msra.gmra.mrb[0].mxu1 %v647_v23  ;;  %v10471_v23 = vld [vmem:[%s13731_s1 + $0x1128] ss:$16 sps:$4 sm:$0xff]   ;;  %v369_v16 = vld [vmem:[%s10993_s8 + $0x1c0] sm:$0xff] }
 0x217   : > { %5514 = vmatpush1.bf16.msra.mxu0 %v10414_v26  ;;  %6644 = vmatpush1.bf16.msra.mxu1 %v10417_v27  ;;  %v547_v26 = vld [vmem:[%s10993_s8 + $0x750] sm:$0xff] }
 0x218   : > { %5515 = vmatprep.subr.bf16.mxu0 %v10422_v28  ;;  %6645 = vmatprep.subr.bf16.mxu1 %v10425_v29  ;;  %v10476_v27 = vld [vmem:[%s13731_s1 + $0x1144] ss:$16 sps:$4 sm:$0xff]   ;;  %v10479_v28 = vld [vmem:[%s13731_s1 + $0x114c] ss:$16 sps:$4 sm:$0xff]  }
 0x219   : > { %5442 = vmatprep.mubr.bf16.mxu0 %v668_v32  ;;  %6572 = vmatprep.mubr.bf16.mxu1 %v668_v32  ;;  %v568_v29 = vld [vmem:[%s10993_s8 + $0x7f8] sm:$0xff]  ;;  %v747_v32 = vpack.c.bf16 %v547_v26, %v527_v25  ;;  %v10524_v25 = vld [vmem:[%s13731_s1 + $0x1264] ss:$16 sps:$4 sm:$0xff]  }
 0x21a   : > { %v10533_v26 = vld [vmem:[%s13731_s1 + $0x124c] ss:$16 sps:$4 sm:$0xff]  }
 0x21b   : > { %5516 = vmatpush1.bf16.msra.mxu0 %v10420_v30  ;;  %6646 = vmatpush1.bf16.msra.mxu1 %v10423_v31  ;;  %v588_v30 = vld [vmem:[%s10993_s8 + $0x898] sm:$0xff]  ;;  %v10474_v31 = vld [vmem:[%s13731_s1 + $0x1140] ss:$16 sps:$4 sm:$0xff]  }
 0x21c   : > { %5517 = vmatprep.subr.bf16.mxu0 %v10428_v35  ;;  %6647 = vmatprep.subr.bf16.mxu1 %v10431_v36  ;;  %v10485_v35 = vld [vmem:[%s13731_s1 + $0x116c] ss:$16 sps:$4 sm:$0xff]   ;;  %v768_v36 = vpack.c.bf16 %v588_v30, %v568_v29  ;;  %v409_v29 = vld [vmem:[%s10993_s8 + $0x300] sm:$0xff] }
 0x21d   : > { %v429_v30 = vld [vmem:[%s10993_s8 + $0x3a0] sm:$0xff] }
 0x21e   : > { %5443 = vmatmul.mubr.bf16.gmra.mrb[4].mxu0 %v667_v41  ;;  %6573 = vmatmul.mubr.bf16.gmra.mrb[4].mxu1 %v667_v41  ;;  %v10488_v41 = vld [vmem:[%s13731_s1 + $0x1184] ss:$16 sps:$4 sm:$0xff]  }
 0x21f   : > { %5518 = vmatpush1.bf16.msra.mxu0 %v10426_v39  ;;  %6648 = vmatpush1.bf16.msra.mxu1 %v10429_v40  ;;  %v567_v39 = vld [vmem:[%s10993_s8 + $0x7f0] sm:$0xff] }
 0x220   : > { %5519 = vmatprep.subr.bf16.mxu0 %v10434_v42  ;;  %6649 = vmatprep.subr.bf16.mxu1 %v10437_v43  ;;  %v587_v40 = vld [vmem:[%s10993_s8 + $0x890] sm:$0xff]  ;;  %v10491_v42 = vld [vmem:[%s13731_s1 + $0x118c] ss:$16 sps:$4 sm:$0xff]  }
 0x221   : > { %5452 = vmatprep.mubr.bf16.mxu0 %v688_v46  ;;  %6582 = vmatprep.mubr.bf16.mxu1 %v688_v46  ;;  %v767_v43 = vpack.c.bf16 %v587_v40, %v567_v39  ;;  %v10486_v46 = vld [vmem:[%s13731_s1 + $0x1180] ss:$16 sps:$4 sm:$0xff]   ;;  %v10534_v39 = vld [vmem:[%s13731_s1 + $0x1268] ss:$16 sps:$4 sm:$0xff]   ;;  %v10542_v40 = vld [vmem:[%s13731_s1 + $0x128c] ss:$16 sps:$4 sm:$0xff]  }
 0x223   : > { %5520 = vmatpush1.bf16.msra.mxu0 %v10432_v44  ;;  %6650 = vmatpush1.bf16.msra.mxu1 %v10435_v45  ;;  %v608_v44 = vld [vmem:[%s10993_s8 + $0x938] sm:$0xff] }
 0x224   : > { %5521 = vmatprep.subr.bf16.mxu0 %v10440_v49  ;;  %6651 = vmatprep.subr.bf16.mxu1 %v10443_v50  ;;  %v628_v45 = vld [vmem:[%s10993_s8 + $0x9d8] sm:$0xff] }
 0x225   : > { %v10497_v49 = vld [vmem:[%s13731_s1 + $0x11ac] ss:$16 sps:$4 sm:$0xff]   ;;  %v788_v50 = vpack.c.bf16 %v628_v45, %v608_v44  ;;  %v10545_v44 = vld [vmem:[%s13731_s1 + $0x12c4] ss:$16 sps:$4 sm:$0xff]  }
 0x226   : > { %5453 = vmatmul.mubr.bf16.gmra.mrb[8].mxu0 %v687_v55  ;;  %6583 = vmatmul.mubr.bf16.gmra.mrb[8].mxu1 %v687_v55  ;;  %v10500_v55 = vld [vmem:[%s13731_s1 + $0x11c4] ss:$16 sps:$4 sm:$0xff]   ;;  %v490_v45 = vld [vmem:[%s10993_s8 + $0x588] sm:$0xff] }
 0x227   : > { %5522 = vmatpush1.bf16.msra.mxu0 %v10438_v53  ;;  %6652 = vmatpush1.bf16.msra.mxu1 %v10441_v54  ;;  %v607_v53 = vld [vmem:[%s10993_s8 + $0x930] sm:$0xff] }
 0x228   : > { %5523 = vmatprep.subr.bf16.mxu0 %v10446_v56  ;;  %6653 = vmatprep.subr.bf16.mxu1 %v10449_v57  ;;  %v627_v54 = vld [vmem:[%s10993_s8 + $0x9d0] sm:$0xff]  ;;  %v10503_v56 = vld [vmem:[%s13731_s1 + $0x11cc] ss:$16 sps:$4 sm:$0xff]  }
 0x229   : > { %5462 = vmatprep.mubr.bf16.mxu0 %v708_v60  ;;  %6592 = vmatprep.mubr.bf16.mxu1 %v708_v60  ;;  %v787_v57 = vpack.c.bf16 %v627_v54, %v607_v53  ;;  %v10498_v60 = vld [vmem:[%s13731_s1 + $0x11c0] ss:$16 sps:$4 sm:$0xff]   ;;  %v10551_v53 = vld [vmem:[%s13731_s1 + $0x12e4] ss:$16 sps:$4 sm:$0xff]   ;;  %v10554_v54 = vld [vmem:[%s13731_s1 + $0x12cc] ss:$16 sps:$4 sm:$0xff]  }
 0x22b   : > { %5524 = vmatpush1.bf16.msra.mxu0 %v10444_v58  ;;  %6654 = vmatpush1.bf16.msra.mxu1 %v10447_v59  ;;  %v330_v58 = vld [vmem:[%s10993_s8 + $0x88] sm:$0xff] }
 0x22c   : > { %5525 = vmatprep.subr.bf16.mxu0 %v10452_v63  ;;  %6655 = vmatprep.subr.bf16.mxu1 %v10455_v0  ;;  %v350_v59 = vld [vmem:[%s10993_s8 + $0x128] sm:$0xff] }
 0x22d   : > { %v10509_v63 = vld [vmem:[%s13731_s1 + $0x11ec] ss:$16 sps:$4 sm:$0xff]   ;;  %v650_v0 = vpack.c.bf16 %v350_v59, %v330_v58 }
 0x22e   : > { %5463 = vmatmul.mubr.bf16.gmra.mrb[12].mxu0 %v707_v5  ;;  %6593 = vmatmul.mubr.bf16.gmra.mrb[12].mxu1 %v707_v5  ;;  %v10512_v5 = vld [vmem:[%s13731_s1 + $0x1204] ss:$16 sps:$4 sm:$0xff]   ;;  %v530_v58 = vld [vmem:[%s10993_s8 + $0x6c8] sm:$0xff] }
 0x22f   : > { %5526 = vmatpush1.bf16.msra.mxu0 %v10450_v3  ;;  %6656 = vmatpush1.bf16.msra.mxu1 %v10453_v4  ;;  %v329_v3 = vld [vmem:[%s10993_s8 + $0x80] sm:$0xff]  ;;  %v550_v59 = vld [vmem:[%s10993_s8 + $0x768] sm:$0xff] }
 0x230   : > { %5527 = vmatprep.subr.bf16.mxu0 %v10458_v6  ;;  %6657 = vmatprep.subr.bf16.mxu1 %v10461_v7  ;;  %v349_v4 = vld [vmem:[%s10993_s8 + $0x120] sm:$0xff]  ;;  %v370_v6 = vld [vmem:[%s10993_s8 + $0x1c8] sm:$0xff] }
 0x231   : > { %5472 = vmatprep.mubr.bf16.mxu0 %v728_v10  ;;  %6602 = vmatprep.mubr.bf16.mxu1 %v728_v10  ;;  %v390_v7 = vld [vmem:[%s10993_s8 + $0x268] sm:$0xff]  ;;  %v10510_v10 = vld [vmem:[%s13731_s1 + $0x1200] ss:$16 sps:$4 sm:$0xff]  }
 0x232   : > { %v670_v11 = vpack.c.bf16 %v390_v7, %v370_v6  ;;  %v549_v6 = vld [vmem:[%s10993_s8 + $0x760] sm:$0xff] }
 0x233   : > { %5528 = vmatpush1.bf16.msra.mxu0 %v10456_v8  ;;  %6658 = vmatpush1.bf16.msra.mxu1 %v10459_v9  ;;  %v10521_v8 = vld [vmem:[%s13731_s1 + $0x120c] ss:$16 sps:$4 sm:$0xff]   ;;  %v649_v9 = vpack.c.bf16 %v349_v4, %v329_v3  ;;  %v10566_v3 = vld [vmem:[%s13731_s1 + $0x1324] ss:$16 sps:$4 sm:$0xff]   ;;  %v10564_v7 = vld [vmem:[%s13731_s1 + $0x1320] ss:$16 sps:$4 sm:$0xff]  }
 0x234   : > { %5529 = vmatprep.subr.bf16.mxu0 %v10464_v13  ;;  %6659 = vmatprep.subr.bf16.mxu1 %v10467_v14  ;;  %v10519_v13 = vld [vmem:[%s13731_s1 + $0x1208] ss:$16 sps:$4 sm:$0xff]   ;;  %v10527_v14 = vld [vmem:[%s13731_s1 + $0x122c] ss:$16 sps:$4 sm:$0xff]  }
 0x235   : > { %v10563_v4 = vld [vmem:[%s13731_s1 + $0x130c] ss:$16 sps:$4 sm:$0xff]  }
 0x236   : > { %5473 = vmatmul.mubr.bf16.gmra.mrb[16].mxu0 %v727_v19  ;;  %6603 = vmatmul.mubr.bf16.gmra.mrb[16].mxu1 %v727_v19  ;;  %v410_v19 = vld [vmem:[%s10993_s8 + $0x308] sm:$0xff] }
 0x237   : > { %5530 = vmatpush1.bf16.msra.mxu0 %v10462_v17  ;;  %6660 = vmatpush1.bf16.msra.mxu1 %v10465_v18  ;;  %v389_v17 = vld [vmem:[%s10993_s8 + $0x260] sm:$0xff] }
 0x238   : > { %5531 = vmatprep.subr.bf16.mxu0 %v10470_v20  ;;  %6661 = vmatprep.subr.bf16.mxu1 %v10473_v21  ;;  %v10518_v18 = vld [vmem:[%s13731_s1 + $0x1244] ss:$16 sps:$4 sm:$0xff]   ;;  %v430_v20 = vld [vmem:[%s10993_s8 + $0x3a8] sm:$0xff] }
 0x239   : > { %5482 = vmatprep.mubr.bf16.mxu0 %v748_v24  ;;  %6612 = vmatprep.mubr.bf16.mxu1 %v748_v24  ;;  %v10525_v21 = vld [vmem:[%s13731_s1 + $0x1228] ss:$16 sps:$4 sm:$0xff]   ;;  %v690_v24 = vpack.c.bf16 %v430_v20, %v410_v19  ;;  %v1417_v19 = vld [vmem:[%s13731_s1 + $0x1380] sm:$0x33] }
 0x23a   : > { %v569_v20 = vld [vmem:[%s10993_s8 + $0x800] sm:$0xff] }
 0x23b   : > { %5532 = vmatpush1.bf16.msra.mxu0 %v10468_v22  ;;  %6662 = vmatpush1.bf16.msra.mxu1 %v10471_v23  ;;  %v669_v22 = vpack.c.bf16 %v389_v17, %v369_v16  ;;  %v10516_v23 = vld [vmem:[%s13731_s1 + $0x1240] ss:$16 sps:$4 sm:$0xff]   ;;  %v10567_v16 = vld [vmem:[%s13731_s1 + $0x1328] ss:$16 sps:$4 sm:$0xff]   ;;  %v10578_v17 = vld [vmem:[%s13731_s1 + $0x1364] ss:$16 sps:$4 sm:$0xff]  }
 0x23c   : > { %5533 = vmatprep.subr.bf16.mxu0 %v10476_v27  ;;  %6663 = vmatprep.subr.bf16.mxu1 %v10479_v28  ;;  %v10522_v27 = vld [vmem:[%s13731_s1 + $0x1260] ss:$16 sps:$4 sm:$0xff]   ;;  %v10531_v28 = vld [vmem:[%s13731_s1 + $0x1248] ss:$16 sps:$4 sm:$0xff]  }
 0x23e   : > { %5483 = vmatmul.mubr.bf16.gmra.mrb[20].mxu0 %v747_v32  ;;  %6613 = vmatmul.mubr.bf16.gmra.mrb[20].mxu1 %v747_v32  ;;  %v10530_v32 = vld [vmem:[%s13731_s1 + $0x1284] ss:$16 sps:$4 sm:$0xff]  }
 0x23f   : > { %5534 = vmatpush1.bf16.msra.mxu0 %v10474_v31  ;;  %6664 = vmatpush1.bf16.msra.mxu1 %v10477_v33  ;;  %v10536_v31 = vld [vmem:[%s13731_s1 + $0x126c] ss:$16 sps:$4 sm:$0xff]  }
 0x240   : > { %5535 = vmatprep.subr.bf16.mxu0 %v10482_v34  ;;  %6665 = vmatprep.subr.bf16.mxu1 %v10485_v35  ;;  %v450_v33 = vld [vmem:[%s10993_s8 + $0x448] sm:$0xff]  ;;  %v689_v35 = vpack.c.bf16 %v429_v30, %v409_v29 }
 0x241   : > { %5492 = vmatprep.mubr.bf16.mxu0 %v768_v36  ;;  %6622 = vmatprep.mubr.bf16.mxu1 %v768_v36  ;;  %v470_v34 = vld [vmem:[%s10993_s8 + $0x4e8] sm:$0xff]  ;;  %v10528_v36 = vld [vmem:[%s13731_s1 + $0x1280] ss:$16 sps:$4 sm:$0xff]  }
 0x242   : > { %v1418_v30 = vld [vmem:[%s13731_s1 + $0x1388] sm:$0x33] }
 0x243   : > { %5536 = vmatpush1.bf16.msra.mxu0 %v10480_v37  ;;  %6666 = vmatpush1.bf16.msra.mxu1 %v10483_v38  ;;  %v710_v37 = vpack.c.bf16 %v470_v34, %v450_v33  ;;  %v10539_v38 = vld [vmem:[%s13731_s1 + $0x12a4] ss:$16 sps:$4 sm:$0xff]  }
 0x244   : > { %5537 = vmatprep.subr.bf16.mxu0 %v10488_v41  ;;  %6667 = vmatprep.subr.bf16.mxu1 %v10491_v42  ;;  %v449_v41 = vld [vmem:[%s10993_s8 + $0x440] sm:$0xff] }
 0x245   : > { %v469_v42 = vld [vmem:[%s10993_s8 + $0x4e0] sm:$0xff] }
 0x246   : > { %5493 = vmatmul.mubr.bf16.gmra.mrb[24].mxu0 %v767_v43  ;;  %6623 = vmatmul.mubr.bf16.gmra.mrb[24].mxu1 %v767_v43  ;;  %v10537_v43 = vld [vmem:[%s13731_s1 + $0x12a0] ss:$16 sps:$4 sm:$0xff]   ;;  %v10588_v34 = vld [vmem:[%s13733_s3 + $0x4] ss:$8 sps:$4 sm:$0xff]  }
 0x247   : > { %5538 = vmatpush1.bf16.msra.mxu0 %v10486_v46  ;;  %6668 = vmatpush1.bf16.msra.mxu1 %v10489_v47  ;;  %v510_v46 = vld [vmem:[%s10993_s8 + $0x628] sm:$0xff] }
 0x248   : > { %5539 = vmatprep.subr.bf16.mxu0 %v10494_v48  ;;  %6669 = vmatprep.subr.bf16.mxu1 %v10497_v49  ;;  %v10540_v47 = vld [vmem:[%s13731_s1 + $0x1288] ss:$16 sps:$4 sm:$0xff]   ;;  %v709_v48 = vpack.c.bf16 %v469_v42, %v449_v41  ;;  %v10543_v49 = vld [vmem:[%s13731_s1 + $0x12c0] ss:$16 sps:$4 sm:$0xff]  }
 0x249   : > { %5502 = vmatprep.mubr.bf16.mxu0 %v788_v50  ;;  %6632 = vmatprep.mubr.bf16.mxu1 %v788_v50  ;;  %v730_v50 = vpack.c.bf16 %v510_v46, %v490_v45  ;;  %v331_v45 = vld [vmem:[%s10993_s8 + $0x90] sm:$0xff] }
 0x24a   : > { %v351_v46 = vld [vmem:[%s10993_s8 + $0x130] sm:$0xff] }
 0x24b   : > { %5540 = vmatpush1.bf16.msra.mxu0 %v10492_v51  ;;  %6670 = vmatpush1.bf16.msra.mxu1 %v10495_v52  ;;  %v10548_v51 = vld [vmem:[%s13731_s1 + $0x12ac] ss:$16 sps:$4 sm:$0xff]   ;;  %v10546_v52 = vld [vmem:[%s13731_s1 + $0x12a8] ss:$16 sps:$4 sm:$0xff]  }
 0x24c   : > { %5541 = vmatprep.subr.bf16.mxu0 %v10500_v55  ;;  %6671 = vmatprep.subr.bf16.mxu1 %v10503_v56  ;;  %v489_v55 = vld [vmem:[%s10993_s8 + $0x580] sm:$0xff] }
 0x24d   : > { %v509_v56 = vld [vmem:[%s10993_s8 + $0x620] sm:$0xff] }
 0x24e   : > { %5503 = vmatmul.mubr.bf16.gmra.mrb[28].mxu0 %v787_v57  ;;  %6633 = vmatmul.mubr.bf16.gmra.mrb[28].mxu1 %v787_v57  ;;  %v10549_v57 = vld [vmem:[%s13731_s1 + $0x12e0] ss:$16 sps:$4 sm:$0xff]  }
 0x24f   : > { %5542 = vmatpush1.bf16.msra.mxu0 %v10498_v60  ;;  %6672 = vmatpush1.bf16.msra.mxu1 %v10501_v61  ;;  %v10557_v60 = vld [vmem:[%s13731_s1 + $0x1304] ss:$16 sps:$4 sm:$0xff]   ;;  %v10552_v61 = vld [vmem:[%s13731_s1 + $0x12c8] ss:$16 sps:$4 sm:$0xff]  }
 0x250   : > { %5543 = vmatprep.subr.bf16.mxu0 %v10506_v62  ;;  %6673 = vmatprep.subr.bf16.mxu1 %v10509_v63  ;;  %v729_v62 = vpack.c.bf16 %v509_v56, %v489_v55  ;;  %v750_v63 = vpack.c.bf16 %v550_v59, %v530_v58  ;;  %v371_v55 = vld [vmem:[%s10993_s8 + $0x1d0] sm:$0xff]  ;;  %v432_v58 = vld [vmem:[%s10993_s8 + $0x3b8] sm:$0xff] }
 0x251   : > { %5545 = vmatprep.mubr.bf16.mxu0 %v650_v0  ;;  %6675 = vmatprep.mubr.bf16.mxu1 %v650_v0  ;;  %v10555_v0 = vld [vmem:[%s13731_s1 + $0x1300] ss:$16 sps:$4 sm:$0xff]  }
 0x252   : > { %v391_v56 = vld [vmem:[%s10993_s8 + $0x270] sm:$0xff] }
 0x253   : > { %5544 = vmatpush1.bf16.msra.mxu0 %v10504_v1  ;;  %6674 = vmatpush1.bf16.msra.mxu1 %v10507_v2  ;;  %v10560_v1 = vld [vmem:[%s13731_s1 + $0x12ec] ss:$16 sps:$4 sm:$0xff]   ;;  %v10558_v2 = vld [vmem:[%s13731_s1 + $0x12e8] ss:$16 sps:$4 sm:$0xff]  }
 0x254   : > { %5626 = vmatprep.subr.bf16.mxu0 %v10512_v5  ;;  %6756 = vmatprep.subr.bf16.mxu1 %v10521_v8  ;;  %v529_v5 = vld [vmem:[%s10993_s8 + $0x6c0] sm:$0xff]  ;;  %v570_v8 = vld [vmem:[%s10993_s8 + $0x808] sm:$0xff]  ;;  %v10589_v59 = vld [vmem:[%s13733_s3 + $0x10] ss:$8 sps:$4 sm:$0xff]  }
 0x256   : > { %5546 = vmatmul.mubr.bf16.vlgmr.msra.gmra.mrb[0].mxu0 %v649_v9  ;;  %6676 = vmatmul.mubr.bf16.vlgmr.msra.gmra.mrb[0].mxu1 %v649_v9  ;;  %v590_v9 = vld [vmem:[%s10993_s8 + $0x8a8] sm:$0xff] }
 0x257   : > { %5627 = vmatpush1.bf16.msra.mxu0 %v10510_v10  ;;  %5555 = vmatprep.mubr.bf16.mxu0 %v670_v11  ;;  %v10561_v10 = vld [vmem:[%s13731_s1 + $0x1308] ss:$16 sps:$4 sm:$0xff]  }
 0x258   : > { %5628 = vmatprep.subr.bf16.mxu0 %v10515_v12  ;;  %6685 = vmatprep.mubr.bf16.mxu1 %v670_v11  ;;  %v10572_v11 = vld [vmem:[%s13731_s1 + $0x1344] ss:$16 sps:$4 sm:$0xff]   ;;  %v749_v12 = vpack.c.bf16 %v549_v6, %v529_v5 }
 0x259   : > { %6757 = vmatpush1.bf16.msra.mxu1 %v10519_v13  ;;  %v770_v13 = vpack.c.bf16 %v590_v9, %v570_v8  ;;  %v411_v5 = vld [vmem:[%s10993_s8 + $0x310] sm:$0xff]  ;;  %v472_v8 = vld [vmem:[%s10993_s8 + $0x4f8] sm:$0xff] }
 0x25a   : > { %6758 = vmatprep.subr.bf16.mxu1 %v10527_v14  ;;  %v10569_v14 = vld [vmem:[%s13731_s1 + $0x132c] ss:$16 sps:$4 sm:$0xff]   ;;  %v431_v6 = vld [vmem:[%s10993_s8 + $0x3b0] sm:$0xff] }
 0x25b   : > { %5629 = vmatpush1.bf16.msra.mxu0 %v10513_v15  ;;  %v10570_v15 = vld [vmem:[%s13731_s1 + $0x1340] ss:$16 sps:$4 sm:$0xff]  }
 0x25c   : > { %5630 = vmatprep.subr.bf16.mxu0 %v10518_v18  ;;  %v10575_v18 = vld [vmem:[%s13731_s1 + $0x134c] ss:$16 sps:$4 sm:$0xff]   ;;  %v10595_v9 = vld [vmem:[%s13733_s3 + $0x30] ss:$8 sps:$4 sm:$0xff]  }
 0x25d   : > { %6759 = vmatpush1.bf16.msra.mxu1 %v10525_v21  ;;  %v589_v21 = vld [vmem:[%s10993_s8 + $0x8a0] sm:$0xff] }
 0x25e   : > { %5556 = vmatmul.mubr.bf16.gmra.mrb[4].mxu0 %v669_v22  ;;  %6686 = vmatmul.mubr.bf16.gmra.mrb[4].mxu1 %v669_v22  ;;  %v610_v22 = vld [vmem:[%s10993_s8 + $0x948] sm:$0xff] }
 0x25f   : > { %5631 = vmatpush1.bf16.msra.mxu0 %v10516_v23  ;;  %5565 = vmatprep.mubr.bf16.mxu0 %v690_v24  ;;  %v630_v23 = vld [vmem:[%s10993_s8 + $0x9e8] sm:$0xff] }
 0x260   : > { %5632 = vmatprep.subr.bf16.mxu0 %v10524_v25  ;;  %6695 = vmatprep.mubr.bf16.mxu1 %v690_v24  ;;  %v10576_v24 = vld [vmem:[%s13731_s1 + $0x1360] ss:$16 sps:$4 sm:$0xff]   ;;  %v10573_v25 = vld [vmem:[%s13731_s1 + $0x1348] ss:$16 sps:$4 sm:$0xff]   ;;  %v790_v29 = vpack.c.bf16 %v630_v23, %v610_v22  ;;  %v10606_v23 = vld [vmem:[%s13733_s3 + $0x64] ss:$8 sps:$4 sm:$0xff]  }
 0x261   : > { %6760 = vmatprep.subr.bf16.mxu1 %v10533_v26  ;;  %v8693_v26 = vcombine.high %v1417_v19, %v1417_v19  ;;  %v10601_v22 = vld [vmem:[%s13733_s3 + $0x50] ss:$8 sps:$4 sm:$0xff]  }
 0x262   : > { %6761 = vmatpush1.bf16.msra.mxu1 %v10531_v28  ;;  %v769_v28 = vpack.c.bf16 %v589_v21, %v569_v20  ;;  %v492_v20 = vld [vmem:[%s10993_s8 + $0x598] sm:$0xff] }
 0x263   : > { %5633 = vmatpush1.bf16.msra.mxu0 %v10522_v27  ;;  %6762 = vmatprep.subr.bf16.mxu1 %v10536_v31  ;;  %v8692_v27 = vcombine.low %v1417_v19, %v1417_v19  ;;  %v10581_v31 = vld [vmem:[%s13731_s1 + $0x136c] ss:$16 sps:$4 sm:$0xff]   ;;  %v471_v19 = vld [vmem:[%s10993_s8 + $0x4f0] sm:$0xff] }
 0x264   : > { %5634 = vmatprep.subr.bf16.mxu0 %v10530_v32  ;;  %v10579_v32 = vld [vmem:[%s13731_s1 + $0x1368] ss:$16 sps:$4 sm:$0xff]  }
 0x265   : > { %v4598_v33 = vsel %vm4596_vm0, %v8692_v27, 0  ;;  %v512_v21 = vld [vmem:[%s10993_s8 + $0x638] sm:$0xff] }
 0x266   : > { %5566 = vmatmul.mubr.bf16.gmra.mrb[8].mxu0 %v689_v35  ;;  %6696 = vmatmul.mubr.bf16.gmra.mrb[8].mxu1 %v689_v35  ;;  %v8695_v35 = vcombine.high %v1418_v30, %v1418_v30  ;;  %v10609_v27 = vld [vmem:[%s13733_s3 + $0x74] ss:$8 sps:$4 sm:$0xff]  }
 0x267   : > { %5635 = vmatpush1.bf16.msra.mxu0 %v10528_v36  ;;  %5575 = vmatprep.mubr.bf16.mxu0 %v710_v37  ;;  %v8694_v36 = vcombine.low %v1418_v30, %v1418_v30  ;;  %v532_v30 = vld [vmem:[%s10993_s8 + $0x6d8] sm:$0xff] }
 0x268   : > { %6705 = vmatprep.mubr.bf16.mxu1 %v710_v37  ;;  %5636 = vmatprep.subr.bf16.mxu0 %v10539_v38  ;;  %v609_v37 = vld [vmem:[%s10993_s8 + $0x940] sm:$0xff] }
 0x269   : > { %6763 = vmatpush1.bf16.msra.mxu1 %v10534_v39  ;;  %v629_v38 = vld [vmem:[%s10993_s8 + $0x9e0] sm:$0xff]  ;;  %v332_v39 = vld [vmem:[%s10993_s8 + $0x98] sm:$0xff]  ;;  %v4604_v42 = vsel %vm4596_vm0, %v8694_v36, 0 }
 0x26a   : > { %6764 = vmatprep.subr.bf16.mxu1 %v10542_v40  ;;  %v352_v40 = vld [vmem:[%s10993_s8 + $0x138] sm:$0xff]  ;;  %v789_v41 = vpack.c.bf16 %v629_v38, %v609_v37  ;;  %v10610_v36 = vld [vmem:[%s13733_s3 + $0x80] ss:$8 sps:$4 sm:$0xff]   ;;  %v531_v38 = vld [vmem:[%s10993_s8 + $0x6d0] sm:$0xff] }
 0x26b   : > { %5637 = vmatpush1.bf16.msra.mxu0 %v10537_v43  ;;  %v652_v43 = vpack.c.bf16 %v352_v40, %v332_v39  ;;  %v10618_v37 = vld [vmem:[%s13733_s3 + $0x94] ss:$8 sps:$4 sm:$0xff]  }
 0x26c   : > { %5638 = vmatprep.subr.bf16.mxu0 %v10545_v44  ;;  %v13041_v44 = vld [vmem:[%s13733_s3 + $0x104] ss:$8 sps:$4 sm:$0xff]   ;;  %v551_v39 = vld [vmem:[%s10993_s8 + $0x770] sm:$0xff]  ;;  %v572_v40 = vld [vmem:[%s10993_s8 + $0x818] sm:$0xff] }
 0x26d   : > { %6765 = vmatpush1.bf16.msra.mxu1 %v10540_v47  ;;  %v372_v47 = vld [vmem:[%s10993_s8 + $0x1d8] sm:$0xff] }
 0x26e   : > { %5576 = vmatmul.mubr.bf16.gmra.mrb[12].mxu0 %v709_v48  ;;  %6706 = vmatmul.mubr.bf16.gmra.mrb[12].mxu1 %v709_v48  ;;  %v392_v48 = vld [vmem:[%s10993_s8 + $0x278] sm:$0xff] }
 0x26f   : > { %5585 = vmatprep.mubr.bf16.mxu0 %v730_v50  ;;  %5639 = vmatpush1.bf16.msra.mxu0 %v10543_v49  ;;  %v651_v49 = vpack.c.bf16 %v351_v46, %v331_v45  ;;  %v751_v45 = vpack.c.bf16 %v551_v39, %v531_v38 }
 0x270   : > { %6715 = vmatprep.mubr.bf16.mxu1 %v730_v50  ;;  %6766 = vmatprep.subr.bf16.mxu1 %v10548_v51  ;;  %v672_v50 = vpack.c.bf16 %v392_v48, %v372_v47  ;;  %v10586_v51 = vld [vmem:[%s13733_s3] ss:$8 sps:$4 sm:$0xff]   ;;  %v10630_v48 = vld [vmem:[%s13733_s3 + $0xb4] ss:$8 sps:$4 sm:$0xff]  }
 0x271   : > { %6767 = vmatpush1.bf16.msra.mxu1 %v10546_v52  ;;  %5640 = vmatprep.subr.bf16.mxu0 %v10551_v53  ;;  %v13056_v52 = vld [vmem:[%s13733_s3 + $0x100] ss:$8 sps:$4 sm:$0xff]   ;;  %v10591_v53 = vld [vmem:[%s13733_s3 + $0x14] ss:$8 sps:$4 sm:$0xff]  }
 0x272   : > { %6768 = vmatprep.subr.bf16.mxu1 %v10554_v54  ;;  %v13064_v54 = vld [vmem:[%s13733_s3 + $0x114] ss:$8 sps:$4 sm:$0xff]   ;;  %v10622_v47 = vld [vmem:[%s13733_s3 + $0xa0] ss:$8 sps:$4 sm:$0xff]  }
 0x273   : > { %5641 = vmatpush1.bf16.msra.mxu0 %v10549_v57  ;;  %v412_v57 = vld [vmem:[%s10993_s8 + $0x318] sm:$0xff] }
 0x274   : > { %5642 = vmatprep.subr.bf16.mxu0 %v10557_v60  ;;  %v13079_v60 = vld [vmem:[%s13733_s3 + $0x110] ss:$8 sps:$4 sm:$0xff]  }
 0x275   : > { %6769 = vmatpush1.bf16.msra.mxu1 %v10552_v61  ;;  %v10594_v61 = vld [vmem:[%s13733_s3 + $0x24] ss:$8 sps:$4 sm:$0xff]  }
 0x276   : > { %5586 = vmatmul.mubr.bf16.gmra.mrb[16].mxu0 %v729_v62  ;;  %6716 = vmatmul.mubr.bf16.gmra.mrb[16].mxu1 %v729_v62  ;;  %v13088_v62 = vld [vmem:[%s13733_s3 + $0x124] ss:$8 sps:$4 sm:$0xff]  }
 0x277   : > { %5595 = vmatprep.mubr.bf16.mxu0 %v750_v63  ;;  %6725 = vmatprep.mubr.bf16.mxu1 %v750_v63  ;;  %v671_v63 = vpack.c.bf16 %v391_v56, %v371_v55  ;;  %v10628_v55 = vld [vmem:[%s13733_s3 + $0xb0] ss:$8 sps:$4 sm:$0xff]   ;;  %v10636_v56 = vld [vmem:[%s13733_s3 + $0xc4] ss:$8 sps:$4 sm:$0xff]  }
 0x278   : > { %6770 = vmatprep.subr.bf16.mxu1 %v10560_v1  ;;  %5643 = vmatpush1.bf16.msra.mxu0 %v10555_v0  ;;  %v692_v0 = vpack.c.bf16 %v432_v58, %v412_v57  ;;  %v10592_v1 = vld [vmem:[%s13733_s3 + $0x20] ss:$8 sps:$4 sm:$0xff]  }
 0x279   : > { %6771 = vmatpush1.bf16.msra.mxu1 %v10558_v2  ;;  %5644 = vmatprep.subr.bf16.mxu0 %v10566_v3  ;;  %v13097_v2 = vld [vmem:[%s13733_s3 + $0x120] ss:$8 sps:$4 sm:$0xff]   ;;  %v10597_v3 = vld [vmem:[%s13733_s3 + $0x34] ss:$8 sps:$4 sm:$0xff]  }
 0x27a   : > { %6772 = vmatprep.subr.bf16.mxu1 %v10563_v4  ;;  %v13106_v4 = vld [vmem:[%s13733_s3 + $0x134] ss:$8 sps:$4 sm:$0xff]  }
 0x27c   : > { %5645 = vmatpush1.bf16.msra.mxu0 %v10564_v7  ;;  %v452_v7 = vld [vmem:[%s10993_s8 + $0x458] sm:$0xff] }
 0x27d   : > { %6773 = vmatpush1.bf16.msra.mxu1 %v10561_v10  ;;  %5646 = vmatprep.subr.bf16.mxu0 %v10572_v11  ;;  %v13121_v10 = vld [vmem:[%s13733_s3 + $0x130] ss:$8 sps:$4 sm:$0xff]   ;;  %v10600_v11 = vld [vmem:[%s13733_s3 + $0x44] ss:$8 sps:$4 sm:$0xff]  }
 0x27e   : > { %5596 = vmatmul.mubr.bf16.gmra.mrb[20].mxu0 %v749_v12  ;;  %6726 = vmatmul.mubr.bf16.gmra.mrb[20].mxu1 %v749_v12  ;;  %v13130_v12 = vld [vmem:[%s13733_s3 + $0x144] ss:$8 sps:$4 sm:$0xff]  }
 0x27f   : > { %5605 = vmatprep.mubr.bf16.mxu0 %v770_v13  ;;  %6735 = vmatprep.mubr.bf16.mxu1 %v770_v13  ;;  %v691_v13 = vpack.c.bf16 %v431_v6, %v411_v5  ;;  %v10640_v5 = vld [vmem:[%s13733_s3 + $0xd0] ss:$8 sps:$4 sm:$0xff]  }
 0x280   : > { %6774 = vmatprep.subr.bf16.mxu1 %v10569_v14  ;;  %5647 = vmatpush1.bf16.msra.mxu0 %v10570_v15  ;;  %v712_v14 = vpack.c.bf16 %v472_v8, %v452_v7  ;;  %v10598_v15 = vld [vmem:[%s13733_s3 + $0x40] ss:$8 sps:$4 sm:$0xff]   ;;  %v13233_v6 = vld [vmem:[%s13733_s3 + $0x150] ss:$8 sps:$4 sm:$0xff]   ;;  %v10648_v7 = vld [vmem:[%s13733_s3 + $0xe4] ss:$8 sps:$4 sm:$0xff]  }
 0x281   : > { %6775 = vmatpush1.bf16.msra.mxu1 %v10567_v16  ;;  %5648 = vmatprep.subr.bf16.mxu0 %v10578_v17  ;;  %v13139_v16 = vld [vmem:[%s13733_s3 + $0x140] ss:$8 sps:$4 sm:$0xff]   ;;  %v10603_v17 = vld [vmem:[%s13733_s3 + $0x54] ss:$8 sps:$4 sm:$0xff]   ;;  %v13243_v8 = vld [vmem:[%s13733_s3 + $0x164] ss:$8 sps:$4 sm:$0xff]  }
 0x282   : > { %6776 = vmatprep.subr.bf16.mxu1 %v10575_v18  ;;  %v451_v18 = vld [vmem:[%s10993_s8 + $0x450] sm:$0xff] }
 0x284   : > { %5649 = vmatpush1.bf16.msra.mxu0 %v10576_v24  ;;  %v711_v24 = vpack.c.bf16 %v471_v19, %v451_v18  ;;  %v13277_v18 = vld [vmem:[%s13733_s3 + $0x184] ss:$8 sps:$4 sm:$0xff]   ;;  %v13282_v19 = vld [vmem:[%s13733_s3 + $0x180] ss:$8 sps:$4 sm:$0xff]  }
 0x285   : > { %6777 = vmatpush1.bf16.msra.mxu1 %v10573_v25  ;;  %8696 = vmatprep.subr.msk.bf16.mxu0 %vm4596_vm0, %v8693_v26  ;;  %v732_v25 = vpack.c.bf16 %v512_v21, %v492_v20  ;;  %v10604_v26 = vld [vmem:[%s13733_s3 + $0x60] ss:$8 sps:$4 sm:$0xff]   ;;  %v13289_v20 = vld [vmem:[%s13733_s3 + $0x194] ss:$8 sps:$4 sm:$0xff]   ;;  %v13301_v21 = vld [vmem:[%s13733_s3 + $0x1a4] ss:$8 sps:$4 sm:$0xff]  }
 0x286   : > { %5606 = vmatmul.mubr.bf16.gmra.mrb[24].mxu0 %v769_v28  ;;  %6736 = vmatmul.mubr.bf16.gmra.mrb[24].mxu1 %v769_v28  ;;  %v491_v28 = vld [vmem:[%s10993_s8 + $0x590] sm:$0xff] }
 0x287   : > { %5615 = vmatprep.mubr.bf16.mxu0 %v790_v29  ;;  %6745 = vmatprep.mubr.bf16.mxu1 %v790_v29  ;;  %v511_v29 = vld [vmem:[%s10993_s8 + $0x630] sm:$0xff] }
 0x288   : > { %6778 = vmatprep.subr.bf16.mxu1 %v10581_v31  ;;  %5651 = vmatpush1.bf16.msra.mxu0 %v4598_v33  ;;  %v552_v31 = vld [vmem:[%s10993_s8 + $0x778] sm:$0xff]  ;;  %v10612_v33 = vld [vmem:[%s13733_s3 + $0x84] ss:$8 sps:$4 sm:$0xff]  }
 0x289   : > { %6779 = vmatpush1.bf16.msra.mxu1 %v10579_v32  ;;  %7425 = vmatprep.subr.bf16.mxu0 %v10588_v34  ;;  %v10607_v32 = vld [vmem:[%s13733_s3 + $0x70] ss:$8 sps:$4 sm:$0xff]   ;;  %v731_v34 = vpack.c.bf16 %v511_v29, %v491_v28  ;;  %v13349_v29 = vld [vmem:[%s13733_s3 + $0x1e4] ss:$8 sps:$4 sm:$0xff]  }
 0x28a   : > { %8705 = vmatprep.subr.msk.bf16.mxu1 %vm4596_vm0, %v8695_v35  ;;  %v752_v35 = vpack.c.bf16 %v552_v31, %v532_v30  ;;  %v13342_v28 = vld [vmem:[%s13733_s3 + $0x1d0] ss:$8 sps:$4 sm:$0xff]   ;;  %v13354_v30 = vld [vmem:[%s13733_s3 + $0x1e0] ss:$8 sps:$4 sm:$0xff]   ;;  %v13361_v31 = vld [vmem:[%s13733_s3 + $0x1f4] ss:$8 sps:$4 sm:$0xff]  }
 0x28b   : > { %13747 = vst [vmem:[#allocation5_spill] sm:$0xff] %v13354_v30  ;;  %13748 = vst [vmem:[#allocation6_spill] sm:$0xff] %v13361_v31 }
 0x28d   : > { %6781 = vmatpush1.bf16.msra.mxu1 %v4604_v42  ;;  %v10616_v42 = vld [vmem:[%s13733_s3 + $0x90] ss:$8 sps:$4 sm:$0xff]  }
 0x28e   : > { %5616 = vmatmul.mubr.bf16.gmra.mrb[28].mxu0 %v789_v41  ;;  %6746 = vmatmul.mubr.bf16.gmra.mrb[28].mxu1 %v789_v41  ;;  %v592_v41 = vld [vmem:[%s10993_s8 + $0x8b8] sm:$0xff] }
 0x28f   : > { %8697 = vmatprep.mubr.msk.bf16.mxu0 %vm4571_vm1, %v652_v43  ;;  %8706 = vmatprep.mubr.msk.bf16.mxu1 %vm4571_vm1, %v652_v43  ;;  %v10624_v43 = vld [vmem:[%s13733_s3 + $0xa4] ss:$8 sps:$4 sm:$0xff]   ;;  %v772_v46 = vpack.c.bf16 %v592_v41, %v572_v40 }
 0x290   : > { %8869 = vmatprep.subr.bf16.mxu1 %v13041_v44 }
 0x296   : > { %5659 = vmatmul.mubr.bf16.vlgmr.msra.gmra.mrb[0].mxu0 %v651_v49  ;;  %6789 = vmatmul.mubr.bf16.vlgmr.msra.gmra.mrb[0].mxu1 %v651_v49  ;;  %v571_v49 = vld [vmem:[%s10993_s8 + $0x810] sm:$0xff] }
 0x297   : > { %8698 = vmatprep.mubr.msk.bf16.mxu0 %vm4571_vm1, %v672_v50  ;;  %8707 = vmatprep.mubr.msk.bf16.mxu1 %vm4571_vm1, %v672_v50  ;;  %v591_v50 = vld [vmem:[%s10993_s8 + $0x8b0] sm:$0xff] }
 0x298   : > { %7426 = vmatpush1.bf16.msra.mxu0 %v10586_v51  ;;  %8885 = vmatpush1.bf16.msra.mxu1 %v13056_v52  ;;  %v612_v51 = vld [vmem:[%s10993_s8 + $0x958] sm:$0xff]  ;;  %v771_v57 = vpack.c.bf16 %v591_v50, %v571_v49 }
 0x299   : > { %7427 = vmatprep.subr.bf16.mxu0 %v10591_v53  ;;  %8870 = vmatprep.subr.bf16.mxu1 %v13064_v54  ;;  %v632_v53 = vld [vmem:[%s10993_s8 + $0x9f8] sm:$0xff] }
 0x29a   : > { %v792_v58 = vpack.c.bf16 %v632_v53, %v612_v51 }
 0x29c   : > { %7428 = vmatpush1.bf16.msra.mxu0 %v10589_v59  ;;  %8886 = vmatpush1.bf16.msra.mxu1 %v13079_v60  ;;  %v10634_v59 = vld [vmem:[%s13733_s3 + $0xc0] ss:$8 sps:$4 sm:$0xff]  }
 0x29d   : > { %7429 = vmatprep.subr.bf16.mxu0 %v10594_v61  ;;  %8871 = vmatprep.subr.bf16.mxu1 %v13088_v62  ;;  %v611_v61 = vld [vmem:[%s10993_s8 + $0x950] sm:$0xff] }
 0x29e   : > { %5669 = vmatmul.mubr.bf16.gmra.mrb[4].mxu0 %v671_v63  ;;  %6799 = vmatmul.mubr.bf16.gmra.mrb[4].mxu1 %v671_v63  ;;  %v631_v63 = vld [vmem:[%s10993_s8 + $0x9f0] sm:$0xff] }
 0x29f   : > { %8699 = vmatprep.mubr.msk.bf16.mxu0 %vm4571_vm1, %v692_v0  ;;  %8708 = vmatprep.mubr.msk.bf16.mxu1 %vm4571_vm1, %v692_v0  ;;  %v791_v0 = vpack.c.bf16 %v631_v63, %v611_v61 }
 0x2a0   : > { %7430 = vmatpush1.bf16.msra.mxu0 %v10592_v1  ;;  %8887 = vmatpush1.bf16.msra.mxu1 %v13097_v2  ;;  %v10642_v1 = vld [vmem:[%s13733_s3 + $0xd4] ss:$8 sps:$4 sm:$0xff]  }
 0x2a1   : > { %7431 = vmatprep.subr.bf16.mxu0 %v10597_v3  ;;  %8872 = vmatprep.subr.bf16.mxu1 %v13106_v4  ;;  %v13225_v3 = vld [vmem:[%s13733_s3 + $0x154] ss:$8 sps:$4 sm:$0xff]  }
 0x2a4   : > { %7432 = vmatpush1.bf16.msra.mxu0 %v10595_v9  ;;  %8888 = vmatpush1.bf16.msra.mxu1 %v13121_v10  ;;  %v10646_v9 = vld [vmem:[%s13733_s3 + $0xe0] ss:$8 sps:$4 sm:$0xff]  }
 0x2a5   : > { %7433 = vmatprep.subr.bf16.mxu0 %v10600_v11  ;;  %8873 = vmatprep.subr.bf16.mxu1 %v13130_v12  ;;  %v13251_v11 = vld [vmem:[%s13733_s3 + $0x160] ss:$8 sps:$4 sm:$0xff]  }
 0x2a6   : > { %5679 = vmatmul.mubr.bf16.gmra.mrb[8].mxu0 %v691_v13  ;;  %6809 = vmatmul.mubr.bf16.gmra.mrb[8].mxu1 %v691_v13  ;;  %v10654_v13 = vld [vmem:[%s13733_s3 + $0xf4] ss:$8 sps:$4 sm:$0xff]  }
 0x2a7   : > { %8700 = vmatprep.mubr.msk.bf16.mxu0 %vm4571_vm1, %v712_v14  ;;  %8709 = vmatprep.mubr.msk.bf16.mxu1 %vm4571_vm1, %v712_v14  ;;  %v13261_v14 = vld [vmem:[%s13733_s3 + $0x174] ss:$8 sps:$4 sm:$0xff]  }
 0x2a8   : > { %7434 = vmatpush1.bf16.msra.mxu0 %v10598_v15  ;;  %8889 = vmatpush1.bf16.msra.mxu1 %v13139_v16  ;;  %v10652_v15 = vld [vmem:[%s13733_s3 + $0xf0] ss:$8 sps:$4 sm:$0xff]  }
 0x2a9   : > { %7435 = vmatprep.subr.bf16.mxu0 %v10603_v17  ;;  %8874 = vmatprep.subr.bf16.mxu1 %v13225_v3  ;;  %v13269_v17 = vld [vmem:[%s13733_s3 + $0x170] ss:$8 sps:$4 sm:$0xff]  }
 0x2ac   : > { %7436 = vmatpush1.bf16.msra.mxu0 %v10601_v22  ;;  %8890 = vmatpush1.bf16.msra.mxu1 %v13233_v6  ;;  %v13306_v22 = vld [vmem:[%s13733_s3 + $0x1a0] ss:$8 sps:$4 sm:$0xff]  }
 0x2ad   : > { %7437 = vmatprep.subr.bf16.mxu0 %v10606_v23  ;;  %8875 = vmatprep.subr.bf16.mxu1 %v13243_v8  ;;  %v13313_v23 = vld [vmem:[%s13733_s3 + $0x1b4] ss:$8 sps:$4 sm:$0xff]  }
 0x2ae   : > { %5689 = vmatmul.mubr.bf16.gmra.mrb[12].mxu0 %v711_v24  ;;  %6819 = vmatmul.mubr.bf16.gmra.mrb[12].mxu1 %v711_v24  ;;  %v13318_v24 = vld [vmem:[%s13733_s3 + $0x1b0] ss:$8 sps:$4 sm:$0xff]  }
 0x2af   : > { %8701 = vmatprep.mubr.msk.bf16.mxu0 %vm4571_vm1, %v732_v25  ;;  %8710 = vmatprep.mubr.msk.bf16.mxu1 %vm4571_vm1, %v732_v25  ;;  %v13325_v25 = vld [vmem:[%s13733_s3 + $0x1c4] ss:$8 sps:$4 sm:$0xff]  }
 0x2b0   : > { %7438 = vmatpush1.bf16.msra.mxu0 %v10604_v26  ;;  %8891 = vmatpush1.bf16.msra.mxu1 %v13251_v11  ;;  %v13330_v26 = vld [vmem:[%s13733_s3 + $0x1c0] ss:$8 sps:$4 sm:$0xff]  }
 0x2b1   : > { %7439 = vmatprep.subr.bf16.mxu0 %v10609_v27  ;;  %8876 = vmatprep.subr.bf16.mxu1 %v13261_v14  ;;  %v13337_v27 = vld [vmem:[%s13733_s3 + $0x1d4] ss:$8 sps:$4 sm:$0xff]  }
 0x2b4   : > { %7440 = vmatpush1.bf16.msra.mxu0 %v10607_v32  ;;  %8892 = vmatpush1.bf16.msra.mxu1 %v13269_v17  ;;  %v13366_v32 = vld [vmem:[%s13733_s3 + $0x1f0] ss:$8 sps:$4 sm:$0xff]  }
 0x2b5   : > { %7441 = vmatprep.subr.bf16.mxu0 %v10612_v33  ;;  %8877 = vmatprep.subr.bf16.mxu1 %v13277_v18  ;;  %13749 = vst [vmem:[#allocation7_spill] sm:$0xff] %v13366_v32  ;;  %v1421_v33 = vlaneseq }
 0x2b6   : > { %5699 = vmatmul.mubr.bf16.gmra.mrb[16].mxu0 %v731_v34  ;;  %6829 = vmatmul.mubr.bf16.gmra.mrb[16].mxu1 %v731_v34 }
 0x2b7   : > { %8702 = vmatprep.mubr.msk.bf16.mxu0 %vm4571_vm1, %v752_v35  ;;  %8711 = vmatprep.mubr.msk.bf16.mxu1 %vm4571_vm1, %v752_v35  ;;  %v13370_v34 = vshrl.u32 %v1421_v33, 7 }
 0x2b8   : > { %7442 = vmatpush1.bf16.msra.mxu0 %v10610_v36  ;;  %8893 = vmatpush1.bf16.msra.mxu1 %v13282_v19 }
 0x2b9   : > { %7443 = vmatprep.subr.bf16.mxu0 %v10618_v37  ;;  %8878 = vmatprep.subr.bf16.mxu1 %v13289_v20  ;;  %13750 = vst [vmem:[#allocation8_spill] sm:$0xff] %v13370_v34  ;;  %v13739_v35 = vsub.s32 0, %v13370_v34  ;;  %v1431_v36 = vsub.s32 2, %v13370_v34  ;;  %v1419_v37 = vld [vmem:[%s13732_s2] sm:$0xf]  ;;  %v13738_v38 = vsub.s32 1, %v13370_v34 }
 0x2ba   : > { %v1435_v39 = vsub.s32 3, %v13370_v34 }
 0x2bb   : > { %v13381_v40 = vrot.slane %v1419_v37, %v13739_v35  ;;  %v13383_v41 = vrot.slane %v1419_v37, %v1431_v36 }
 0x2bc   : > { %7444 = vmatpush1.bf16.msra.mxu0 %v10616_v42  ;;  %v13387_v42 = vrot.slane %v1419_v37, %v13738_v38 }
 0x2bd   : > { %7445 = vmatprep.subr.bf16.mxu0 %v10624_v43  ;;  %v13389_v43 = vrot.slane %v1419_v37, %v1435_v39 }
 0x2be   : > { %5709 = vmatmul.mubr.bf16.gmra.mrb[20].mxu0 %v751_v45  ;;  %6839 = vmatmul.mubr.bf16.gmra.mrb[20].mxu1 %v751_v45 }
 0x2bf   : > { %8703 = vmatprep.mubr.msk.bf16.mxu0 %vm4571_vm1, %v772_v46  ;;  %8712 = vmatprep.mubr.msk.bf16.mxu1 %vm4571_vm1, %v772_v46 }
 0x2c0   : > { %7446 = vmatpush1.bf16.msra.mxu0 %v10622_v47 }
 0x2c1   : > { %7447 = vmatprep.subr.bf16.mxu0 %v10630_v48 }
 0x2c4   : > { %7448 = vmatpush1.bf16.msra.mxu0 %v10628_v55 }
 0x2c5   : > { %7449 = vmatprep.subr.bf16.mxu0 %v10636_v56 }
 0x2c6   : > { %5719 = vmatmul.mubr.bf16.gmra.mrb[24].mxu0 %v771_v57  ;;  %6849 = vmatmul.mubr.bf16.gmra.mrb[24].mxu1 %v771_v57 }
 0x2c7   : > { %8704 = vmatprep.mubr.msk.bf16.mxu0 %vm4571_vm1, %v792_v58  ;;  %8713 = vmatprep.mubr.msk.bf16.mxu1 %vm4571_vm1, %v792_v58 }
 0x2c8   : > { %7450 = vmatpush1.bf16.msra.mxu0 %v10634_v59 }
 0x2c9   : > { %7451 = vmatprep.subr.bf16.mxu0 %v10642_v1 }
 0x2cc   : > { %7452 = vmatpush1.bf16.msra.mxu0 %v10640_v5 }
 0x2cd   : > { %7453 = vmatprep.subr.bf16.mxu0 %v10648_v7 }
 0x2ce   : > { %5729 = vmatmul.mubr.bf16.gmra.mrb[28].mxu0 %v791_v0  ;;  %6859 = vmatmul.mubr.bf16.gmra.mrb[28].mxu1 %v791_v0 }
 0x2d0   : > { %7454 = vmatpush1.bf16.msra.mxu0 %v10646_v9 }
 0x2d1   : > { %7455 = vmatprep.subr.bf16.mxu0 %v10654_v13 }
 0x2d4   : > { %7456 = vmatpush1.bf16.msra.mxu0 %v10652_v15 }
 0x2d5   : > { %7538 = vmatprep.subr.bf16.mxu0 %v13041_v44  ;;  %v13294_v44 = vld [vmem:[%s13733_s3 + $0x190] ss:$8 sps:$4 sm:$0xff]  }
 0x2d6   : > { %8894 = vmatpush1.bf16.msra.mxu1 %v13294_v44 }
 0x2d7   : > { %8879 = vmatprep.subr.bf16.mxu1 %v13301_v21 }
 0x2da   : > { %8895 = vmatpush1.bf16.msra.mxu1 %v13306_v22 }
 0x2db   : > { %8880 = vmatprep.subr.bf16.mxu1 %v13313_v23 }
 0x2de   : > { %8896 = vmatpush1.bf16.msra.mxu1 %v13318_v24 }
 0x2df   : > { %8881 = vmatprep.subr.bf16.mxu1 %v13325_v25 }
 0x2e2   : > { %8897 = vmatpush1.bf16.msra.mxu1 %v13330_v26 }
 0x2e3   : > { %8882 = vmatprep.subr.bf16.mxu1 %v13337_v27 }
 0x2e6   : > { %8898 = vmatpush1.bf16.msra.mxu1 %v13342_v28 }
 0x2e7   : > { %8883 = vmatprep.subr.bf16.mxu1 %v13349_v29 }
 0x2ea   : > { %8899 = vmatpush1.bf16.msra.mxu1 %v13354_v30 }
 0x2eb   : > { %8884 = vmatprep.subr.bf16.mxu1 %v13361_v31 }
 0x2ee   : > { %8900 = vmatpush1.bf16.msra.mxu1 %v13366_v32 }
 0x369   : > { %v5660_v45 = vpop.f32.mrb[0].mxu0  ;;  %v6790_v46 = vpop.f32.mrb[0].mxu1 }
 0x36a   : > { %v8901_v47 = vadd.f32 %v5660_v45, %v13381_v40  ;;  %v8933_v48 = vadd.f32 %v6790_v46, %v13383_v41  ;;  %v5662_v49 = vpop.f32.mrb[1].mxu0  ;;  %v6792_v50 = vpop.f32.mrb[1].mxu1 }
 0x36b   : > { %v8902_v51 = vadd.f32 %v5662_v49, %v13387_v42  ;;  %v8934_v53 = vadd.f32 %v6792_v50, %v13389_v43  ;;  %v5664_v55 = vpop.f32.mrb[2].mxu0  ;;  %v6794_v56 = vpop.f32.mrb[2].mxu1 }
 0x36c   : > { %v6869_v57 = vmul.f32 0.2, %v8901_v47  ;;  %v6871_v58 = vmul.f32 0.2, %v8933_v48  ;;  %v8903_v59 = vadd.f32 %v5664_v55, %v13381_v40  ;;  %v8935_v61 = vadd.f32 %v6794_v56, %v13383_v41  ;;  %v5666_v63 = vpop.f32.mrb[3].mxu0  ;;  %v6796_v0 = vpop.f32.mrb[3].mxu1 }
 0x36d   : > { %v6870_v1 = vmul.f32 0.2, %v8902_v51  ;;  %v6872_v5 = vmul.f32 0.2, %v8934_v53  ;;  %v8904_v7 = vadd.f32 %v5666_v63, %v13387_v42  ;;  %v8936_v9 = vadd.f32 %v6796_v0, %v13389_v43 }
 0x36e   : > { %v6873_v13 = vmul.f32 0.2, %v8903_v59  ;;  %v6875_v15 = vmul.f32 0.2, %v8935_v61  ;;  %v6933_v37 = vmax.f32 %v8901_v47, %v6869_v57  ;;  %v6935_v39 = vmax.f32 %v8933_v48, %v6871_v58 }
 0x36f   : > { %v6874_v33 = vmul.f32 0.2, %v8904_v7  ;;  %v6876_v36 = vmul.f32 0.2, %v8936_v9  ;;  %v6934_v49 = vmax.f32 %v8902_v51, %v6870_v1  ;;  %v6936_v50 = vmax.f32 %v8934_v53, %v6872_v5 }
 0x370   : > { %v6937_v45 = vmax.f32 %v8903_v59, %v6873_v13  ;;  %v6939_v46 = vmax.f32 %v8935_v61, %v6875_v15 }
 0x371   : > { %v6938_v55 = vmax.f32 %v8904_v7, %v6874_v33  ;;  %v6940_v56 = vmax.f32 %v8936_v9, %v6876_v36  ;;  %v5670_v38 = vpop.f32.mrb[4].mxu0  ;;  %v6800_v35 = vpop.f32.mrb[4].mxu1 }
 0x372   : > { %v6997_v34 = vpack.c.bf16 %v6937_v45, %v6933_v37  ;;  %v13399_v32 = vpack.c.bf16 %v6939_v46, %v6935_v39  ;;  %v8905_v63 = vadd.f32 %v5670_v38, %v13381_v40  ;;  %v8937_v0 = vadd.f32 %v6800_v35, %v13383_v41  ;;  %v5672_v31 = vpop.f32.mrb[5].mxu0  ;;  %v6802_v30 = vpop.f32.mrb[5].mxu1 }
 0x373   : > { %v8906_v47 = vadd.f32 %v5672_v31, %v13387_v42  ;;  %v8938_v48 = vadd.f32 %v6802_v30, %v13389_v43  ;;  %v5674_v57 = vpop.f32.mrb[6].mxu0  ;;  %v6804_v51 = vpop.f32.mrb[6].mxu1  ;;  %v6998_v53 = vpack.c.bf16 %v6938_v55, %v6934_v49  ;;  %v13405_v58 = vpack.c.bf16 %v6940_v56, %v6936_v50 }
 0x374   : > { %13751 = vst [vmem:[#allocation9_spill] sm:$0xff] %v13399_v32  ;;  %v6877_v59 = vmul.f32 0.2, %v8905_v63  ;;  %v6879_v61 = vmul.f32 0.2, %v8937_v0  ;;  %v8907_v1 = vadd.f32 %v5674_v57, %v13381_v40  ;;  %v8939_v5 = vadd.f32 %v6804_v51, %v13383_v41  ;;  %v5676_v38 = vpop.f32.mrb[7].mxu0 }
 0x375   : > { %v6806_v7 = vpop.f32.mrb[7].mxu1  ;;  %v6878_v35 = vmul.f32 0.2, %v8906_v47  ;;  %v6880_v9 = vmul.f32 0.2, %v8938_v48  ;;  %v8908_v13 = vadd.f32 %v5676_v38, %v13387_v42  ;;  %7457 = vmatprep.mubr.bf16.mxu0 %v6998_v53 }
 0x376   : > { %v8940_v31 = vadd.f32 %v6806_v7, %v13389_v43  ;;  %v6881_v30 = vmul.f32 0.2, %v8907_v1  ;;  %v6883_v15 = vmul.f32 0.2, %v8939_v5  ;;  %7458 = vmatmul.mubr.bf16.vlgmr.msra.gmra.mrb[32].mxu0 %v6997_v34  ;;  %v6941_v37 = vmax.f32 %v8905_v63, %v6877_v59 }
 0x377   : > { %v6882_v33 = vmul.f32 0.2, %v8908_v13  ;;  %7539 = vmatpush1.bf16.msra.mxu0 %v13056_v52  ;;  %v6943_v39 = vmax.f32 %v8937_v0, %v6879_v61  ;;  %v6942_v49 = vmax.f32 %v8906_v47, %v6878_v35  ;;  %v6944_v50 = vmax.f32 %v8938_v48, %v6880_v9 }
 0x378   : > { %v6884_v36 = vmul.f32 0.2, %v8940_v31  ;;  %v6945_v45 = vmax.f32 %v8907_v1, %v6881_v30  ;;  %v6947_v46 = vmax.f32 %v8939_v5, %v6883_v15  ;;  %7540 = vmatprep.subr.bf16.mxu0 %v13064_v54 }
 0x379   : > { %v6946_v55 = vmax.f32 %v8908_v13, %v6882_v33  ;;  %v5680_v57 = vpop.f32.mrb[8].mxu0  ;;  %v6810_v51 = vpop.f32.mrb[8].mxu1 }
 0x37a   : > { %v6948_v56 = vmax.f32 %v8940_v31, %v6884_v36  ;;  %v8909_v53 = vadd.f32 %v5680_v57, %v13381_v40  ;;  %v8941_v34 = vadd.f32 %v6810_v51, %v13383_v41  ;;  %v5682_v38 = vpop.f32.mrb[9].mxu0  ;;  %v6812_v7 = vpop.f32.mrb[9].mxu1  ;;  %v7001_v32 = vpack.c.bf16 %v6945_v45, %v6941_v37 }
 0x37b   : > { %v13415_v52 = vpack.c.bf16 %v6947_v46, %v6943_v39  ;;  %v8910_v63 = vadd.f32 %v5682_v38, %v13387_v42  ;;  %v8942_v0 = vadd.f32 %v6812_v7, %v13389_v43  ;;  %v5684_v54 = vpop.f32.mrb[10].mxu0  ;;  %v6814_v47 = vpop.f32.mrb[10].mxu1  ;;  %7541 = vmatpush1.bf16.msra.mxu0 %v13079_v60  ;;  %v7002_v48 = vpack.c.bf16 %v6946_v55, %v6942_v49 }
 0x37c   : > { %v13420_v59 = vpack.c.bf16 %v6948_v56, %v6944_v50  ;;  %v6885_v61 = vmul.f32 0.2, %v8909_v53  ;;  %v6887_v1 = vmul.f32 0.2, %v8941_v34  ;;  %v8911_v5 = vadd.f32 %v5684_v54, %v13381_v40  ;;  %v5686_v9 = vpop.f32.mrb[11].mxu0  ;;  %v6816_v13 = vpop.f32.mrb[11].mxu1  ;;  %7542 = vmatprep.subr.bf16.mxu0 %v13088_v62 }
 0x37d   : > { %v8943_v35 = vadd.f32 %v6814_v47, %v13383_v41  ;;  %v6886_v31 = vmul.f32 0.2, %v8910_v63  ;;  %v6888_v30 = vmul.f32 0.2, %v8942_v0  ;;  %v8912_v15 = vadd.f32 %v5686_v9, %v13387_v42  ;;  %7467 = vmatprep.mubr.bf16.mxu0 %v7002_v48 }
 0x37e   : > { %v8944_v33 = vadd.f32 %v6816_v13, %v13389_v43  ;;  %v6889_v60 = vmul.f32 0.2, %v8911_v5  ;;  %7468 = vmatmul.mubr.bf16.gmra.mrb[36].mxu0 %v7001_v32  ;;  %v6949_v45 = vmax.f32 %v8909_v53, %v6885_v61  ;;  %v6951_v46 = vmax.f32 %v8941_v34, %v6887_v1 }
 0x37f   : > { %v6891_v36 = vmul.f32 0.2, %v8943_v35  ;;  %v6890_v37 = vmul.f32 0.2, %v8912_v15  ;;  %7543 = vmatpush1.bf16.msra.mxu0 %v13097_v2  ;;  %v6950_v62 = vmax.f32 %v8910_v63, %v6886_v31  ;;  %v6952_v55 = vmax.f32 %v8942_v0, %v6888_v30 }
 0x380   : > { %v6892_v39 = vmul.f32 0.2, %v8944_v33  ;;  %v6953_v49 = vmax.f32 %v8911_v5, %v6889_v60  ;;  %7544 = vmatprep.subr.bf16.mxu0 %v13106_v4 }
 0x381   : > { %v6955_v50 = vmax.f32 %v8943_v35, %v6891_v36  ;;  %v6954_v56 = vmax.f32 %v8912_v15, %v6890_v37  ;;  %v5690_v51 = vpop.f32.mrb[12].mxu0  ;;  %v6820_v38 = vpop.f32.mrb[12].mxu1 }
 0x382   : > { %v6956_v57 = vmax.f32 %v8944_v33, %v6892_v39  ;;  %v8913_v7 = vadd.f32 %v5690_v51, %v13381_v40  ;;  %v8945_v32 = vadd.f32 %v6820_v38, %v13383_v41  ;;  %v5692_v54 = vpop.f32.mrb[13].mxu0  ;;  %v6822_v47 = vpop.f32.mrb[13].mxu1  ;;  %v7005_v48 = vpack.c.bf16 %v6953_v49, %v6949_v45 }
 0x383   : > { %v13431_v2 = vpack.c.bf16 %v6955_v50, %v6951_v46  ;;  %v8914_v53 = vadd.f32 %v5692_v54, %v13387_v42  ;;  %v8946_v34 = vadd.f32 %v6822_v47, %v13389_v43  ;;  %v5694_v4 = vpop.f32.mrb[14].mxu0  ;;  %v6824_v63 = vpop.f32.mrb[14].mxu1  ;;  %7545 = vmatpush1.bf16.msra.mxu0 %v13121_v10  ;;  %v7006_v0 = vpack.c.bf16 %v6954_v56, %v6950_v62 }
 0x384   : > { %v13436_v61 = vpack.c.bf16 %v6956_v57, %v6952_v55  ;;  %v6893_v1 = vmul.f32 0.2, %v8913_v7  ;;  %v6895_v5 = vmul.f32 0.2, %v8945_v32  ;;  %v8915_v35 = vadd.f32 %v5694_v4, %v13381_v40  ;;  %v5696_v13 = vpop.f32.mrb[15].mxu0  ;;  %v6826_v31 = vpop.f32.mrb[15].mxu1  ;;  %7546 = vmatprep.subr.bf16.mxu0 %v13130_v12 }
 0x385   : > { %v8947_v9 = vadd.f32 %v6824_v63, %v13383_v41  ;;  %v6894_v30 = vmul.f32 0.2, %v8914_v53  ;;  %v6896_v15 = vmul.f32 0.2, %v8946_v34  ;;  %v8916_v33 = vadd.f32 %v5696_v13, %v13387_v42  ;;  %7477 = vmatprep.mubr.bf16.mxu0 %v7006_v0 }
 0x386   : > { %v8948_v60 = vadd.f32 %v6826_v31, %v13389_v43  ;;  %v6897_v10 = vmul.f32 0.2, %v8915_v35  ;;  %7478 = vmatmul.mubr.bf16.gmra.mrb[40].mxu0 %v7005_v48  ;;  %v6957_v45 = vmax.f32 %v8913_v7, %v6893_v1  ;;  %v6959_v46 = vmax.f32 %v8945_v32, %v6895_v5 }
 0x387   : > { %v6899_v36 = vmul.f32 0.2, %v8947_v9  ;;  %v6898_v37 = vmul.f32 0.2, %v8916_v33  ;;  %7547 = vmatpush1.bf16.msra.mxu0 %v13139_v16  ;;  %v6958_v12 = vmax.f32 %v8914_v53, %v6894_v30  ;;  %v6960_v62 = vmax.f32 %v8946_v34, %v6896_v15 }
 0x388   : > { %v6900_v39 = vmul.f32 0.2, %v8948_v60  ;;  %v6961_v49 = vmax.f32 %v8915_v35, %v6897_v10  ;;  %7548 = vmatprep.subr.bf16.mxu0 %v13225_v3 }
 0x389   : > { %v6963_v50 = vmax.f32 %v8947_v9, %v6899_v36  ;;  %v6962_v55 = vmax.f32 %v8916_v33, %v6898_v37  ;;  %v5700_v57 = vpop.f32.mrb[16].mxu0  ;;  %v6830_v51 = vpop.f32.mrb[16].mxu1 }
 0x38a   : > { %v6964_v56 = vmax.f32 %v8948_v60, %v6900_v39  ;;  %v8917_v38 = vadd.f32 %v5700_v57, %v13381_v40  ;;  %v8949_v54 = vadd.f32 %v6830_v51, %v13383_v41  ;;  %v5702_v47 = vpop.f32.mrb[17].mxu0  ;;  %v6832_v48 = vpop.f32.mrb[17].mxu1  ;;  %v7009_v4 = vpack.c.bf16 %v6961_v49, %v6957_v45 }
 0x38b   : > { %v13447_v16 = vpack.c.bf16 %v6963_v50, %v6959_v46  ;;  %v8918_v7 = vadd.f32 %v5702_v47, %v13387_v42  ;;  %v8950_v32 = vadd.f32 %v6832_v48, %v13389_v43  ;;  %v5704_v3 = vpop.f32.mrb[18].mxu0  ;;  %v6834_v53 = vpop.f32.mrb[18].mxu1  ;;  %7549 = vmatpush1.bf16.msra.mxu0 %v13233_v6  ;;  %v7010_v34 = vpack.c.bf16 %v6962_v55, %v6958_v12 }
 0x38c   : > { %v13452_v63 = vpack.c.bf16 %v6964_v56, %v6960_v62  ;;  %v6901_v0 = vmul.f32 0.2, %v8917_v38  ;;  %v6903_v1 = vmul.f32 0.2, %v8949_v54  ;;  %v8919_v5 = vadd.f32 %v5704_v3, %v13381_v40  ;;  %v5706_v9 = vpop.f32.mrb[19].mxu0  ;;  %v6836_v13 = vpop.f32.mrb[19].mxu1  ;;  %7550 = vmatprep.subr.bf16.mxu0 %v13243_v8 }
 0x38d   : > { %v8951_v35 = vadd.f32 %v6834_v53, %v13383_v41  ;;  %v6902_v31 = vmul.f32 0.2, %v8918_v7  ;;  %v6904_v30 = vmul.f32 0.2, %v8950_v32  ;;  %v8920_v15 = vadd.f32 %v5706_v9, %v13387_v42  ;;  %7487 = vmatprep.mubr.bf16.mxu0 %v7010_v34 }
 0x38e   : > { %v8952_v33 = vadd.f32 %v6836_v13, %v13389_v43  ;;  %v6905_v6 = vmul.f32 0.2, %v8919_v5  ;;  %7488 = vmatmul.mubr.bf16.gmra.mrb[44].mxu0 %v7009_v4  ;;  %v6965_v37 = vmax.f32 %v8917_v38, %v6901_v0  ;;  %v6967_v39 = vmax.f32 %v8949_v54, %v6903_v1 }
 0x38f   : > { %v6907_v60 = vmul.f32 0.2, %v8951_v35  ;;  %v6906_v10 = vmul.f32 0.2, %v8920_v15  ;;  %7551 = vmatpush1.bf16.msra.mxu0 %v13251_v11  ;;  %v6966_v8 = vmax.f32 %v8918_v7, %v6902_v31  ;;  %v6968_v49 = vmax.f32 %v8950_v32, %v6904_v30 }
 0x390   : > { %v6908_v36 = vmul.f32 0.2, %v8952_v33  ;;  %v6969_v45 = vmax.f32 %v8919_v5, %v6905_v6  ;;  %7552 = vmatprep.subr.bf16.mxu0 %v13261_v14 }
 0x391   : > { %v6971_v46 = vmax.f32 %v8951_v35, %v6907_v60  ;;  %v6970_v50 = vmax.f32 %v8920_v15, %v6906_v10  ;;  %v5710_v62 = vpop.f32.mrb[20].mxu0  ;;  %v6840_v55 = vpop.f32.mrb[20].mxu1 }
 0x392   : > { %v6972_v12 = vmax.f32 %v8952_v33, %v6908_v36  ;;  %v8921_v57 = vadd.f32 %v5710_v62, %v13381_v40  ;;  %v8953_v51 = vadd.f32 %v6840_v55, %v13383_v41  ;;  %v5712_v47 = vpop.f32.mrb[21].mxu0  ;;  %v6842_v48 = vpop.f32.mrb[21].mxu1  ;;  %v7013_v11 = vpack.c.bf16 %v6969_v45, %v6965_v37 }
 0x393   : > { %v7015_v56 = vpack.c.bf16 %v6971_v46, %v6967_v39  ;;  %v8922_v38 = vadd.f32 %v5712_v47, %v13387_v42  ;;  %v8954_v54 = vadd.f32 %v6842_v48, %v13389_v43  ;;  %v5714_v4 = vpop.f32.mrb[22].mxu0  ;;  %v6844_v14 = vpop.f32.mrb[22].mxu1  ;;  %7553 = vmatpush1.bf16.msra.mxu0 %v13269_v17  ;;  %v7014_v7 = vpack.c.bf16 %v6970_v50, %v6966_v8 }
 0x394   : > { %v7016_v32 = vpack.c.bf16 %v6972_v12, %v6968_v49  ;;  %v6909_v3 = vmul.f32 0.2, %v8921_v57  ;;  %v6911_v53 = vmul.f32 0.2, %v8953_v51  ;;  %v8923_v34 = vadd.f32 %v5714_v4, %v13381_v40  ;;  %v5716_v1 = vpop.f32.mrb[23].mxu0  ;;  %v6846_v5 = vpop.f32.mrb[23].mxu1  ;;  %7554 = vmatprep.subr.bf16.mxu0 %v13277_v18 }
 0x395   : > { %v8955_v0 = vadd.f32 %v6844_v14, %v13383_v41  ;;  %v6910_v35 = vmul.f32 0.2, %v8922_v38  ;;  %v6912_v9 = vmul.f32 0.2, %v8954_v54  ;;  %v8924_v13 = vadd.f32 %v5716_v1, %v13387_v42  ;;  %7497 = vmatprep.mubr.bf16.mxu0 %v7014_v7 }
 0x396   : > { %v8956_v31 = vadd.f32 %v6846_v5, %v13389_v43  ;;  %7610 = vmatprep.mubr.bf16.mxu1 %v7016_v32  ;;  %v6913_v17 = vmul.f32 0.2, %v8923_v34  ;;  %7498 = vmatmul.mubr.bf16.gmra.mrb[48].mxu0 %v7013_v11  ;;  %v6973_v6 = vmax.f32 %v8921_v57, %v6909_v3  ;;  %v6975_v60 = vmax.f32 %v8953_v51, %v6911_v53 }
 0x397   : > { %v6915_v30 = vmul.f32 0.2, %v8955_v0  ;;  %7611 = vmatmul.mubr.bf16.vlgmr.msra.gmra.mrb[32].mxu1 %v7015_v56  ;;  %v6914_v15 = vmul.f32 0.2, %v8924_v13  ;;  %7555 = vmatpush1.bf16.msra.mxu0 %v13282_v19  ;;  %v6974_v36 = vmax.f32 %v8922_v38, %v6910_v35  ;;  %v6976_v37 = vmax.f32 %v8954_v54, %v6912_v9 }
 0x398   : > { %v6916_v33 = vmul.f32 0.2, %v8956_v31  ;;  %v6977_v10 = vmax.f32 %v8923_v34, %v6913_v17  ;;  %7556 = vmatprep.subr.bf16.mxu0 %v13289_v20 }
 0x399   : > { %v6979_v18 = vmax.f32 %v8955_v0, %v6915_v30  ;;  %v6978_v39 = vmax.f32 %v8924_v13, %v6914_v15  ;;  %v5720_v46 = vpop.f32.mrb[24].mxu0  ;;  %v6850_v8 = vpop.f32.mrb[24].mxu1 }
 0x39a   : > { %v6980_v45 = vmax.f32 %v8956_v31, %v6916_v33  ;;  %v8925_v49 = vadd.f32 %v5720_v46, %v13381_v40  ;;  %v8957_v50 = vadd.f32 %v6850_v8, %v13383_v41  ;;  %v5722_v12 = vpop.f32.mrb[25].mxu0  ;;  %v6852_v62 = vpop.f32.mrb[25].mxu1  ;;  %v7017_v55 = vpack.c.bf16 %v6977_v10, %v6973_v6 }
 0x39b   : > { %v7019_v19 = vpack.c.bf16 %v6979_v18, %v6975_v60  ;;  %v8926_v56 = vadd.f32 %v5722_v12, %v13387_v42  ;;  %v8958_v57 = vadd.f32 %v6852_v62, %v13389_v43  ;;  %v5724_v51 = vpop.f32.mrb[26].mxu0  ;;  %v6854_v20 = vpop.f32.mrb[26].mxu1  ;;  %7557 = vmatpush1.bf16.msra.mxu0 %v13294_v44  ;;  %v7018_v47 = vpack.c.bf16 %v6978_v39, %v6974_v36 }
 0x39c   : > { %v7020_v48 = vpack.c.bf16 %v6980_v45, %v6976_v37  ;;  %v6917_v11 = vmul.f32 0.2, %v8925_v49  ;;  %v6919_v38 = vmul.f32 0.2, %v8957_v50  ;;  %v8927_v54 = vadd.f32 %v5724_v51, %v13381_v40  ;;  %v5726_v14 = vpop.f32.mrb[27].mxu0  ;;  %v6856_v7 = vpop.f32.mrb[27].mxu1  ;;  %7558 = vmatprep.subr.bf16.mxu0 %v13301_v21 }
 0x39d   : > { %v8959_v4 = vadd.f32 %v6854_v20, %v13383_v41  ;;  %v6918_v32 = vmul.f32 0.2, %v8926_v56  ;;  %v6920_v3 = vmul.f32 0.2, %v8958_v57  ;;  %v8928_v53 = vadd.f32 %v5726_v14, %v13387_v42  ;;  %7507 = vmatprep.mubr.bf16.mxu0 %v7018_v47 }
 0x39e   : > { %v8960_v34 = vadd.f32 %v6856_v7, %v13389_v43  ;;  %7620 = vmatprep.mubr.bf16.mxu1 %v7020_v48  ;;  %v6921_v44 = vmul.f32 0.2, %v8927_v54  ;;  %7508 = vmatmul.mubr.bf16.gmra.mrb[52].mxu0 %v7017_v55  ;;  %v6981_v35 = vmax.f32 %v8925_v49, %v6917_v11  ;;  %v6983_v9 = vmax.f32 %v8957_v50, %v6919_v38 }
 0x39f   : > { %v6923_v0 = vmul.f32 0.2, %v8959_v4  ;;  %7621 = vmatmul.mubr.bf16.gmra.mrb[36].mxu1 %v7019_v19  ;;  %v6922_v1 = vmul.f32 0.2, %v8928_v53  ;;  %7559 = vmatpush1.bf16.msra.mxu0 %v13306_v22  ;;  %v6982_v31 = vmax.f32 %v8926_v56, %v6918_v32  ;;  %v6984_v17 = vmax.f32 %v8958_v57, %v6920_v3 }
 0x3a0   : > { %v6924_v5 = vmul.f32 0.2, %v8960_v34  ;;  %v6985_v13 = vmax.f32 %v8927_v54, %v6921_v44  ;;  %7560 = vmatprep.subr.bf16.mxu0 %v13313_v23  ;;  %v13755_v44 = vld [vmem:[#allocation9_spill] sm:$0xff] }
 0x3a1   : > { %v6987_v21 = vmax.f32 %v8959_v4, %v6923_v0  ;;  %v6986_v30 = vmax.f32 %v8928_v53, %v6922_v1  ;;  %v5730_v33 = vpop.f32.mrb[28].mxu0  ;;  %v6860_v6 = vpop.f32.mrb[28].mxu1  ;;  %v10691_v0 = vld [vmem:[%s13735_s5 + $0x20] sm:$0xff]   ;;  %v10692_v1 = vld [vmem:[%s13735_s5 + $0x68] sm:$0xff]  }
 0x3a2   : > { %v6988_v15 = vmax.f32 %v8960_v34, %v6924_v5  ;;  %v8929_v60 = vadd.f32 %v5730_v33, %v13381_v40  ;;  %v8961_v10 = vadd.f32 %v6860_v6, %v13383_v41  ;;  %v5732_v18 = vpop.f32.mrb[29].mxu0  ;;  %v6862_v36 = vpop.f32.mrb[29].mxu1  ;;  %v7021_v37 = vpack.c.bf16 %v6985_v13, %v6981_v35  ;;  %v13754_v34 = vld [vmem:[#allocation7_spill] sm:$0xff]  ;;  %v10693_v5 = vld [vmem:[%s13735_s5 + $0x28] sm:$0xff]   ;;  %v10696_v13 = vld [vmem:[%s13735_s5 + $0x78] sm:$0xff]  }
 0x3a3   : > { %v7023_v22 = vpack.c.bf16 %v6987_v21, %v6983_v9  ;;  %v8930_v39 = vadd.f32 %v5732_v18, %v13387_v42  ;;  %v8962_v45 = vadd.f32 %v6862_v36, %v13389_v43  ;;  %v5734_v46 = vpop.f32.mrb[30].mxu0  ;;  %v6864_v23 = vpop.f32.mrb[30].mxu1  ;;  %7561 = vmatpush1.bf16.msra.mxu0 %v13318_v24  ;;  %v7022_v8 = vpack.c.bf16 %v6986_v30, %v6982_v31  ;;  %v10694_v35 = vld [vmem:[%s13735_s5 + $0x70] sm:$0xff]   ;;  %v10697_v21 = vld [vmem:[%s13735_s5 + $0x38] sm:$0xff]   ;;  %v7093_v31 = vld [vmem:[%s13734_s4] sm:$0x3] }
 0x3a4   : > { %v7024_v49 = vpack.c.bf16 %v6988_v15, %v6984_v17  ;;  %v6925_v50 = vmul.f32 0.2, %v8929_v60  ;;  %v6927_v12 = vmul.f32 0.2, %v8961_v10  ;;  %v8931_v62 = vadd.f32 %v5734_v46, %v13381_v40  ;;  %v5736_v19 = vpop.f32.mrb[31].mxu0  ;;  %v6866_v56 = vpop.f32.mrb[31].mxu1  ;;  %7562 = vmatprep.subr.bf16.mxu0 %v13325_v25 }
 0x3a5   : > { %v8963_v55 = vadd.f32 %v6864_v23, %v13383_v41  ;;  %v6926_v57 = vmul.f32 0.2, %v8930_v39  ;;  %v6928_v51 = vmul.f32 0.2, %v8962_v45  ;;  %v8932_v20 = vadd.f32 %v5736_v19, %v13387_v42  ;;  %7517 = vmatprep.mubr.bf16.mxu0 %v7022_v8  ;;  %v10695_v9 = vld [vmem:[%s13735_s5 + $0x30] sm:$0xff]   ;;  %v13756_v17 = vld [vmem:[#allocation8_spill] sm:$0xff] }
 0x3a6   : > { %v8964_v47 = vadd.f32 %v6866_v56, %v13389_v43  ;;  %7630 = vmatprep.mubr.bf16.mxu1 %v7024_v49  ;;  %v6929_v24 = vmul.f32 0.2, %v8931_v62  ;;  %7518 = vmatmul.mubr.bf16.gmra.mrb[56].mxu0 %v7021_v37  ;;  %v6989_v41 = vmax.f32 %v8929_v60, %v6925_v50  ;;  %v6991_v38 = vmax.f32 %v8961_v10, %v6927_v12 }
 0x3a7   : > { %v6931_v48 = vmul.f32 0.2, %v8963_v55  ;;  %7631 = vmatmul.mubr.bf16.gmra.mrb[40].mxu1 %v7023_v22  ;;  %v6930_v11 = vmul.f32 0.2, %v8932_v20  ;;  %7563 = vmatpush1.bf16.msra.mxu0 %v13330_v26  ;;  %v6990_v4 = vmax.f32 %v8930_v39, %v6926_v57  ;;  %v6992_v42 = vmax.f32 %v8962_v45, %v6928_v51  ;;  %v13752_v26 = vld [vmem:[#allocation5_spill] sm:$0xff] }
 0x3a8   : > { %v6932_v40 = vmul.f32 0.2, %v8964_v47  ;;  %v6993_v54 = vmax.f32 %v8931_v62, %v6929_v24  ;;  %7564 = vmatprep.subr.bf16.mxu0 %v13337_v27  ;;  %v13753_v27 = vld [vmem:[#allocation6_spill] sm:$0xff]  ;;  %v13757_v30 = vsub.s32 0, %v13756_v17  ;;  %v13758_v33 = vsub.s32 1, %v13756_v17 }
 0x3a9   : > { %v6995_v25 = vmax.f32 %v8963_v55, %v6931_v48  ;;  %v6994_v14 = vmax.f32 %v8932_v20, %v6930_v11 }
 0x3aa   : > { %v6996_v43 = vmax.f32 %v8964_v47, %v6932_v40  ;;  %v7025_v7 = vpack.c.bf16 %v6993_v54, %v6989_v41  ;;  %v13563_v15 = vrot.slane %v7093_v31, %v13757_v30  ;;  %v13567_v6 = vrot.slane %v7093_v31, %v13758_v33 }
 0x3ab   : > { %v7027_v32 = vpack.c.bf16 %v6995_v25, %v6991_v38  ;;  %7565 = vmatpush1.bf16.msra.mxu0 %v13342_v28  ;;  %v7026_v3 = vpack.c.bf16 %v6994_v14, %v6990_v4  ;;  %v10682_v28 = vld [vmem:[%s13735_s5 + $0x40] sm:$0xff]  }
 0x3ac   : > { %v7028_v53 = vpack.c.bf16 %v6996_v43, %v6992_v42  ;;  %7566 = vmatprep.subr.bf16.mxu0 %v13349_v29  ;;  %v10683_v29 = vld [vmem:[%s13735_s5] sm:$0xff]   ;;  %8805 = vmatprep.subr.bf16.mxu1 %v10682_v28 }
 0x3ad   : > { %7527 = vmatprep.mubr.bf16.mxu0 %v7026_v3  ;;  %8806 = vmatpush3.bf16.msra.mxu1 %v10683_v29 }
 0x3ae   : > { %7640 = vmatprep.mubr.bf16.mxu1 %v7028_v53  ;;  %7528 = vmatmul.mubr.bf16.gmra.mrb[60].mxu0 %v7025_v7 }
 0x3af   : > { %7641 = vmatmul.mubr.bf16.gmra.mrb[44].mxu1 %v7027_v32  ;;  %7567 = vmatpush1.bf16.msra.mxu0 %v13752_v26 }
 0x3b0   : > { %7570 = vmatprep.mubr.bf16.mxu0 %v13405_v58  ;;  %7568 = vmatprep.subr.bf16.mxu0 %v13753_v27  ;;  %v10684_v58 = vld [vmem:[%s13735_s5 + $0x48] sm:$0xff]  }
 0x3b1   : > { %8807 = vmatprep.subr.bf16.mxu1 %v10684_v58 }
 0x3b3   : > { %7569 = vmatpush1.bf16.msra.mxu0 %v13754_v34 }
 0x3b6   : > { %7571 = vmatmul.mubr.bf16.vlgmr.msra.gmra.mrb[32].mxu0 %v13755_v44 }
 0x3b7   : > { %7580 = vmatprep.mubr.bf16.mxu0 %v13420_v59  ;;  %v10686_v59 = vld [vmem:[%s13735_s5 + $0x50] sm:$0xff]  }
 0x3be   : > { %7581 = vmatmul.mubr.bf16.gmra.mrb[36].mxu0 %v13415_v52  ;;  %v10685_v52 = vld [vmem:[%s13735_s5 + $0x8] sm:$0xff]  }
 0x3bf   : > { %7590 = vmatprep.mubr.bf16.mxu0 %v13436_v61  ;;  %8808 = vmatpush3.bf16.msra.mxu1 %v10685_v52  ;;  %v10688_v61 = vld [vmem:[%s13735_s5 + $0x58] sm:$0xff]  }
 0x3c0   : > { %8809 = vmatprep.subr.bf16.mxu1 %v10686_v59 }
 0x3c6   : > { %7591 = vmatmul.mubr.bf16.gmra.mrb[40].mxu0 %v13431_v2  ;;  %v10687_v2 = vld [vmem:[%s13735_s5 + $0x10] sm:$0xff]  }
 0x3c7   : > { %7600 = vmatprep.mubr.bf16.mxu0 %v13452_v63  ;;  %8810 = vmatpush3.bf16.msra.mxu1 %v10687_v2  ;;  %v10690_v63 = vld [vmem:[%s13735_s5 + $0x60] sm:$0xff]  }
 0x3c8   : > { %8811 = vmatprep.subr.bf16.mxu1 %v10688_v61 }
 0x3ce   : > { %7601 = vmatmul.mubr.bf16.gmra.mrb[44].mxu0 %v13447_v16  ;;  %v10689_v16 = vld [vmem:[%s13735_s5 + $0x18] sm:$0xff]  }
 0x3cf   : > { %8812 = vmatpush3.bf16.msra.mxu1 %v10689_v16 }
 0x3d0   : > { %8813 = vmatprep.subr.bf16.mxu1 %v10690_v63 }
 0x3d3   : > { %8814 = vmatpush3.bf16.msra.mxu1 %v10691_v0 }
 0x3d4   : > { %8815 = vmatprep.subr.bf16.mxu1 %v10692_v1 }
 0x3d7   : > { %8816 = vmatpush3.bf16.msra.mxu1 %v10693_v5 }
 0x3d8   : > { %8817 = vmatprep.subr.bf16.mxu1 %v10694_v35 }
 0x3db   : > { %8818 = vmatpush3.bf16.msra.mxu1 %v10695_v9 }
 0x3dc   : > { %8819 = vmatprep.subr.bf16.mxu1 %v10696_v13 }
 0x3df   : > { %8820 = vmatpush3.bf16.msra.mxu1 %v10697_v21 }
 0x469   : > { %v7499_v60 = vpop.f32.mrb[48].mxu0 }
 0x46a   : > { %v7612_v10 = vpop.f32.mrb[32].mxu1  ;;  %v7500_v18 = vadd.f32 %v7499_v60, %v13563_v15  ;;  %v7501_v36 = vpop.f32.mrb[49].mxu0 }
 0x46b   : > { %v7614_v37 = vpop.f32.mrb[33].mxu1  ;;  %v7502_v22 = vadd.f32 %v7501_v36, %v13567_v6  ;;  %v7503_v39 = vpop.f32.mrb[50].mxu0 }
 0x46c   : > { %v7616_v45 = vpop.f32.mrb[34].mxu1  ;;  %v7613_v46 = vadd.f32 %v7612_v10, %v7500_v18  ;;  %v7504_v23 = vadd.f32 %v7503_v39, %v13563_v15  ;;  %v7505_v8 = vpop.f32.mrb[51].mxu0 }
 0x46d   : > { %v7618_v49 = vpop.f32.mrb[35].mxu1  ;;  %v7615_v50 = vadd.f32 %v7614_v37, %v7502_v22  ;;  %v7506_v12 = vadd.f32 %v7505_v8, %v13567_v6 }
 0x46e   : > { %v7667_v62 = vmul.f32 0.2, %v7613_v46  ;;  %v7617_v55 = vadd.f32 %v7616_v45, %v7504_v23 }
 0x46f   : > { %v7668_v19 = vmul.f32 0.2, %v7615_v50  ;;  %v7619_v56 = vadd.f32 %v7618_v49, %v7506_v12 }
 0x470   : > { %v7669_v57 = vmul.f32 0.2, %v7617_v55  ;;  %v7699_v24 = vmax.f32 %v7613_v46, %v7667_v62 }
 0x471   : > { %v7670_v51 = vmul.f32 0.2, %v7619_v56  ;;  %v7509_v20 = vpop.f32.mrb[52].mxu0  ;;  %v7700_v38 = vmax.f32 %v7615_v50, %v7668_v19 }
 0x472   : > { %v7622_v47 = vpop.f32.mrb[36].mxu1  ;;  %v7701_v48 = vmax.f32 %v7617_v55, %v7669_v57  ;;  %v7510_v11 = vadd.f32 %v7509_v20, %v13563_v15  ;;  %v7511_v40 = vpop.f32.mrb[53].mxu0 }
 0x473   : > { %v7624_v41 = vpop.f32.mrb[37].mxu1  ;;  %v7702_v54 = vmax.f32 %v7619_v56, %v7670_v51  ;;  %v7512_v25 = vadd.f32 %v7511_v40, %v13567_v6  ;;  %v7513_v4 = vpop.f32.mrb[54].mxu0 }
 0x474   : > { %v7626_v42 = vpop.f32.mrb[38].mxu1  ;;  %v7623_v14 = vadd.f32 %v7622_v47, %v7510_v11  ;;  %v7514_v43 = vadd.f32 %v7513_v4, %v13563_v15  ;;  %v7515_v7 = vpop.f32.mrb[55].mxu0  ;;  %v13576_v3 = vpack.c.bf16 %v7701_v48, %v7699_v24 }
 0x475   : > { %v7628_v32 = vpop.f32.mrb[39].mxu1  ;;  %v7625_v53 = vadd.f32 %v7624_v41, %v7512_v25  ;;  %v7516_v26 = vadd.f32 %v7515_v7, %v13567_v6  ;;  %v13579_v27 = vpack.c.bf16 %v7702_v54, %v7700_v38 }
 0x476   : > { %v7671_v34 = vmul.f32 0.2, %v7623_v14  ;;  %v7627_v44 = vadd.f32 %v7626_v42, %v7514_v43 }
 0x477   : > { %v7672_v28 = vmul.f32 0.2, %v7625_v53  ;;  %v7629_v29 = vadd.f32 %v7628_v32, %v7516_v26 }
 0x478   : > { %v7673_v58 = vmul.f32 0.2, %v7627_v44  ;;  %v7703_v61 = vmax.f32 %v7623_v14, %v7671_v34 }
 0x479   : > { %v7674_v52 = vmul.f32 0.2, %v7629_v29  ;;  %v7519_v59 = vpop.f32.mrb[56].mxu0  ;;  %v7704_v5 = vmax.f32 %v7625_v53, %v7672_v28 }
 0x47a   : > { %v7632_v2 = vpop.f32.mrb[40].mxu1  ;;  %v7705_v16 = vmax.f32 %v7627_v44, %v7673_v58  ;;  %v7520_v63 = vadd.f32 %v7519_v59, %v13563_v15  ;;  %v7521_v0 = vpop.f32.mrb[57].mxu0 }
 0x47b   : > { %v7634_v1 = vpop.f32.mrb[41].mxu1  ;;  %v7706_v35 = vmax.f32 %v7629_v29, %v7674_v52  ;;  %v7522_v9 = vadd.f32 %v7521_v0, %v13567_v6  ;;  %v7523_v13 = vpop.f32.mrb[58].mxu0 }
 0x47c   : > { %v7636_v21 = vpop.f32.mrb[42].mxu1  ;;  %v7633_v31 = vadd.f32 %v7632_v2, %v7520_v63  ;;  %v7524_v17 = vadd.f32 %v7523_v13, %v13563_v15  ;;  %v7525_v30 = vpop.f32.mrb[59].mxu0  ;;  %v13584_v60 = vpack.c.bf16 %v7705_v16, %v7703_v61 }
 0x47d   : > { %v7638_v33 = vpop.f32.mrb[43].mxu1  ;;  %v7635_v10 = vadd.f32 %v7634_v1, %v7522_v9  ;;  %v7526_v18 = vadd.f32 %v7525_v30, %v13567_v6  ;;  %v13587_v36 = vpack.c.bf16 %v7706_v35, %v7704_v5 }
 0x47e   : > { %v7675_v37 = vmul.f32 0.2, %v7633_v31  ;;  %v7637_v22 = vadd.f32 %v7636_v21, %v7524_v17 }
 0x47f   : > { %v7676_v39 = vmul.f32 0.2, %v7635_v10  ;;  %v7639_v45 = vadd.f32 %v7638_v33, %v7526_v18 }
 0x480   : > { %v7677_v46 = vmul.f32 0.2, %v7637_v22  ;;  %v7707_v50 = vmax.f32 %v7633_v31, %v7675_v37 }
 0x481   : > { %v7678_v23 = vmul.f32 0.2, %v7639_v45  ;;  %v7529_v8 = vpop.f32.mrb[60].mxu0  ;;  %v7708_v56 = vmax.f32 %v7635_v10, %v7676_v39 }
 0x482   : > { %v7642_v49 = vpop.f32.mrb[44].mxu1  ;;  %v7709_v12 = vmax.f32 %v7637_v22, %v7677_v46  ;;  %v7530_v62 = vadd.f32 %v7529_v8, %v13563_v15  ;;  %v7531_v55 = vpop.f32.mrb[61].mxu0 }
 0x483   : > { %v7644_v19 = vpop.f32.mrb[45].mxu1  ;;  %v7710_v57 = vmax.f32 %v7639_v45, %v7678_v23  ;;  %v7532_v51 = vadd.f32 %v7531_v55, %v13567_v6  ;;  %v7533_v20 = vpop.f32.mrb[62].mxu0 }
 0x484   : > { %v7646_v47 = vpop.f32.mrb[46].mxu1  ;;  %v7643_v24 = vadd.f32 %v7642_v49, %v7530_v62  ;;  %v7534_v48 = vadd.f32 %v7533_v20, %v13563_v15  ;;  %v7535_v11 = vpop.f32.mrb[63].mxu0  ;;  %v13592_v41 = vpack.c.bf16 %v7709_v12, %v7707_v50 }
 0x485   : > { %v7648_v40 = vpop.f32.mrb[47].mxu1  ;;  %v7645_v38 = vadd.f32 %v7644_v19, %v7532_v51  ;;  %v7536_v54 = vadd.f32 %v7535_v11, %v13567_v6  ;;  %v13595_v25 = vpack.c.bf16 %v7710_v57, %v7708_v56 }
 0x486   : > { %v7679_v4 = vmul.f32 0.2, %v7643_v24  ;;  %v7647_v42 = vadd.f32 %v7646_v47, %v7534_v48 }
 0x487   : > { %v7680_v14 = vmul.f32 0.2, %v7645_v38  ;;  %v7649_v43 = vadd.f32 %v7648_v40, %v7536_v54 }
 0x488   : > { %v7681_v7 = vmul.f32 0.2, %v7647_v42  ;;  %v7711_v26 = vmax.f32 %v7643_v24, %v7679_v4 }
 0x489   : > { %v7682_v32 = vmul.f32 0.2, %v7649_v43  ;;  %v7572_v53 = vpop.f32.mrb[32].mxu0  ;;  %v7712_v29 = vmax.f32 %v7645_v38, %v7680_v14 }
 0x48a   : > { %v7713_v34 = vmax.f32 %v7647_v42, %v7681_v7  ;;  %v8965_v44 = vadd.f32 %v7572_v53, %v13563_v15  ;;  %v7574_v28 = vpop.f32.mrb[33].mxu0 }
 0x48b   : > { %v7714_v58 = vmax.f32 %v7649_v43, %v7682_v32  ;;  %v8966_v52 = vadd.f32 %v7574_v28, %v13567_v6  ;;  %v7576_v59 = vpop.f32.mrb[34].mxu0 }
 0x48c   : > { %v7651_v2 = vmul.f32 0.2, %v8965_v44  ;;  %v8967_v61 = vadd.f32 %v7576_v59, %v13563_v15  ;;  %v7578_v16 = vpop.f32.mrb[35].mxu0  ;;  %v13600_v63 = vpack.c.bf16 %v7713_v34, %v7711_v26 }
 0x48d   : > { %v7652_v0 = vmul.f32 0.2, %v8966_v52  ;;  %v8968_v1 = vadd.f32 %v7578_v16, %v13567_v6  ;;  %v13603_v5 = vpack.c.bf16 %v7714_v58, %v7712_v29 }
 0x48e   : > { %v7653_v35 = vmul.f32 0.2, %v8967_v61  ;;  %v7683_v13 = vmax.f32 %v8965_v44, %v7651_v2 }
 0x48f   : > { %v7654_v9 = vmul.f32 0.2, %v8968_v1  ;;  %v7684_v31 = vmax.f32 %v8966_v52, %v7652_v0 }
 0x490   : > { %v7685_v21 = vmax.f32 %v8967_v61, %v7653_v35 }
 0x491   : > { %v7686_v17 = vmax.f32 %v8968_v1, %v7654_v9  ;;  %v7582_v30 = vpop.f32.mrb[36].mxu0 }
 0x492   : > { %v7715_v33 = vpack.c.bf16 %v7685_v21, %v7683_v13  ;;  %v8969_v10 = vadd.f32 %v7582_v30, %v13563_v15  ;;  %v7584_v18 = vpop.f32.mrb[37].mxu0 }
 0x493   : > { %v8970_v37 = vadd.f32 %v7584_v18, %v13567_v6  ;;  %v7586_v22 = vpop.f32.mrb[38].mxu0  ;;  %v7716_v39 = vpack.c.bf16 %v7686_v17, %v7684_v31 }
 0x494   : > { %v7655_v45 = vmul.f32 0.2, %v8969_v10  ;;  %v8971_v46 = vadd.f32 %v7586_v22, %v13563_v15  ;;  %v7588_v23 = vpop.f32.mrb[39].mxu0 }
 0x495   : > { %v7656_v8 = vmul.f32 0.2, %v8970_v37  ;;  %v8972_v49 = vadd.f32 %v7588_v23, %v13567_v6  ;;  %7898 = vmatprep.mubr.bf16.mxu1 %v7716_v39 }
 0x496   : > { %v7657_v50 = vmul.f32 0.2, %v8971_v46  ;;  %7899 = vmatmul.mubr.bf16.vlgmr.msra.gmra.mrb[48].mxu1 %v7715_v33  ;;  %v7687_v62 = vmax.f32 %v8969_v10, %v7655_v45 }
 0x497   : > { %v7658_v12 = vmul.f32 0.2, %v8972_v49  ;;  %v7688_v19 = vmax.f32 %v8970_v37, %v7656_v8 }
 0x498   : > { %v7689_v55 = vmax.f32 %v8971_v46, %v7657_v50 }
 0x499   : > { %v7690_v56 = vmax.f32 %v8972_v49, %v7658_v12  ;;  %v7592_v57 = vpop.f32.mrb[40].mxu0 }
 0x49a   : > { %v8973_v51 = vadd.f32 %v7592_v57, %v13563_v15  ;;  %v7594_v20 = vpop.f32.mrb[41].mxu0  ;;  %v7717_v47 = vpack.c.bf16 %v7689_v55, %v7687_v62 }
 0x49b   : > { %v8974_v24 = vadd.f32 %v7594_v20, %v13567_v6  ;;  %v7596_v48 = vpop.f32.mrb[42].mxu0  ;;  %v7718_v11 = vpack.c.bf16 %v7690_v56, %v7688_v19 }
 0x49c   : > { %v7659_v40 = vmul.f32 0.2, %v8973_v51  ;;  %v8975_v38 = vadd.f32 %v7596_v48, %v13563_v15  ;;  %v7598_v54 = vpop.f32.mrb[43].mxu0 }
 0x49d   : > { %v7660_v4 = vmul.f32 0.2, %v8974_v24  ;;  %v8976_v42 = vadd.f32 %v7598_v54, %v13567_v6  ;;  %7906 = vmatprep.mubr.bf16.mxu1 %v7718_v11 }
 0x49e   : > { %v7661_v14 = vmul.f32 0.2, %v8975_v38  ;;  %7907 = vmatmul.mubr.bf16.gmra.mrb[52].mxu1 %v7717_v47  ;;  %v7691_v7 = vmax.f32 %v8973_v51, %v7659_v40 }
 0x49f   : > { %v7662_v43 = vmul.f32 0.2, %v8976_v42  ;;  %v7692_v53 = vmax.f32 %v8974_v24, %v7660_v4 }
 0x4a0   : > { %v7693_v32 = vmax.f32 %v8975_v38, %v7661_v14 }
 0x4a1   : > { %v7694_v26 = vmax.f32 %v8976_v42, %v7662_v43  ;;  %v7602_v34 = vpop.f32.mrb[44].mxu0 }
 0x4a2   : > { %v8977_v44 = vadd.f32 %v7602_v34, %v13563_v15  ;;  %v7604_v28 = vpop.f32.mrb[45].mxu0  ;;  %v7719_v29 = vpack.c.bf16 %v7693_v32, %v7691_v7 }
 0x4a3   : > { %v8978_v58 = vadd.f32 %v7604_v28, %v13567_v6  ;;  %v7606_v52 = vpop.f32.mrb[46].mxu0  ;;  %v7720_v59 = vpack.c.bf16 %v7694_v26, %v7692_v53 }
 0x4a4   : > { %v7663_v2 = vmul.f32 0.2, %v8977_v44  ;;  %v8979_v61 = vadd.f32 %v7606_v52, %v13563_v15  ;;  %v7608_v16 = vpop.f32.mrb[47].mxu0 }
 0x4a5   : > { %v7664_v0 = vmul.f32 0.2, %v8978_v58  ;;  %v8980_v1 = vadd.f32 %v7608_v16, %v13567_v6  ;;  %7914 = vmatprep.mubr.bf16.mxu1 %v7720_v59  ;;  %v13631_v6 = vld [vmem:[%s13736_s6] ss:$0 sm:$0xff] }
 0x4a6   : > { %v7665_v35 = vmul.f32 0.2, %v8979_v61  ;;  %7915 = vmatmul.mubr.bf16.gmra.mrb[56].mxu1 %v7719_v29  ;;  %v7695_v13 = vmax.f32 %v8977_v44, %v7663_v2 }
 0x4a7   : > { %v7666_v9 = vmul.f32 0.2, %v8980_v1  ;;  %v7696_v31 = vmax.f32 %v8978_v58, %v7664_v0 }
 0x4a8   : > { %v7697_v21 = vmax.f32 %v8979_v61, %v7665_v35 }
 0x4a9   : > { %v7698_v17 = vmax.f32 %v8980_v1, %v7666_v9 }
 0x4aa   : > { %v7721_v30 = vpack.c.bf16 %v7697_v21, %v7695_v13 }
 0x4ab   : > { %v7722_v33 = vpack.c.bf16 %v7698_v17, %v7696_v31 }
 0x4ad   : > { %7922 = vmatprep.mubr.bf16.mxu1 %v7722_v33 }
 0x4ae   : > { %7923 = vmatmul.mubr.bf16.gmra.mrb[60].mxu1 %v7721_v30 }
 0x4af   : > { %7930 = vmatprep.mubr.bf16.mxu1 %v13579_v27 }
 0x4b6   : > { %7931 = vmatmul.mubr.bf16.gmra.mrb[64].mxu1 %v13576_v3 }
 0x4b7   : > { %7938 = vmatprep.mubr.bf16.mxu1 %v13587_v36 }
 0x4be   : > { %7939 = vmatmul.mubr.bf16.gmra.mrb[68].mxu1 %v13584_v60 }
 0x4bf   : > { %7946 = vmatprep.mubr.bf16.mxu1 %v13595_v25 }
 0x4c6   : > { %7947 = vmatmul.mubr.bf16.gmra.mrb[72].mxu1 %v13592_v41 }
 0x4c7   : > { %7954 = vmatprep.mubr.bf16.mxu1 %v13603_v5 }
 0x4ce   : > { %7955 = vmatmul.mubr.bf16.gmra.mrb[76].mxu1 %v13600_v63 }
 0x569   : > { %v8821_v15 = vpop.f32.mrb[48].mxu1 }
 0x56a   : > { %v8822_v3 = vpop.f32.mrb[49].mxu1 }
 0x56b   : > { %v8823_v27 = vadd.f32 %v8822_v3, %v8821_v15  ;;  %v8824_v60 = vpop.f32.mrb[50].mxu1 }
 0x56c   : > { %v8825_v36 = vpop.f32.mrb[51].mxu1 }
 0x56d   : > { %v7901_v25 = vadd.f32 %v8823_v27, %v13631_v6  ;;  %v8826_v41 = vadd.f32 %v8825_v36, %v8824_v60 }
 0x56f   : > { %7963 = vst [vmem:[%s13634_s19] sm:$0xff] %v7901_v25  ;;  %v7904_v63 = vadd.f32 %v8826_v41, %v13631_v6 }
 0x571   : > { %7964 = vst [vmem:[%s13634_s19 + $0x8] sm:$0xff] %v7904_v63  ;;  %v8827_v5 = vpop.f32.mrb[52].mxu1 }
 0x572   : > { %v8828_v10 = vpop.f32.mrb[53].mxu1 }
 0x573   : > { %v8829_v18 = vadd.f32 %v8828_v10, %v8827_v5  ;;  %v8830_v37 = vpop.f32.mrb[54].mxu1 }
 0x574   : > { %v8831_v22 = vpop.f32.mrb[55].mxu1 }
 0x575   : > { %v7909_v39 = vadd.f32 %v8829_v18, %v13631_v6  ;;  %v8832_v45 = vadd.f32 %v8831_v22, %v8830_v37 }
 0x577   : > { %7965 = vst [vmem:[%s13634_s19 + $0x10] sm:$0xff] %v7909_v39  ;;  %v7912_v46 = vadd.f32 %v8832_v45, %v13631_v6 }
 0x579   : > { %7966 = vst [vmem:[%s13634_s19 + $0x18] sm:$0xff] %v7912_v46  ;;  %v8833_v23 = vpop.f32.mrb[56].mxu1 }
 0x57a   : > { %v8834_v8 = vpop.f32.mrb[57].mxu1 }
 0x57b   : > { %v8835_v49 = vadd.f32 %v8834_v8, %v8833_v23  ;;  %v8836_v50 = vpop.f32.mrb[58].mxu1 }
 0x57c   : > { %v8837_v12 = vpop.f32.mrb[59].mxu1 }
 0x57d   : > { %v7917_v62 = vadd.f32 %v8835_v49, %v13631_v6  ;;  %v8838_v55 = vadd.f32 %v8837_v12, %v8836_v50 }
 0x57f   : > { %7967 = vst [vmem:[%s13634_s19 + $0x20] sm:$0xff] %v7917_v62  ;;  %v7920_v19 = vadd.f32 %v8838_v55, %v13631_v6 }
 0x581   : > { %7968 = vst [vmem:[%s13634_s19 + $0x28] sm:$0xff] %v7920_v19  ;;  %v8839_v56 = vpop.f32.mrb[60].mxu1 }
 0x582   : > { %v8840_v57 = vpop.f32.mrb[61].mxu1 }
 0x583   : > { %v8841_v51 = vadd.f32 %v8840_v57, %v8839_v56  ;;  %v8842_v20 = vpop.f32.mrb[62].mxu1 }
 0x584   : > { %v8843_v47 = vpop.f32.mrb[63].mxu1 }
 0x585   : > { %v7925_v24 = vadd.f32 %v8841_v51, %v13631_v6  ;;  %v8844_v48 = vadd.f32 %v8843_v47, %v8842_v20 }
 0x587   : > { %7969 = vst [vmem:[%s13634_s19 + $0x30] sm:$0xff] %v7925_v24  ;;  %v7928_v11 = vadd.f32 %v8844_v48, %v13631_v6 }
 0x589   : > { %7970 = vst [vmem:[%s13634_s19 + $0x38] sm:$0xff] %v7928_v11  ;;  %v8845_v40 = vpop.f32.mrb[64].mxu1 }
 0x58a   : > { %v8846_v38 = vpop.f32.mrb[65].mxu1 }
 0x58b   : > { %v8847_v54 = vadd.f32 %v8846_v38, %v8845_v40  ;;  %v8848_v4 = vpop.f32.mrb[66].mxu1 }
 0x58c   : > { %v8849_v42 = vpop.f32.mrb[67].mxu1 }
 0x58d   : > { %v7933_v14 = vadd.f32 %v8847_v54, %v13631_v6  ;;  %v8850_v43 = vadd.f32 %v8849_v42, %v8848_v4 }
 0x58f   : > { %7971 = vst [vmem:[%s13634_s19 + $0x40] sm:$0xff] %v7933_v14  ;;  %v7936_v7 = vadd.f32 %v8850_v43, %v13631_v6 }
 0x591   : > { %7972 = vst [vmem:[%s13634_s19 + $0x48] sm:$0xff] %v7936_v7  ;;  %v8851_v32 = vpop.f32.mrb[68].mxu1 }
 0x592   : > { %v8852_v53 = vpop.f32.mrb[69].mxu1 }
 0x593   : > { %v8853_v26 = vadd.f32 %v8852_v53, %v8851_v32  ;;  %v8854_v34 = vpop.f32.mrb[70].mxu1 }
 0x594   : > { %v8855_v44 = vpop.f32.mrb[71].mxu1 }
 0x595   : > { %v7941_v28 = vadd.f32 %v8853_v26, %v13631_v6  ;;  %v8856_v29 = vadd.f32 %v8855_v44, %v8854_v34 }
 0x597   : > { %7973 = vst [vmem:[%s13634_s19 + $0x50] sm:$0xff] %v7941_v28  ;;  %v7944_v58 = vadd.f32 %v8856_v29, %v13631_v6 }
 0x599   : > { %7974 = vst [vmem:[%s13634_s19 + $0x58] sm:$0xff] %v7944_v58  ;;  %v8857_v52 = vpop.f32.mrb[72].mxu1 }
 0x59a   : > { %v8858_v59 = vpop.f32.mrb[73].mxu1 }
 0x59b   : > { %v8859_v2 = vadd.f32 %v8858_v59, %v8857_v52  ;;  %v8860_v61 = vpop.f32.mrb[74].mxu1 }
 0x59c   : > { %v8861_v16 = vpop.f32.mrb[75].mxu1 }
 0x59d   : > { %v7949_v0 = vadd.f32 %v8859_v2, %v13631_v6  ;;  %v8862_v1 = vadd.f32 %v8861_v16, %v8860_v61 }
 0x59f   : > { %7975 = vst [vmem:[%s13634_s19 + $0x60] sm:$0xff] %v7949_v0  ;;  %v7952_v35 = vadd.f32 %v8862_v1, %v13631_v6 }
 0x5a1   : > { %7976 = vst [vmem:[%s13634_s19 + $0x68] sm:$0xff] %v7952_v35  ;;  %v8863_v9 = vpop.f32.mrb[76].mxu1 }
 0x5a2   : > { %v8864_v13 = vpop.f32.mrb[77].mxu1 }
 0x5a3   : > { %v8865_v21 = vadd.f32 %v8864_v13, %v8863_v9  ;;  %v8866_v31 = vpop.f32.mrb[78].mxu1  ;;  %7986 = sbr.rel (!%p10843_p5) target bundleno = 1478 (0x5c6), region = 52 }
 0x5a4   : > { %v8867_v17 = vpop.f32.mrb[79].mxu1 }
 0x5a5   : > { %v7957_v30 = vadd.f32 %v8865_v21, %v13631_v6  ;;  %v8868_v33 = vadd.f32 %v8867_v17, %v8866_v31 }
 0x5a7   : > { %7977 = vst [vmem:[%s13634_s19 + $0x70] sm:$0xff] %v7957_v30  ;;  %v7960_v15 = vadd.f32 %v8868_v33, %v13631_v6 }
 0x5a9   : > { %7978 = vst [vmem:[%s13634_s19 + $0x78] sm:$0xff] %v7960_v15 }
 0x5aa   : > { %s13764_s20 = smov (!%p7989_p11, %s7988_s20), 16 }
 0x5ab   : > { %s13674_s8 = sshll.u32 %s13764_s20, 7 }
 0x5ac   : > { %s7993_s17 = ssub.s32 2048, %s13674_s8 }
 0x5ad   : > { %7994 = vsyncadd %s13669_s29, %s7993_s17  ;;  %p8798_p12 = scmp.ne.s32.totalorder %s13674_s8, 0  ;;  %s8804_s21 = sshll.u32 %s10826_s28, 11 }
 0x5ae   : > { %s13683_s23 = scalar_lea.hbm %s13737_s7, %s8804_s21  ;;  %s7999_s15 = sshll.u32 %s13634_s19, 4  ;;  %s13686_s15 = int_to_ptr.vmem [resolvable:$true] %s7999_s15 }
 0x5af   : > { %s10698_s9 = scalar_lea.vmem %s13686_s15, %s13674_s8  ;;  %s10762_s13 = smov [#allocation2]  }
 0x5b0   : > { %p10699_p13 = scmp.ne.s32.totalorder %s13686_s15, %s10698_s9  ;;  %s10702_s14 = sshll.u32 %s10762_s13, 4  ;;  %s10703_s14 = int_to_ptr.vmem [resolvable:$false] %s10702_s14 }
 0x5b1   : > { %s10704_s28 = scalar_lea.vmem %s10703_s14, 4096  ;;  %p10705_p2 = scmp.lt.s32.totalorder %s13686_s15, %s10703_s14 }
 0x5b2   : > { %p10700_p0 = pnand %p10699_p13, %p8798_p12  ;;  %p10706_p3 = scmp.lt.s32.totalorder %s10704_s28, %s10698_s9 }
 0x5b4   : > { %p10701_p1 = pneg %p10700_p0  ;;  %p10707_p4 = por %p10706_p3, %p10705_p2 }
 0x5b6   : > { %p10708_p5 = pnand %p10707_p4, %p10701_p1 }
 0x5b8   : > { %10711 = shalt.err (!%p10708_p5)
}
 0x5b9   : > { %s10712_s16 = scalar_lea.hbm %s13683_s23, %s13674_s8  ;;  %s10716_s20 = scalar_lea.hbm %s13737_s7, 3200 }
 0x5ba   : > { %p10713_p7 = scmp.ne.s32.totalorder %s13683_s23, %s10712_s16  ;;  %p10717_p10 = scmp.lt.u32.totalorder %s13683_s23, %s13737_s7 }
 0x5bb   : > { %p10718_p11 = scmp.lt.u32.totalorder %s10716_s20, %s10712_s16  ;;  %p10720_p0 = scmp.lt.u32.totalorder %s10712_s16, %s13683_s23 }
 0x5bc   : > { %p10714_p8 = pnand %p10713_p7, %p8798_p12 }
 0x5bd   : > { %p10719_p13 = por %p10718_p11, %p10717_p10 }
 0x5be   : > { %p10715_p9 = pneg %p10714_p8 }
 0x5bf   : > { %p10721_p1 = por %p10720_p0, %p10719_p13 }
 0x5c1   : > { %p10722_p2 = pnand %p10721_p1, %p10715_p9 }
 0x5c3   : > { %10725 = shalt.err (!%p10722_p2)
}
 0x5c4   : > { %s10763_s22 = smov 128   ;;  %s10764_s11 = smov 8  }
 0x5c5   : > { %8005 = dma.vmem_to_hbm [thread:$0]  (%p8798_p12), %s13686_s15, %s13674_s8, %s13683_s23, %s13669_s29, %s10763_s22, %s10763_s22, %s10764_s11  }
 0x5c6 PF: > { %p9611_p3 = scmp.ge.s32.totalorder %s10760_s27, 2  ;;  %s8014_s9 = sand.u32 1, %s10748_s24  }
 0x5c7   : > { %s8015_s13 = scalar_lea.sflag [#allocation3], %s8014_s9 }
 0x5c8   : > { %p9608_p4 = pnand %p9611_p3, %p10847_p6 }
 0x5ca   : > { %10743 = dma.done.wait (!%p9608_p4), %s8015_s13, 2048  }
 0x5cb   : > { %10745 = vsyncadd (!%p9608_p4), %s8015_s13, 4294965248  ;;  %p17_p5 = scmp.ge.s32.totalorder %s10830_s30, 4   ;;  %s13759_s24 = smov %s10752_s25 }
 0x5cc   : > { %s13760_s25 = smov %s10756_s26  ;;  %s13761_s26 = smov %s10841_s10 }
 0x5cd   : > { %s13762_s27 = smov %s10830_s30  ;;  %19 = sbr.rel (!%p17_p5) target bundleno = 3 (0x3), region = 83 }
 0x5d4   :  { %8020 = vsyncpa [#allocation3], 1 }
 0x5d5   :  { %8022 = vsyncpa [#allocation3 + $0x1], 1 }

</bundles_post_ra>
